<compile_context>
chip_gen: v6e
topology: v6e:2x2x1
jax: 0.10.0
libtpu: 0.0.40
codegen_flags: <defaults>
</compile_context>

<pallas_src>
import jax
import jax.numpy as jnp
from jax.experimental import pallas as pl
from jax.experimental.pallas import tpu as pltpu

K_RAW = 784          # input features (fed unpadded; Mosaic lane-pads internally)
HIDDEN = 512
OUT = 10             # true output features
OUT_PAD = 128        # padded to one full lane tile for an unmasked store


def mlp_kernel(x_ref, w0_ref, b0_ref, w1_ref, b1_ref, w2_ref, b2_ref,
               w3_ref, b3_ref, out_ref):
    # 4 fused MXU matmuls: bf16 operands, f32 accumulation, f32 bias + ReLU,
    # recast to bf16 between layers so every matmul runs at bf16 MXU rate.
    # Dropout layers are identity (eval mode).
    x = x_ref[...].astype(jnp.bfloat16)          # VPU cast, hidden under MXU

    h = jnp.dot(x, w0_ref[...],
                preferred_element_type=jnp.float32) + b0_ref[...]
    h = jnp.maximum(h, 0.0).astype(jnp.bfloat16)

    h = jnp.dot(h, w1_ref[...],
                preferred_element_type=jnp.float32) + b1_ref[...]
    h = jnp.maximum(h, 0.0).astype(jnp.bfloat16)

    h = jnp.dot(h, w2_ref[...],
                preferred_element_type=jnp.float32) + b2_ref[...]
    h = jnp.maximum(h, 0.0).astype(jnp.bfloat16)

    y = jnp.dot(h, w3_ref[...],
                preferred_element_type=jnp.float32) + b3_ref[...]
    out_ref[...] = y.astype(out_ref.dtype)       # lane-dense (tile_b, 128) bf16 store


def _round_up(n, m):
    return ((n + m - 1) // m) * m


def _tile_cap():
    """Max batch tile by generation (fits comfortably under the scoped VMEM default)."""
    try:
        kind = jax.devices()[0].device_kind.lower()
    except Exception:
        return 512
    if "v6" in kind or "v7" in kind:
        return 1024           # 32 MiB scoped default; ~15 MB used at tile_b=1024
    return 512                # v5e (16 MiB scoped default) and older


def _choose_tiling(B):
    cap = _tile_cap()
    # >= 2 grid steps so ("parallel",) can shard the batch across v7x's two TCs;
    # tile_b a multiple of 16 for bf16 (16, 128) sublane packing.
    tile_b = max(16, min(cap, _round_up(pl.cdiv(B, 2), 16)))
    b_pad = max(_round_up(B, tile_b), 2 * tile_b)
    nb = b_pad // tile_b
    return tile_b, b_pad, nb


def prepare_params(params):
    """One-time conversion: bf16 weights (final layer lane-padded), f32 biases.

    Call once; reuse the result for every mlp_forward call so no per-call
    weight cast/pad passes hit HBM.
    """
    w3 = jnp.zeros((HIDDEN, OUT_PAD), jnp.bfloat16)
    w3 = w3.at[:, :OUT].set(params["w3"].astype(jnp.bfloat16))
    b3 = jnp.zeros((1, OUT_PAD), jnp.float32)
    b3 = b3.at[:, :OUT].set(params["b3"].astype(jnp.float32))
    return {
        "w0": params["w0"].astype(jnp.bfloat16),
        "w1": params["w1"].astype(jnp.bfloat16),
        "w2": params["w2"].astype(jnp.bfloat16),
        "w3": w3,
        "b0": params["b0"].astype(jnp.float32),
        "b1": params["b1"].astype(jnp.float32),
        "b2": params["b2"].astype(jnp.float32),
        "b3": b3,
    }


def _build_pallas_call(tile_b, nb, b_pad, single_buffer_weights):
    def resident(shape):
        # Constant block index -> fetched once, stays resident in VMEM.
        if single_buffer_weights:
            return pl.BlockSpec(shape, lambda i: (0, 0),
                                pipeline_mode=pl.Buffered(1))
        return pl.BlockSpec(shape, lambda i: (0, 0))

    weight_elems = K_RAW * HIDDEN + 2 * HIDDEN * HIDDEN + HIDDEN * OUT_PAD
    flops = 2 * b_pad * weight_elems
    bytes_accessed = (
        b_pad * K_RAW * 4                 # x (f32, read directly, no pre-pass)
        + weight_elems * 2                # bf16 weights
        + (3 * HIDDEN + OUT_PAD) * 4      # f32 biases
        + b_pad * OUT_PAD * 2             # bf16 output writeback
    )

    return pl.pallas_call(
        mlp_kernel,
        out_shape=jax.ShapeDtypeStruct((b_pad, OUT_PAD), jnp.bfloat16),
        grid_spec=pltpu.PrefetchScalarGridSpec(
            num_scalar_prefetch=0,
            grid=(nb,),
            in_specs=[
                # x tiles stream (double-buffered); last dim 784 == full array dim.
                pl.BlockSpec((tile_b, K_RAW), lambda i: (i, 0)),
                resident((K_RAW, HIDDEN)),   resident((1, HIDDEN)),
                resident((HIDDEN, HIDDEN)),  resident((1, HIDDEN)),
                resident((HIDDEN, HIDDEN)),  resident((1, HIDDEN)),
                resident((HIDDEN, OUT_PAD)), resident((1, OUT_PAD)),
            ],
            out_specs=pl.BlockSpec((tile_b, OUT_PAD), lambda i: (i, 0)),
        ),
        compiler_params=pltpu.CompilerParams(
            dimension_semantics=("parallel",),   # shard batch axis across TCs (v7x)
        ),
        cost_estimate=pl.CostEstimate(
            flops=flops, transcendentals=0, bytes_accessed=bytes_accessed),
    )


def mlp_forward(x, prepared):
    """x: (B, 784) float32.  prepared: output of prepare_params()."""
    B = x.shape[0]
    tile_b, b_pad, nb = _choose_tiling(B)

    # Only pad the batch remainder (no K padding, no activation cast pass).
    if b_pad != B:
        x = jnp.pad(x, ((0, b_pad - B), (0, 0)))

    args = (x,
            prepared["w0"], prepared["b0"],
            prepared["w1"], prepared["b1"],
            prepared["w2"], prepared["b2"],
            prepared["w3"], prepared["b3"])

    try:
        out_padded = _build_pallas_call(tile_b, nb, b_pad, True)(*args)
    except Exception:
        # Fallback if this jax build rejects pl.Buffered(1) single-buffering.
        out_padded = _build_pallas_call(tile_b, nb, b_pad, False)(*args)

    # Strip batch / output-feature padding; padded rows hold bias-propagated
    # garbage by design and must not be consumed.
    return out_padded[:B, :OUT].astype(jnp.float32)


def init_params(key):
    """Deterministic synthetic parameters matching nn.Linear shapes."""
    sizes = [(784, 512), (512, 512), (512, 512), (512, 10)]
    params = {}
    for i, (fan_in, fan_out) in enumerate(sizes):
        key, kw, kb = jax.random.split(key, 3)
        bound = 1.0 / jnp.sqrt(fan_in)
        # PyTorch Linear stores W as (out, in); we keep the transposed (in, out)
        # layout so the kernel does x @ W directly.
        params[f"w{i}"] = jax.random.uniform(
            kw, (fan_in, fan_out), jnp.float32, -bound, bound)
        params[f"b{i}"] = jax.random.uniform(
            kb, (1, fan_out), jnp.float32, -bound, bound)
    return params


def reference_forward(x, params):
    """Pure-JAX reference matching the kernel's bf16-operand / f32-accum scheme."""
    h = x.astype(jnp.bfloat16)
    for i in range(3):
        h = jnp.dot(h, params[f"w{i}"].astype(jnp.bfloat16),
                    preferred_element_type=jnp.float32) + params[f"b{i}"]
        h = jnp.maximum(h, 0.0).astype(jnp.bfloat16)
    y = jnp.dot(h, params["w3"].astype(jnp.bfloat16),
                preferred_element_type=jnp.float32) + params["b3"]
    return y


if __name__ == "__main__":
    key = jax.random.PRNGKey(0)
    key, kx, kp = jax.random.split(key, 3)

    B = 8
    x = jax.random.normal(kx, (B, K_RAW), jnp.float32)
    params = init_params(kp)
    prepared = prepare_params(params)     # one-time weight prep

    out = mlp_forward(x, prepared)
    out = jax.block_until_ready(out)

    ref = reference_forward(x, params)
    assert out.shape == (B, OUT), out.shape
    assert jnp.allclose(out, ref, atol=2e-2, rtol=2e-2), "mismatch vs reference"

    print("KERNEL_OK")
</pallas_src>

<mosaic_0001>
module attributes {stable_mosaic.version = 11 : i64} {
  func.func @mlp_kernel(%arg0: i32, %arg1: memref<16x784xf32, #tpu.memory_space<vmem>>, %arg2: memref<784x512xbf16, #tpu.memory_space<vmem>>, %arg3: memref<1x512xf32, #tpu.memory_space<vmem>>, %arg4: memref<512x512xbf16, #tpu.memory_space<vmem>>, %arg5: memref<1x512xf32, #tpu.memory_space<vmem>>, %arg6: memref<512x512xbf16, #tpu.memory_space<vmem>>, %arg7: memref<1x512xf32, #tpu.memory_space<vmem>>, %arg8: memref<512x128xbf16, #tpu.memory_space<vmem>>, %arg9: memref<1x128xf32, #tpu.memory_space<vmem>>, %arg10: memref<16x128xbf16, #tpu.memory_space<vmem>>) attributes {dimension_semantics = [#tpu.dimension_semantics<parallel>], iteration_bounds = array<i64: 2>, scalar_prefetch = 0 : i64, scratch_operands = 0 : i64, tpu.core_type = #tpu.core_type<tc>, window_params = [{transform_indices = @transform_0, window_bounds = array<i64: 16, 784>}, {pipeline_mode = #tpu.pipeline_mode<synchronous>, transform_indices = @transform_1, window_bounds = array<i64: 784, 512>}, {pipeline_mode = #tpu.pipeline_mode<synchronous>, transform_indices = @transform_2, window_bounds = array<i64: 1, 512>}, {pipeline_mode = #tpu.pipeline_mode<synchronous>, transform_indices = @transform_3, window_bounds = array<i64: 512, 512>}, {pipeline_mode = #tpu.pipeline_mode<synchronous>, transform_indices = @transform_4, window_bounds = array<i64: 1, 512>}, {pipeline_mode = #tpu.pipeline_mode<synchronous>, transform_indices = @transform_5, window_bounds = array<i64: 512, 512>}, {pipeline_mode = #tpu.pipeline_mode<synchronous>, transform_indices = @transform_6, window_bounds = array<i64: 1, 512>}, {pipeline_mode = #tpu.pipeline_mode<synchronous>, transform_indices = @transform_7, window_bounds = array<i64: 512, 128>}, {pipeline_mode = #tpu.pipeline_mode<synchronous>, transform_indices = @transform_8, window_bounds = array<i64: 1, 128>}, {transform_indices = @transform_9, window_bounds = array<i64: 16, 128>}]} {
    %c0 = arith.constant 0 : index
    %c0_0 = arith.constant 0 : index
    %0 = vector.load %arg1[%c0, %c0_0] : memref<16x784xf32, #tpu.memory_space<vmem>>, vector<16x784xf32>
    %1 = arith.truncf %0 : vector<16x784xf32> to vector<16x784xbf16>
    %c0_1 = arith.constant 0 : index
    %c0_2 = arith.constant 0 : index
    %2 = vector.load %arg2[%c0_1, %c0_2] : memref<784x512xbf16, #tpu.memory_space<vmem>>, vector<784x512xbf16>
    %cst = arith.constant dense<0.000000e+00> : vector<16x512xf32>
    %3 = tpu.matmul %1, %2, %cst {dimension_numbers = #tpu.dot_dimension_numbers<[1], [0], [0], [1], [0, 0, 1, 1], [], []>} : vector<16x784xbf16>, vector<784x512xbf16>, vector<16x512xf32> -> vector<16x512xf32>
    %c0_3 = arith.constant 0 : index
    %c0_4 = arith.constant 0 : index
    %4 = vector.load %arg3[%c0_3, %c0_4] : memref<1x512xf32, #tpu.memory_space<vmem>>, vector<1x512xf32>
    %5 = vector.broadcast %4 : vector<1x512xf32> to vector<16x512xf32>
    %6 = arith.addf %3, %5 : vector<16x512xf32>
    %cst_5 = arith.constant 0.000000e+00 : f32
    %7 = vector.broadcast %cst_5 : f32 to vector<16x512xf32>
    %8 = arith.maximumf %6, %7 : vector<16x512xf32>
    %9 = arith.truncf %8 : vector<16x512xf32> to vector<16x512xbf16>
    %c0_6 = arith.constant 0 : index
    %c0_7 = arith.constant 0 : index
    %10 = vector.load %arg4[%c0_6, %c0_7] : memref<512x512xbf16, #tpu.memory_space<vmem>>, vector<512x512xbf16>
    %cst_8 = arith.constant dense<0.000000e+00> : vector<16x512xf32>
    %11 = tpu.matmul %9, %10, %cst_8 {dimension_numbers = #tpu.dot_dimension_numbers<[1], [0], [0], [1], [0, 0, 1, 1], [], []>} : vector<16x512xbf16>, vector<512x512xbf16>, vector<16x512xf32> -> vector<16x512xf32>
    %c0_9 = arith.constant 0 : index
    %c0_10 = arith.constant 0 : index
    %12 = vector.load %arg5[%c0_9, %c0_10] : memref<1x512xf32, #tpu.memory_space<vmem>>, vector<1x512xf32>
    %13 = vector.broadcast %12 : vector<1x512xf32> to vector<16x512xf32>
    %14 = arith.addf %11, %13 : vector<16x512xf32>
    %cst_11 = arith.constant 0.000000e+00 : f32
    %15 = vector.broadcast %cst_11 : f32 to vector<16x512xf32>
    %16 = arith.maximumf %14, %15 : vector<16x512xf32>
    %17 = arith.truncf %16 : vector<16x512xf32> to vector<16x512xbf16>
    %c0_12 = arith.constant 0 : index
    %c0_13 = arith.constant 0 : index
    %18 = vector.load %arg6[%c0_12, %c0_13] : memref<512x512xbf16, #tpu.memory_space<vmem>>, vector<512x512xbf16>
    %cst_14 = arith.constant dense<0.000000e+00> : vector<16x512xf32>
    %19 = tpu.matmul %17, %18, %cst_14 {dimension_numbers = #tpu.dot_dimension_numbers<[1], [0], [0], [1], [0, 0, 1, 1], [], []>} : vector<16x512xbf16>, vector<512x512xbf16>, vector<16x512xf32> -> vector<16x512xf32>
    %c0_15 = arith.constant 0 : index
    %c0_16 = arith.constant 0 : index
    %20 = vector.load %arg7[%c0_15, %c0_16] : memref<1x512xf32, #tpu.memory_space<vmem>>, vector<1x512xf32>
    %21 = vector.broadcast %20 : vector<1x512xf32> to vector<16x512xf32>
    %22 = arith.addf %19, %21 : vector<16x512xf32>
    %cst_17 = arith.constant 0.000000e+00 : f32
    %23 = vector.broadcast %cst_17 : f32 to vector<16x512xf32>
    %24 = arith.maximumf %22, %23 : vector<16x512xf32>
    %25 = arith.truncf %24 : vector<16x512xf32> to vector<16x512xbf16>
    %c0_18 = arith.constant 0 : index
    %c0_19 = arith.constant 0 : index
    %26 = vector.load %arg8[%c0_18, %c0_19] : memref<512x128xbf16, #tpu.memory_space<vmem>>, vector<512x128xbf16>
    %cst_20 = arith.constant dense<0.000000e+00> : vector<16x128xf32>
    %27 = tpu.matmul %25, %26, %cst_20 {dimension_numbers = #tpu.dot_dimension_numbers<[1], [0], [0], [1], [0, 0, 1, 1], [], []>} : vector<16x512xbf16>, vector<512x128xbf16>, vector<16x128xf32> -> vector<16x128xf32>
    %c0_21 = arith.constant 0 : index
    %c0_22 = arith.constant 0 : index
    %28 = vector.load %arg9[%c0_21, %c0_22] : memref<1x128xf32, #tpu.memory_space<vmem>>, vector<1x128xf32>
    %29 = vector.broadcast %28 : vector<1x128xf32> to vector<16x128xf32>
    %30 = arith.addf %27, %29 : vector<16x128xf32>
    %31 = arith.truncf %30 : vector<16x128xf32> to vector<16x128xbf16>
    %c0_23 = arith.constant 0 : index
    %c0_24 = arith.constant 0 : index
    %32 = vector.load %arg10[%c0_23, %c0_24] : memref<16x128xbf16, #tpu.memory_space<vmem>>, vector<16x128xbf16>
    tpu.vector_store %arg10[%c0_23, %c0_24], %31 {strides = array<i32>} : memref<16x128xbf16, #tpu.memory_space<vmem>>, vector<16x128xbf16>,
    return
  }
  func.func @transform_0(%arg0: i32) -> (i32, i32) {
    %c0_i32 = arith.constant 0 : i32
    %c0_i32_0 = arith.constant 0 : i32
    return %arg0, %c0_i32 : i32, i32
  }
  func.func @transform_1(%arg0: i32) -> (i32, i32) {
    %c0_i32 = arith.constant 0 : i32
    %c0_i32_0 = arith.constant 0 : i32
    %c0_i32_1 = arith.constant 0 : i32
    return %c0_i32, %c0_i32_0 : i32, i32
  }
  func.func @transform_2(%arg0: i32) -> (i32, i32) {
    %c0_i32 = arith.constant 0 : i32
    %c0_i32_0 = arith.constant 0 : i32
    %c0_i32_1 = arith.constant 0 : i32
    return %c0_i32, %c0_i32_0 : i32, i32
  }
  func.func @transform_3(%arg0: i32) -> (i32, i32) {
    %c0_i32 = arith.constant 0 : i32
    %c0_i32_0 = arith.constant 0 : i32
    %c0_i32_1 = arith.constant 0 : i32
    return %c0_i32, %c0_i32_0 : i32, i32
  }
  func.func @transform_4(%arg0: i32) -> (i32, i32) {
    %c0_i32 = arith.constant 0 : i32
    %c0_i32_0 = arith.constant 0 : i32
    %c0_i32_1 = arith.constant 0 : i32
    return %c0_i32, %c0_i32_0 : i32, i32
  }
  func.func @transform_5(%arg0: i32) -> (i32, i32) {
    %c0_i32 = arith.constant 0 : i32
    %c0_i32_0 = arith.constant 0 : i32
    %c0_i32_1 = arith.constant 0 : i32
    return %c0_i32, %c0_i32_0 : i32, i32
  }
  func.func @transform_6(%arg0: i32) -> (i32, i32) {
    %c0_i32 = arith.constant 0 : i32
    %c0_i32_0 = arith.constant 0 : i32
    %c0_i32_1 = arith.constant 0 : i32
    return %c0_i32, %c0_i32_0 : i32, i32
  }
  func.func @transform_7(%arg0: i32) -> (i32, i32) {
    %c0_i32 = arith.constant 0 : i32
    %c0_i32_0 = arith.constant 0 : i32
    %c0_i32_1 = arith.constant 0 : i32
    return %c0_i32, %c0_i32_0 : i32, i32
  }
  func.func @transform_8(%arg0: i32) -> (i32, i32) {
    %c0_i32 = arith.constant 0 : i32
    %c0_i32_0 = arith.constant 0 : i32
    %c0_i32_1 = arith.constant 0 : i32
    return %c0_i32, %c0_i32_0 : i32, i32
  }
  func.func @transform_9(%arg0: i32) -> (i32, i32) {
    %c0_i32 = arith.constant 0 : i32
    %c0_i32_0 = arith.constant 0 : i32
    return %arg0, %c0_i32 : i32, i32
  }
}

module attributes {stable_mosaic.version = 11 : i64} {
  func.func @mlp_kernel(%arg0: i32, %arg1: memref<16x784xf32, #tpu.memory_space<vmem>>, %arg2: memref<784x512xbf16, #tpu.memory_space<vmem>>, %arg3: memref<1x512xf32, #tpu.memory_space<vmem>>, %arg4: memref<512x512xbf16, #tpu.memory_space<vmem>>, %arg5: memref<1x512xf32, #tpu.memory_space<vmem>>, %arg6: memref<512x512xbf16, #tpu.memory_space<vmem>>, %arg7: memref<1x512xf32, #tpu.memory_space<vmem>>, %arg8: memref<512x128xbf16, #tpu.memory_space<vmem>>, %arg9: memref<1x128xf32, #tpu.memory_space<vmem>>, %arg10: memref<16x128xbf16, #tpu.memory_space<vmem>>) attributes {dimension_semantics = [#tpu.dimension_semantics<parallel>], iteration_bounds = array<i64: 2>, scalar_prefetch = 0 : i64, scratch_operands = 0 : i64, tpu.core_type = #tpu.core_type<tc>, window_params = [{transform_indices = @transform_0, window_bounds = array<i64: 16, 784>}, {pipeline_mode = #tpu.pipeline_mode<synchronous>, transform_indices = @transform_1, window_bounds = array<i64: 784, 512>}, {pipeline_mode = #tpu.pipeline_mode<synchronous>, transform_indices = @transform_2, window_bounds = array<i64: 1, 512>}, {pipeline_mode = #tpu.pipeline_mode<synchronous>, transform_indices = @transform_3, window_bounds = array<i64: 512, 512>}, {pipeline_mode = #tpu.pipeline_mode<synchronous>, transform_indices = @transform_4, window_bounds = array<i64: 1, 512>}, {pipeline_mode = #tpu.pipeline_mode<synchronous>, transform_indices = @transform_5, window_bounds = array<i64: 512, 512>}, {pipeline_mode = #tpu.pipeline_mode<synchronous>, transform_indices = @transform_6, window_bounds = array<i64: 1, 512>}, {pipeline_mode = #tpu.pipeline_mode<synchronous>, transform_indices = @transform_7, window_bounds = array<i64: 512, 128>}, {pipeline_mode = #tpu.pipeline_mode<synchronous>, transform_indices = @transform_8, window_bounds = array<i64: 1, 128>}, {transform_indices = @transform_9, window_bounds = array<i64: 16, 128>}]} {
    %c0 = arith.constant 0 : index
    %c0_0 = arith.constant 0 : index
    %0 = vector.load %arg1[%c0, %c0_0] : memref<16x784xf32, #tpu.memory_space<vmem>>, vector<16x784xf32>
    %1 = arith.truncf %0 : vector<16x784xf32> to vector<16x784xbf16>
    %c0_1 = arith.constant 0 : index
    %c0_2 = arith.constant 0 : index
    %2 = vector.load %arg2[%c0_1, %c0_2] : memref<784x512xbf16, #tpu.memory_space<vmem>>, vector<784x512xbf16>
    %cst = arith.constant dense<0.000000e+00> : vector<16x512xf32>
    %3 = tpu.matmul %1, %2, %cst {dimension_numbers = #tpu.dot_dimension_numbers<[1], [0], [0], [1], [0, 0, 1, 1], [], []>} : vector<16x784xbf16>, vector<784x512xbf16>, vector<16x512xf32> -> vector<16x512xf32>
    %c0_3 = arith.constant 0 : index
    %c0_4 = arith.constant 0 : index
    %4 = vector.load %arg3[%c0_3, %c0_4] : memref<1x512xf32, #tpu.memory_space<vmem>>, vector<1x512xf32>
    %5 = vector.broadcast %4 : vector<1x512xf32> to vector<16x512xf32>
    %6 = arith.addf %3, %5 : vector<16x512xf32>
    %cst_5 = arith.constant 0.000000e+00 : f32
    %7 = vector.broadcast %cst_5 : f32 to vector<16x512xf32>
    %8 = arith.maximumf %6, %7 : vector<16x512xf32>
    %9 = arith.truncf %8 : vector<16x512xf32> to vector<16x512xbf16>
    %c0_6 = arith.constant 0 : index
    %c0_7 = arith.constant 0 : index
    %10 = vector.load %arg4[%c0_6, %c0_7] : memref<512x512xbf16, #tpu.memory_space<vmem>>, vector<512x512xbf16>
    %cst_8 = arith.constant dense<0.000000e+00> : vector<16x512xf32>
    %11 = tpu.matmul %9, %10, %cst_8 {dimension_numbers = #tpu.dot_dimension_numbers<[1], [0], [0], [1], [0, 0, 1, 1], [], []>} : vector<16x512xbf16>, vector<512x512xbf16>, vector<16x512xf32> -> vector<16x512xf32>
    %c0_9 = arith.constant 0 : index
    %c0_10 = arith.constant 0 : index
    %12 = vector.load %arg5[%c0_9, %c0_10] : memref<1x512xf32, #tpu.memory_space<vmem>>, vector<1x512xf32>
    %13 = vector.broadcast %12 : vector<1x512xf32> to vector<16x512xf32>
    %14 = arith.addf %11, %13 : vector<16x512xf32>
    %cst_11 = arith.constant 0.000000e+00 : f32
    %15 = vector.broadcast %cst_11 : f32 to vector<16x512xf32>
    %16 = arith.maximumf %14, %15 : vector<16x512xf32>
    %17 = arith.truncf %16 : vector<16x512xf32> to vector<16x512xbf16>
    %c0_12 = arith.constant 0 : index
    %c0_13 = arith.constant 0 : index
    %18 = vector.load %arg6[%c0_12, %c0_13] : memref<512x512xbf16, #tpu.memory_space<vmem>>, vector<512x512xbf16>
    %cst_14 = arith.constant dense<0.000000e+00> : vector<16x512xf32>
    %19 = tpu.matmul %17, %18, %cst_14 {dimension_numbers = #tpu.dot_dimension_numbers<[1], [0], [0], [1], [0, 0, 1, 1], [], []>} : vector<16x512xbf16>, vector<512x512xbf16>, vector<16x512xf32> -> vector<16x512xf32>
    %c0_15 = arith.constant 0 : index
    %c0_16 = arith.constant 0 : index
    %20 = vector.load %arg7[%c0_15, %c0_16] : memref<1x512xf32, #tpu.memory_space<vmem>>, vector<1x512xf32>
    %21 = vector.broadcast %20 : vector<1x512xf32> to vector<16x512xf32>
    %22 = arith.addf %19, %21 : vector<16x512xf32>
    %cst_17 = arith.constant 0.000000e+00 : f32
    %23 = vector.broadcast %cst_17 : f32 to vector<16x512xf32>
    %24 = arith.maximumf %22, %23 : vector<16x512xf32>
    %25 = arith.truncf %24 : vector<16x512xf32> to vector<16x512xbf16>
    %c0_18 = arith.constant 0 : index
    %c0_19 = arith.constant 0 : index
    %26 = vector.load %arg8[%c0_18, %c0_19] : memref<512x128xbf16, #tpu.memory_space<vmem>>, vector<512x128xbf16>
    %cst_20 = arith.constant dense<0.000000e+00> : vector<16x128xf32>
    %27 = tpu.matmul %25, %26, %cst_20 {dimension_numbers = #tpu.dot_dimension_numbers<[1], [0], [0], [1], [0, 0, 1, 1], [], []>} : vector<16x512xbf16>, vector<512x128xbf16>, vector<16x128xf32> -> vector<16x128xf32>
    %c0_21 = arith.constant 0 : index
    %c0_22 = arith.constant 0 : index
    %28 = vector.load %arg9[%c0_21, %c0_22] : memref<1x128xf32, #tpu.memory_space<vmem>>, vector<1x128xf32>
    %29 = vector.broadcast %28 : vector<1x128xf32> to vector<16x128xf32>
    %30 = arith.addf %27, %29 : vector<16x128xf32>
    %31 = arith.truncf %30 : vector<16x128xf32> to vector<16x128xbf16>
    %c0_23 = arith.constant 0 : index
    %c0_24 = arith.constant 0 : index
    %32 = vector.load %arg10[%c0_23, %c0_24] : memref<16x128xbf16, #tpu.memory_space<vmem>>, vector<16x128xbf16>
    tpu.vector_store %arg10[%c0_23, %c0_24], %31 {strides = array<i32>} : memref<16x128xbf16, #tpu.memory_space<vmem>>, vector<16x128xbf16>,
    return
  }
  func.func @transform_0(%arg0: i32) -> (i32, i32) {
    %c0_i32 = arith.constant 0 : i32
    %c0_i32_0 = arith.constant 0 : i32
    return %arg0, %c0_i32 : i32, i32
  }
  func.func @transform_1(%arg0: i32) -> (i32, i32) {
    %c0_i32 = arith.constant 0 : i32
    %c0_i32_0 = arith.constant 0 : i32
    %c0_i32_1 = arith.constant 0 : i32
    return %c0_i32, %c0_i32_0 : i32, i32
  }
  func.func @transform_2(%arg0: i32) -> (i32, i32) {
    %c0_i32 = arith.constant 0 : i32
    %c0_i32_0 = arith.constant 0 : i32
    %c0_i32_1 = arith.constant 0 : i32
    return %c0_i32, %c0_i32_0 : i32, i32
  }
  func.func @transform_3(%arg0: i32) -> (i32, i32) {
    %c0_i32 = arith.constant 0 : i32
    %c0_i32_0 = arith.constant 0 : i32
    %c0_i32_1 = arith.constant 0 : i32
    return %c0_i32, %c0_i32_0 : i32, i32
  }
  func.func @transform_4(%arg0: i32) -> (i32, i32) {
    %c0_i32 = arith.constant 0 : i32
    %c0_i32_0 = arith.constant 0 : i32
    %c0_i32_1 = arith.constant 0 : i32
    return %c0_i32, %c0_i32_0 : i32, i32
  }
  func.func @transform_5(%arg0: i32) -> (i32, i32) {
    %c0_i32 = arith.constant 0 : i32
    %c0_i32_0 = arith.constant 0 : i32
    %c0_i32_1 = arith.constant 0 : i32
    return %c0_i32, %c0_i32_0 : i32, i32
  }
  func.func @transform_6(%arg0: i32) -> (i32, i32) {
    %c0_i32 = arith.constant 0 : i32
    %c0_i32_0 = arith.constant 0 : i32
    %c0_i32_1 = arith.constant 0 : i32
    return %c0_i32, %c0_i32_0 : i32, i32
  }
  func.func @transform_7(%arg0: i32) -> (i32, i32) {
    %c0_i32 = arith.constant 0 : i32
    %c0_i32_0 = arith.constant 0 : i32
    %c0_i32_1 = arith.constant 0 : i32
    return %c0_i32, %c0_i32_0 : i32, i32
  }
  func.func @transform_8(%arg0: i32) -> (i32, i32) {
    %c0_i32 = arith.constant 0 : i32
    %c0_i32_0 = arith.constant 0 : i32
    %c0_i32_1 = arith.constant 0 : i32
    return %c0_i32, %c0_i32_0 : i32, i32
  }
  func.func @transform_9(%arg0: i32) -> (i32, i32) {
    %c0_i32 = arith.constant 0 : i32
    %c0_i32_0 = arith.constant 0 : i32
    return %arg0, %c0_i32 : i32, i32
  }
}

</mosaic_0001>

<bundles_post_ra>
// kernel: tpu_custom_call.1
= control target key start
LH: loop header
LB: loop body
LE: loop exit
PB: predicated region body
PF: predicated region fallthrough
CT: control target
= control target key end

     0   :  { %s6480_s0 = inlined_call_operand.hbm [shape: f32[32,784], index: 0, kind: input, shape index: {}]   ;;  %s6481_s1 = inlined_call_operand.hbm [shape: bf16[784,512], index: 1, kind: input, shape index: {}]   ;;  %s6482_s2 = inlined_call_operand.hbm [shape: f32[1,512], index: 2, kind: input, shape index: {}]   ;;  %s6483_s3 = inlined_call_operand.hbm [shape: bf16[512,512], index: 3, kind: input, shape index: {}]   ;;  %s6484_s4 = inlined_call_operand.vmem [shape: f32[1,512], index: 4, kind: input, shape index: {}]   ;;  %s6485_s5 = inlined_call_operand.hbm [shape: bf16[512,512], index: 5, kind: input, shape index: {}]   ;;  %s6486_s6 = inlined_call_operand.vmem [shape: f32[1,512], index: 6, kind: input, shape index: {}]   ;;  %s6487_s7 = inlined_call_operand.hbm [shape: bf16[512,128], index: 7, kind: input, shape index: {}]   ;;  %s6488_s8 = inlined_call_operand.vmem [shape: f32[1,128], index: 8, kind: input, shape index: {}]   ;;  %s6489_s9 = inlined_call_operand.hbm [shape: bf16[32,128], index: 9, kind: output, shape index: {}]  }
   0x1   :  { %6494 = sst [smem:[#allocation19_spill]] %s6481_s1 }
   0x2   :  { %6495 = sst [smem:[#allocation20_spill]] %s6482_s2 }
   0x3   :  { %6496 = sst [smem:[#allocation21_spill]] %s6483_s3 }
   0x4   :  { %14 = vsyncpa [#allocation3], 0 }
   0x5   :  { %16 = vsyncpa [#allocation3 + $0x1], 0 }
   0x6   :  { %17 = vsyncpa [#allocation6], 0 }
   0x7   :  { %18 = vsyncpa [#allocation9], 0 }
   0x8   :  { %19 = vsyncpa [#allocation12], 0 }
   0x9   :  { %20 = vsyncpa [#allocation4], 0 }
   0xa   :  { %22 = vsyncpa [#allocation4 + $0x1], 0  ;;  %s6128_s30 = smov 0   ;;  %s6130_s10 = smov 0  }
   0xb   :  { %s6132_s11 = smov 0   ;;  %s6134_s12 = smov 0  }
   0xc LB: > { %s6062_s13 = smov [#allocation5]   ;;  %s6149_s15 = sadd.s32 4294967295, %s6060_s12   ;;  %s6060_s12 = sphi %s6134_s12, %s6521_s12   ;;  %s6056_s11 = sphi %s6132_s11, %s6520_s11   ;;  %s6052_s10 = sphi %s6130_s10, %s6519_s10   ;;  %s6048_s30 = sphi %s6128_s30, %s6518_s30  }
   0xd   : > { %s265_s14 = sshll.u32 %s6062_s13, 4  ;;  %p4444_p0 = scmp.ge.s32.totalorder %s6060_s12, 1  ;;  %s266_s14 = int_to_ptr.vmem [resolvable:$true] %s265_s14 }
   0xe   : > { %p6490_p1 = scmp.eq.s32.totalorder %s6149_s15, 0  ;;  %p253_p2 = scmp.lt.s32.totalorder %s6060_s12, 3 }
   0xf   : > { %s6063_s17 = smov [#allocation8]   ;;  %s6064_s20 = smov [#allocation7]  }
  0x10   : > { %p6154_p3 = pnand %p4444_p0, %p253_p2  ;;  %s289_s18 = sshll.u32 %s6063_s17, 4  ;;  %s6167_s18 = int_to_ptr.vmem [resolvable:$true] %s289_s18 }
  0x11   : > { %s279_s21 = sshll.u32 %s6064_s20, 4  ;;  %s5837_s23 = scalar_lea.vmem %s266_s14, 25088  ;;  %s6169_s21 = int_to_ptr.vmem [resolvable:$true] %s279_s21 }
  0x12   : > { %s6497_s16 = scalar_select %p6154_p3, 1, 0 }
  0x13   : > { %p5034_p5 = pneg %p6154_p3  ;;  %p5838_p8 = scmp.ne.s32.totalorder %s266_s14, %s5837_s23 }
  0x14   : > { %p5845_p11 = scmp.lt.s32.totalorder %s266_s14, %s266_s14  ;;  %p5846_p12 = scmp.lt.s32.totalorder %s5837_s23, %s5837_s23 }
  0x15   : > { %p6163_p6 = pnand %p5034_p5, %p6490_p1 }
  0x16   : > { %p5847_p13 = por %p5846_p12, %p5845_p11 }
  0x17   : > { %p6173_p7 = pneg %p6163_p6 }
  0x19   : > { %p5840_p9 = pnand %p5838_p8, %p6173_p7 }
  0x1b   : > { %p5841_p10 = pneg %p5840_p9 }
  0x1d   : > { %p5848_p0 = pnand %p5847_p13, %p5841_p10 }
  0x1f   : > { %5851 = shalt.err (!%p5848_p0)
}
  0x20   : > { %s6065_s24 = smov 256   ;;  %s6066_s25 = smov 16  }
  0x21   : > { %s6500_s1 = sld [smem:[#allocation19_spill]]  ;;  %s5863_s28 = scalar_lea.vmem %s6167_s18, 16384 }
  0x22   : > { %p5864_p2 = scmp.ne.s32.totalorder %s6167_s18, %s5863_s28  ;;  %p5871_p9 = scmp.lt.s32.totalorder %s6167_s18, %s6167_s18 }
  0x23   : > { %p5872_p10 = scmp.lt.s32.totalorder %s5863_s28, %s5863_s28 }
  0x24   : > { %p5866_p5 = pnand %p5864_p2, %p6173_p7 }
  0x25   : > { %p5873_p11 = por %p5872_p10, %p5871_p9 }
  0x26   : > { %p5867_p8 = pneg %p5866_p5 }
  0x27   : > { %5037 = dma.hbm_to_vmem [thread:$0]  (!%p6163_p6), %s6500_s1, 25088, %s266_s14, [#allocation6], %s6065_s24, %s6065_s24, %s6066_s25  }
  0x28   : > { %p5874_p12 = pnand %p5873_p11, %p5867_p8 }
  0x2a   : > { %5877 = shalt.err (!%p5874_p12)
}
  0x2b   : > { %s6501_s3 = sld [smem:[#allocation21_spill]]  ;;  %s5889_s14 = scalar_lea.vmem %s6169_s21, 64 }
  0x2c   : > { %p5890_p13 = scmp.ne.s32.totalorder %s6169_s21, %s5889_s14  ;;  %p5897_p5 = scmp.lt.s32.totalorder %s6169_s21, %s6169_s21 }
  0x2d   : > { %p5898_p8 = scmp.lt.s32.totalorder %s5889_s14, %s5889_s14 }
  0x2e   : > { %p5892_p0 = pnand %p5890_p13, %p6173_p7 }
  0x2f   : > { %p5899_p9 = por %p5898_p8, %p5897_p5 }
  0x30   : > { %p5893_p2 = pneg %p5892_p0 }
  0x31   : > { %5043 = dma.hbm_to_vmem [thread:$0]  (!%p6163_p6), %s6501_s3, 16384, %s6167_s18, [#allocation9], %s6065_s24, %s6065_s24, %s6066_s25  }
  0x32   : > { %p5900_p10 = pnand %p5899_p9, %p5893_p2 }
  0x34   : > { %5903 = shalt.err (!%p5900_p10)
}
  0x35   : > { %s6502_s2 = sld [smem:[#allocation20_spill]]  ;;  %s6067_s18 = smov [#allocation10]  }
  0x36   : > { %s305_s23 = sshll.u32 %s6067_s18, 4  ;;  %s6068_s26 = smov [#allocation11]   ;;  %s306_s23 = int_to_ptr.vmem [resolvable:$true] %s305_s23 }
  0x37   : > { %s321_s27 = sshll.u32 %s6068_s26, 4  ;;  %s5915_s28 = scalar_lea.vmem %s306_s23, 16384  ;;  %s322_s27 = int_to_ptr.vmem [resolvable:$true] %s321_s27 }
  0x38   : > { %p5916_p11 = scmp.ne.s32.totalorder %s306_s23, %s5915_s28  ;;  %p5923_p0 = scmp.lt.s32.totalorder %s306_s23, %s306_s23 }
  0x39   : > { %p5924_p2 = scmp.lt.s32.totalorder %s5915_s28, %s5915_s28 }
  0x3a   : > { %p5918_p12 = pnand %p5916_p11, %p6173_p7 }
  0x3b   : > { %5040 = dma.hbm_to_vmem [thread:$0]  (!%p6163_p6), %s6502_s2, 64, %s6169_s21, [#allocation6]  }
  0x3c   : > { %p5919_p13 = pneg %p5918_p12  ;;  %p5925_p5 = por %p5924_p2, %p5923_p0 }
  0x3e   : > { %p5926_p8 = pnand %p5925_p5, %p5919_p13 }
  0x40   : > { %5929 = shalt.err (!%p5926_p8)
}
  0x41   : > { %5046 = dma.hbm_to_vmem [thread:$0]  (!%p6163_p6), %s6485_s5, 16384, %s306_s23, [#allocation9], %s6065_s24, %s6065_s24, %s6066_s25  }
  0x42   : > { %s5941_s13 = scalar_lea.vmem %s322_s27, 4096  ;;  %p5949_p12 = scmp.lt.s32.totalorder %s322_s27, %s322_s27 }
  0x43   : > { %p5942_p9 = scmp.ne.s32.totalorder %s322_s27, %s5941_s13  ;;  %p5950_p0 = scmp.lt.s32.totalorder %s5941_s13, %s5941_s13 }
  0x45   : > { %p5944_p10 = pnand %p5942_p9, %p6173_p7  ;;  %p5951_p13 = por %p5950_p0, %p5949_p12 }
  0x47   : > { %p5945_p11 = pneg %p5944_p10 }
  0x49   : > { %p5952_p2 = pnand %p5951_p13, %p5945_p11 }
  0x4b   : > { %5955 = shalt.err (!%p5952_p2)
}
  0x4c   : > { %s6069_s14 = smov 64   ;;  %s6070_s22 = smov 4  }
  0x4d   : > { %5049 = dma.hbm_to_vmem [thread:$0]  (!%p6163_p6), %s6487_s7, 4096, %s322_s27, [#allocation12], %s6069_s14, %s6069_s14, %s6070_s22  }
  0x4e   : > { %s4443_s17 = sadd.s32 4294967294, %s6060_s12   ;;  %s6233_s20 = sadd.s32 1, %s6060_s12  }
  0x4f   : > { %s35_s18 = sadd.s32 1, %s6056_s11  ;;  %s32_s23 = ssub.s32 %s6060_s12, %s6233_s20 }
  0x50   : > { %p42_p7 = scmp.ne.s32.totalorder %s6056_s11, %s6052_s10  ;;  %p33_p5 = scmp.eq.s32.totalorder %s32_s23, 0 }
  0x51   : > { %p43_p8 = scmp.eq.s32.totalorder %s6060_s12, 0  ;;  %p48_p9 = scmp.ne.s32.totalorder %s6052_s10, %s6048_s30 }
  0x52   : > { %p240_p10 = scmp.eq.s32.totalorder %s6149_s15, 1  ;;  %p246_p0 = scmp.eq.s32.totalorder %s4443_s17, 1 }
  0x53   : > { %s6245_s26 = scalar_select %p33_p5, %s6056_s11, %s35_s18  }
  0x54   : > { %p44_p11 = por %p43_p8, %p42_p7  ;;  %p6249_p12 = por %p6490_p1, %p48_p9 }
  0x55   : > { %p6253_p6 = por %p240_p10, %p42_p7  ;;  %p5063_p13 = scmp.lt.s32.totalorder %s6060_s12, 2 }
  0x56   : > { %s6503_s19 = scalar_select %p6249_p12, 1, 0 }
  0x57   : > { %s6504_s27 = scalar_select %p6253_p6, 1, 0 }
  0x58   : > { %s338_s28 = sand.u32 1, %s6056_s11   ;;  %p6259_p2 = por %p246_p0, %p48_p9 }
  0x59   : > { %s5007_s29 = smul.u32 112, %s338_s28  ;;  %p6263_p5 = pnand %p5063_p13, %p44_p11 }
  0x5a   : > { %s6505_s21 = scalar_select %p6259_p2, 1, 0 }
  0x5b   : > { %s5008_s14 = smul.u32 1792, %s6060_s12  ;;  %s342_s17 = scalar_lea.vmem [#allocation2], %s5007_s29 }
  0x5c   : > { %s350_s18 = sshll.u32 %s342_s17, 4  ;;  %s6275_s23 = scalar_lea.sflag [#allocation3], %s338_s28  ;;  %s6273_s18 = int_to_ptr.vmem [resolvable:$true] %s350_s18 }
  0x5d   : > { %s6271_s25 = scalar_lea.hbm %s6480_s0, %s5008_s14  ;;  %p5958_p8 = pneg %p6263_p5 }
  0x5e   : > { %s5956_s1 = scalar_lea.hbm %s6271_s25, 1792  ;;  %s5961_s14 = scalar_lea.hbm %s6480_s0, 3584 }
  0x5f   : > { %p5957_p7 = scmp.ne.s32.totalorder %s6271_s25, %s5956_s1  ;;  %p5962_p11 = scmp.lt.s32.totalorder %s6271_s25, %s6480_s0 }
  0x60   : > { %p5963_p0 = scmp.lt.s32.totalorder %s5961_s14, %s5956_s1 }
  0x61   : > { %p5959_p9 = pnand %p5958_p8, %p5957_p7 }
  0x62   : > { %p5964_p13 = por %p5963_p0, %p5962_p11 }
  0x63   : > { %p5960_p10 = pneg %p5959_p9 }
  0x65   : > { %p5965_p4 = pnand %p5964_p13, %p5960_p10 }
  0x67   : > { %5968 = shalt.err (!%p5965_p4)
}
  0x68   : > { %s5969_s28 = scalar_lea.vmem %s6273_s18, 1792  ;;  %s6071_s29 = smov [#allocation2]  }
  0x69   : > { %p5970_p1 = scmp.ne.s32.totalorder %s6273_s18, %s5969_s28  ;;  %s5974_s17 = sshll.u32 %s6071_s29, 4  ;;  %s5975_s17 = int_to_ptr.vmem [resolvable:$false] %s5974_s17 }
  0x6a   : > { %s5976_s2 = scalar_lea.vmem %s5975_s17, 3584  ;;  %p5977_p9 = scmp.lt.s32.totalorder %s6273_s18, %s5975_s17 }
  0x6b   : > { %p5972_p2 = pnand %p5970_p1, %p5958_p8  ;;  %p5978_p6 = scmp.lt.s32.totalorder %s5976_s2, %s5969_s28 }
  0x6d   : > { %p5973_p7 = pneg %p5972_p2  ;;  %p5979_p12 = por %p5978_p6, %p5977_p9 }
  0x6f   : > { %p5980_p3 = pnand %p5979_p12, %p5973_p7 }
  0x71   : > { %5983 = shalt.err (!%p5980_p3)
}
  0x72   : > { %s6072_s1 = smov 896   ;;  %s6073_s3 = smov 56  }
  0x73   : > { %5053 = dma.hbm_to_vmem [thread:$0]  (!%p6263_p5), %s6271_s25, 1792, %s6273_s18, %s6275_s23, %s6072_s1, %s6072_s1, %s6073_s3  }
  0x74   : > { %p6507_p1 = scmp.ne.s32.totalorder %s6497_s16, 0 }
  0x75   : > { %s6299_s14 = sand.u32 (!%p6507_p1), 1, %s6052_s10   ;;  %p6508_p3 = scmp.ne.s32.totalorder (!%p6507_p1), %s6503_s19, 0 }
  0x76   : > { %362 = sbr.rel (%p6507_p1) target bundleno = 1303 (0x517), region = 56  ;;  %s365_s24 = scalar_lea.sflag (!%p6507_p1), [#allocation3], %s6299_s14 }
  0x77   : > { %s5009_s22 = smul.u32 (!%p6507_p1), 112, %s6299_s14 }
  0x79   : > { %s6303_s28 = scalar_lea.vmem (!%p6507_p1), [#allocation2], %s5009_s22 }
  0x7b   : > { %6027 = dma.done.wait (%p6508_p3), %s365_s24, 1792  }
  0x7c   : > { %6029 = vsyncadd (%p6508_p3), %s365_s24, 4294965504  ;;  %p6509_p4 = scmp.eq.s32.totalorder %s6149_s15, 0 }
  0x7e   : > { %6031 = dma.done.wait (%p6509_p4), [#allocation6], 25152   ;;  %p6510_p12 = pmov %p6509_p4 }
  0x7f   : > { %p6511_p6 = pmov %p6509_p4 }
  0x80   : > { %6033 = vsyncadd (%p6510_p12), [#allocation6], 4294942144 }
  0x81   : > { %6035 = dma.done.wait (%p6511_p6), [#allocation9], 32768   ;;  %p6512_p2 = pmov %p6509_p4 }
  0x83   : > { %6037 = vsyncadd (%p6512_p2), [#allocation9], 4294934528  ;;  %p6513_p5 = pmov %p6512_p2 }
  0x84   : > { %p6514_p8 = pmov %p6512_p2 }
  0x85   : > { %6039 = dma.done.wait (%p6513_p5), [#allocation12], 4096  }
  0x86   : > { %6041 = vsyncadd (%p6514_p8), [#allocation12], 4294963200  ;;  %v5116_v0 = vld [vmem:[#allocation5 + $0xe4] ss:$16 sps:$4 sm:$0xff]   ;;  %v5120_v2 = vld [vmem:[#allocation5 + $0xe0] ss:$16 sps:$4 sm:$0xff]  }
  0x87   : > { %v5118_v1 = vld [vmem:[#allocation5 + $0x2e4] ss:$16 sps:$4 sm:$0xff]   ;;  %1649 = vmatprep.subr.bf16.mxu0 %v5116_v0  ;;  %v5121_v3 = vld [vmem:[#allocation5 + $0x2e0] ss:$16 sps:$4 sm:$0xff]   ;;  %v427_v46 = vld [vmem:[%s6303_s28 + $0x8] sm:$0xff]  ;;  %vm1645_vm0 = vcmask 130048  }
  0x88   : > { %1692 = vmatprep.subr.bf16.mxu1 %v5118_v1  ;;  %v5122_v4 = vld [vmem:[#allocation5 + $0xc4] ss:$16 sps:$4 sm:$0xff]   ;;  %1650 = vmatpush1.bf16.msra.mxu0 %v5120_v2  ;;  %v5126_v6 = vld [vmem:[#allocation5 + $0xc0] ss:$16 sps:$4 sm:$0xff]   ;;  %v429_v48 = vld [vmem:[%s6303_s28 + $0x18] sm:$0xff]  ;;  %s4460_s18 = sshll.u32 %s6299_s14, 3 }
  0x89   : > { %1693 = vmatpush1.bf16.msra.mxu1 %v5121_v3  ;;  %v5124_v5 = vld [vmem:[#allocation5 + $0x2c4] ss:$16 sps:$4 sm:$0xff]   ;;  %1651 = vmatprep.subr.bf16.mxu0 %v5122_v4  ;;  %v5127_v7 = vld [vmem:[#allocation5 + $0x2c0] ss:$16 sps:$4 sm:$0xff]   ;;  %s4957_s17 = sshll.u32 %s6149_s15, 7  ;;  %s422_s2 = scalar_lea.vmem [#allocation13], %s4460_s18 }
  0x8a   : > { %1694 = vmatprep.subr.bf16.mxu1 %v5124_v5  ;;  %v5128_v8 = vld [vmem:[#allocation5 + $0xa4] ss:$16 sps:$4 sm:$0xff]   ;;  %v5132_v10 = vld [vmem:[#allocation5 + $0xa0] ss:$16 sps:$4 sm:$0xff]   ;;  %s4322_s1 = sshll.u32 %s422_s2, 4  ;;  %s6435_s24 = scalar_lea.hbm %s6489_s9, %s4957_s17  ;;  %s6437_s1 = int_to_ptr.vmem [resolvable:$true] %s4322_s1 }
  0x8b   : > { %v5130_v9 = vld [vmem:[#allocation5 + $0x2a4] ss:$16 sps:$4 sm:$0xff]   ;;  %v5133_v11 = vld [vmem:[#allocation5 + $0x2a0] ss:$16 sps:$4 sm:$0xff]   ;;  %s5984_s16 = scalar_lea.vmem %s6437_s1, 128  ;;  %p6515_p11 = scmp.ne.s32.totalorder %s6504_s27, 0 }
  0x8c   : > { %1652 = vmatpush1.bf16.msra.mxu0 %v5126_v6  ;;  %v5134_v12 = vld [vmem:[#allocation5 + $0x84] ss:$16 sps:$4 sm:$0xff]   ;;  %v5138_v14 = vld [vmem:[#allocation5 + $0x80] ss:$16 sps:$4 sm:$0xff]   ;;  %p5985_p10 = scmp.ne.s32.totalorder %s6437_s1, %s5984_s16  ;;  %s6075_s15 = smov [#allocation13]  }
  0x8d   : > { %1695 = vmatpush1.bf16.msra.mxu1 %v5127_v7  ;;  %1653 = vmatprep.subr.bf16.mxu0 %v5128_v8  ;;  %v5136_v13 = vld [vmem:[#allocation5 + $0x284] ss:$16 sps:$4 sm:$0xff]   ;;  %v5139_v15 = vld [vmem:[#allocation5 + $0x280] ss:$16 sps:$4 sm:$0xff]   ;;  %v433_v7 = vld [vmem:[%s6303_s28 + $0x38] sm:$0xff]  ;;  %s5988_s19 = sshll.u32 %s6075_s15, 4  ;;  %s5989_s19 = int_to_ptr.vmem [resolvable:$false] %s5988_s19 }
  0x8e   : > { %1696 = vmatprep.subr.bf16.mxu1 %v5130_v9  ;;  %v5140_v16 = vld [vmem:[#allocation5 + $0x64] ss:$16 sps:$4 sm:$0xff]   ;;  %v5144_v18 = vld [vmem:[#allocation5 + $0x60] ss:$16 sps:$4 sm:$0xff]   ;;  %v435_v9 = vld [vmem:[%s6303_s28 + $0x48] sm:$0xff]  ;;  %p5986_p0 = pnand %p5985_p10, %p6515_p11  ;;  %s5990_s13 = scalar_lea.vmem %s5989_s19, 256 }
  0x8f   : > { %v5142_v17 = vld [vmem:[#allocation5 + $0x264] ss:$16 sps:$4 sm:$0xff]   ;;  %v5145_v19 = vld [vmem:[#allocation5 + $0x260] ss:$16 sps:$4 sm:$0xff]   ;;  %p5991_p7 = scmp.lt.s32.totalorder %s6437_s1, %s5989_s19  ;;  %p5992_p9 = scmp.lt.s32.totalorder %s5990_s13, %s5984_s16 }
  0x90   : > { %1654 = vmatpush1.bf16.msra.mxu0 %v5132_v10  ;;  %v5146_v20 = vld [vmem:[#allocation5 + $0x44] ss:$16 sps:$4 sm:$0xff]   ;;  %v5150_v22 = vld [vmem:[#allocation5 + $0x40] ss:$16 sps:$4 sm:$0xff]   ;;  %p5987_p13 = pneg %p5986_p0 }
  0x91   : > { %1697 = vmatpush1.bf16.msra.mxu1 %v5133_v11  ;;  %1655 = vmatprep.subr.bf16.mxu0 %v5134_v12  ;;  %v5148_v21 = vld [vmem:[#allocation5 + $0x244] ss:$16 sps:$4 sm:$0xff]   ;;  %v5151_v23 = vld [vmem:[#allocation5 + $0x240] ss:$16 sps:$4 sm:$0xff]   ;;  %p5993_p1 = por %p5992_p9, %p5991_p7 }
  0x92   : > { %1698 = vmatprep.subr.bf16.mxu1 %v5136_v13  ;;  %v5152_v24 = vld [vmem:[#allocation5 + $0x24] ss:$16 sps:$4 sm:$0xff]   ;;  %v5156_v26 = vld [vmem:[#allocation5 + $0x20] ss:$16 sps:$4 sm:$0xff]  }
  0x93   : > { %v5154_v25 = vld [vmem:[#allocation5 + $0x224] ss:$16 sps:$4 sm:$0xff]   ;;  %v5157_v27 = vld [vmem:[#allocation5 + $0x220] ss:$16 sps:$4 sm:$0xff]   ;;  %p5994_p3 = pnand %p5993_p1, %p5987_p13 }
  0x94   : > { %1656 = vmatpush1.bf16.msra.mxu0 %v5138_v14  ;;  %v5158_v28 = vld [vmem:[#allocation5 + $0x4] ss:$16 sps:$4 sm:$0xff]   ;;  %v5162_v30 = vld [vmem:[#allocation5] ss:$16 sps:$4 sm:$0xff]  }
  0x95   : > { %1699 = vmatpush1.bf16.msra.mxu1 %v5139_v15  ;;  %1657 = vmatprep.subr.bf16.mxu0 %v5140_v16  ;;  %v5160_v29 = vld [vmem:[#allocation5 + $0x204] ss:$16 sps:$4 sm:$0xff]   ;;  %v5163_v31 = vld [vmem:[#allocation5 + $0x200] ss:$16 sps:$4 sm:$0xff]  }
  0x96   : > { %1700 = vmatprep.subr.bf16.mxu1 %v5142_v17  ;;  %v5164_v32 = vld [vmem:[#allocation5 + $0x1e4] ss:$16 sps:$4 sm:$0xff]   ;;  %v5168_v34 = vld [vmem:[#allocation5 + $0x1e0] ss:$16 sps:$4 sm:$0xff]   ;;  %v5223_v17 = vld [vmem:[#allocation5 + $0xec] ss:$16 sps:$4 sm:$0xff]  }
  0x97   : > { %v5166_v33 = vld [vmem:[#allocation5 + $0x3e4] ss:$16 sps:$4 sm:$0xff]   ;;  %v5169_v35 = vld [vmem:[#allocation5 + $0x3e0] ss:$16 sps:$4 sm:$0xff]  }
  0x98   : > { %1658 = vmatpush1.bf16.msra.mxu0 %v5144_v18  ;;  %v5170_v36 = vld [vmem:[#allocation5 + $0x1c4] ss:$16 sps:$4 sm:$0xff]   ;;  %v5174_v38 = vld [vmem:[#allocation5 + $0x1c0] ss:$16 sps:$4 sm:$0xff]  }
  0x99   : > { %1701 = vmatpush1.bf16.msra.mxu1 %v5145_v19  ;;  %1659 = vmatprep.subr.bf16.mxu0 %v5146_v20  ;;  %v5172_v37 = vld [vmem:[#allocation5 + $0x3c4] ss:$16 sps:$4 sm:$0xff]   ;;  %v5175_v39 = vld [vmem:[#allocation5 + $0x3c0] ss:$16 sps:$4 sm:$0xff]   ;;  %v439_v20 = vld [vmem:[%s6303_s28 + $0x68] sm:$0xff] }
  0x9a   : > { %1702 = vmatprep.subr.bf16.mxu1 %v5148_v21  ;;  %v5176_v40 = vld [vmem:[#allocation5 + $0x1a4] ss:$16 sps:$4 sm:$0xff]   ;;  %v5180_v42 = vld [vmem:[#allocation5 + $0x1a0] ss:$16 sps:$4 sm:$0xff]   ;;  %v6074_v21 = vmov 0  }
  0x9b   : > { %v5178_v41 = vld [vmem:[#allocation5 + $0x3a4] ss:$16 sps:$4 sm:$0xff]   ;;  %v5181_v43 = vld [vmem:[#allocation5 + $0x3a0] ss:$16 sps:$4 sm:$0xff]  }
  0x9c   : > { %1660 = vmatpush1.bf16.msra.mxu0 %v5150_v22  ;;  %v5182_v44 = vld [vmem:[#allocation5 + $0x184] ss:$16 sps:$4 sm:$0xff]   ;;  %v5186_v50 = vld [vmem:[#allocation5 + $0x180] ss:$16 sps:$4 sm:$0xff]  }
  0x9d   : > { %1703 = vmatpush1.bf16.msra.mxu1 %v5151_v23  ;;  %1661 = vmatprep.subr.bf16.mxu0 %v5152_v24  ;;  %v5184_v45 = vld [vmem:[#allocation5 + $0x384] ss:$16 sps:$4 sm:$0xff]   ;;  %v5187_v51 = vld [vmem:[#allocation5 + $0x380] ss:$16 sps:$4 sm:$0xff]   ;;  %v5221_v24 = vld [vmem:[#allocation5 + $0xe8] ss:$16 sps:$4 sm:$0xff]  }
  0x9e   : > { %1704 = vmatprep.subr.bf16.mxu1 %v5154_v25  ;;  %v434_v47 = vld [vmem:[%s6303_s28 + $0x40] sm:$0xff]  ;;  %v436_v49 = vld [vmem:[%s6303_s28 + $0x50] sm:$0xff] }
  0x9f   : > { %v5188_v52 = vld [vmem:[#allocation5 + $0x164] ss:$16 sps:$4 sm:$0xff]   ;;  %v6325_v53 = vpack.c.bf16 %v434_v47, %v427_v46  ;;  %v6327_v54 = vpack.c.bf16 %v436_v49, %v429_v48  ;;  %v5192_v56 = vld [vmem:[#allocation5 + $0x160] ss:$16 sps:$4 sm:$0xff]   ;;  %v5251_v47 = vld [vmem:[#allocation5 + $0x48] ss:$16 sps:$4 sm:$0xff]  }
  0xa0   : > { %1662 = vmatpush1.bf16.msra.mxu0 %v5156_v26  ;;  %v5190_v55 = vld [vmem:[#allocation5 + $0x364] ss:$16 sps:$4 sm:$0xff]   ;;  %v5193_v57 = vld [vmem:[#allocation5 + $0x360] ss:$16 sps:$4 sm:$0xff]   ;;  %v5229_v26 = vld [vmem:[#allocation5 + $0xcc] ss:$16 sps:$4 sm:$0xff]  }
  0xa1   : > { %1705 = vmatpush1.bf16.msra.mxu1 %v5157_v27  ;;  %1663 = vmatprep.subr.bf16.mxu0 %v5158_v28  ;;  %v5194_v58 = vld [vmem:[#allocation5 + $0x144] ss:$16 sps:$4 sm:$0xff]   ;;  %v5198_v60 = vld [vmem:[#allocation5 + $0x140] ss:$16 sps:$4 sm:$0xff]   ;;  %v5227_v28 = vld [vmem:[#allocation5 + $0xc8] ss:$16 sps:$4 sm:$0xff]  }
  0xa2   : > { %1706 = vmatprep.subr.bf16.mxu1 %v5160_v29  ;;  %1681 = vmatprep.mubr.bf16.mxu0 %v6325_v53  ;;  %v5196_v59 = vld [vmem:[#allocation5 + $0x344] ss:$16 sps:$4 sm:$0xff]   ;;  %v5199_v61 = vld [vmem:[#allocation5 + $0x340] ss:$16 sps:$4 sm:$0xff]   ;;  %v5259_v49 = vld [vmem:[#allocation5 + $0x2c] ss:$16 sps:$4 sm:$0xff]  }
  0xa3   : > { %1724 = vmatprep.mubr.bf16.mxu1 %v6327_v54  ;;  %v5200_v62 = vld [vmem:[#allocation5 + $0x124] ss:$16 sps:$4 sm:$0xff]   ;;  %v5204_v0 = vld [vmem:[#allocation5 + $0x120] ss:$16 sps:$4 sm:$0xff]  }
  0xa4   : > { %1664 = vmatpush1.bf16.msra.mxu0 %v5162_v30  ;;  %v5202_v63 = vld [vmem:[#allocation5 + $0x324] ss:$16 sps:$4 sm:$0xff]   ;;  %v5205_v1 = vld [vmem:[#allocation5 + $0x320] ss:$16 sps:$4 sm:$0xff]   ;;  %v5235_v30 = vld [vmem:[#allocation5 + $0xac] ss:$16 sps:$4 sm:$0xff]  }
  0xa5   : > { %1707 = vmatpush1.bf16.msra.mxu1 %v5163_v31  ;;  %1665 = vmatprep.subr.bf16.mxu0 %v5164_v32  ;;  %v5206_v2 = vld [vmem:[#allocation5 + $0x104] ss:$16 sps:$4 sm:$0xff]   ;;  %v5210_v4 = vld [vmem:[#allocation5 + $0x100] ss:$16 sps:$4 sm:$0xff]   ;;  %v5233_v32 = vld [vmem:[#allocation5 + $0xa8] ss:$16 sps:$4 sm:$0xff]  }
  0xa6   : > { %1708 = vmatprep.subr.bf16.mxu1 %v5166_v33  ;;  %v5208_v3 = vld [vmem:[#allocation5 + $0x304] ss:$16 sps:$4 sm:$0xff]   ;;  %v5211_v5 = vld [vmem:[#allocation5 + $0x300] ss:$16 sps:$4 sm:$0xff]  }
  0xa7   : > { %v426_v6 = vld [vmem:[%s6303_s28] sm:$0xff]  ;;  %v428_v8 = vld [vmem:[%s6303_s28 + $0x10] sm:$0xff] }
  0xa8   : > { %1666 = vmatpush2.bf16.msra.mxu0 %v5168_v34  ;;  %v5214_v10 = vld [vmem:[#allocation5 + $0x4e4] ss:$16 sps:$4 sm:$0xff]   ;;  %v6335_v12 = vpack.c.bf16 %v433_v7, %v426_v6  ;;  %v6337_v13 = vpack.c.bf16 %v435_v9, %v428_v8  ;;  %v5212_v14 = vld [vmem:[#allocation5 + $0x4e0] ss:$16 sps:$4 sm:$0xff]   ;;  %v5241_v34 = vld [vmem:[#allocation5 + $0x8c] ss:$16 sps:$4 sm:$0xff]  }
  0xa9   : > { %1709 = vmatpush2.bf16.msra.mxu1 %v5169_v35  ;;  %1667 = vmatprep.subr.bf16.mxu0 %v5170_v36  ;;  %v5217_v11 = vld [vmem:[#allocation5 + $0x604] ss:$16 sps:$4 sm:$0xff]   ;;  %v5215_v15 = vld [vmem:[#allocation5 + $0x600] ss:$16 sps:$4 sm:$0xff]   ;;  %v5239_v36 = vld [vmem:[#allocation5 + $0x88] ss:$16 sps:$4 sm:$0xff]  }
  0xaa   : > { %1710 = vmatprep.subr.bf16.mxu1 %v5172_v37  ;;  %v5220_v16 = vld [vmem:[#allocation5 + $0x4c4] ss:$16 sps:$4 sm:$0xff]   ;;  %v5218_v18 = vld [vmem:[#allocation5 + $0x4c0] ss:$16 sps:$4 sm:$0xff]   ;;  %v5289_v6 = vld [vmem:[#allocation5 + $0x18c] ss:$16 sps:$4 sm:$0xff]  }
  0xab   : > { %v432_v19 = vld [vmem:[%s6303_s28 + $0x30] sm:$0xff]  ;;  %v5287_v8 = vld [vmem:[#allocation5 + $0x188] ss:$16 sps:$4 sm:$0xff]  }
  0xac   : > { %1668 = vmatpush2.bf16.msra.mxu0 %v5174_v38  ;;  %v5226_v22 = vld [vmem:[#allocation5 + $0x4a4] ss:$16 sps:$4 sm:$0xff]   ;;  %v6344_v23 = vpack.c.bf16 %v439_v20, %v432_v19  ;;  %v5224_v25 = vld [vmem:[#allocation5 + $0x4a0] ss:$16 sps:$4 sm:$0xff]   ;;  %v5247_v38 = vld [vmem:[#allocation5 + $0x6c] ss:$16 sps:$4 sm:$0xff]  }
  0xad   : > { %1711 = vmatpush2.bf16.msra.mxu1 %v5175_v39  ;;  %1669 = vmatprep.subr.bf16.mxu0 %v5176_v40  ;;  %v5232_v27 = vld [vmem:[#allocation5 + $0x484] ss:$16 sps:$4 sm:$0xff]   ;;  %v5230_v29 = vld [vmem:[#allocation5 + $0x480] ss:$16 sps:$4 sm:$0xff]   ;;  %v5245_v40 = vld [vmem:[#allocation5 + $0x68] ss:$16 sps:$4 sm:$0xff]  }
  0xae   : > { %1712 = vmatprep.subr.bf16.mxu1 %v5178_v41  ;;  %v5238_v31 = vld [vmem:[#allocation5 + $0x464] ss:$16 sps:$4 sm:$0xff]   ;;  %v5236_v33 = vld [vmem:[#allocation5 + $0x460] ss:$16 sps:$4 sm:$0xff]   ;;  %v431_v41 = vld [vmem:[%s6303_s28 + $0x28] sm:$0xff] }
  0xaf   : > { %v5244_v35 = vld [vmem:[#allocation5 + $0x444] ss:$16 sps:$4 sm:$0xff]   ;;  %v5242_v37 = vld [vmem:[#allocation5 + $0x440] ss:$16 sps:$4 sm:$0xff]  }
  0xb0   : > { %1670 = vmatpush2.bf16.msra.mxu0 %v5180_v42  ;;  %v5250_v39 = vld [vmem:[#allocation5 + $0x424] ss:$16 sps:$4 sm:$0xff]   ;;  %v5254_v48 = vld [vmem:[#allocation5 + $0x400] ss:$16 sps:$4 sm:$0xff]  }
  0xb1   : > { %1713 = vmatpush2.bf16.msra.mxu1 %v5181_v43  ;;  %1671 = vmatprep.subr.bf16.mxu0 %v5182_v44  ;;  %v438_v42 = vld [vmem:[%s6303_s28 + $0x60] sm:$0xff] }
  0xb2   : > { %1714 = vmatprep.subr.bf16.mxu1 %v5184_v45  ;;  %v5248_v43 = vld [vmem:[#allocation5 + $0x420] ss:$16 sps:$4 sm:$0xff]   ;;  %v6351_v44 = vpack.c.bf16 %v438_v42, %v431_v41  ;;  %v5253_v45 = vld [vmem:[#allocation5 + $0x4c] ss:$16 sps:$4 sm:$0xff]   ;;  %v5256_v46 = vld [vmem:[#allocation5 + $0x404] ss:$16 sps:$4 sm:$0xff]  }
  0xb3   : > { %v5292_v7 = vld [vmem:[#allocation5 + $0x544] ss:$16 sps:$4 sm:$0xff]   ;;  %v5290_v9 = vld [vmem:[#allocation5 + $0x540] ss:$16 sps:$4 sm:$0xff]   ;;  %v5331_v41 = vld [vmem:[#allocation5 + $0x4ac] ss:$16 sps:$4 sm:$0xff]  }
  0xb4   : > { %1672 = vmatpush2.bf16.msra.mxu0 %v5186_v50  ;;  %v5262_v50 = vld [vmem:[#allocation5 + $0x5e4] ss:$16 sps:$4 sm:$0xff]   ;;  %v5302_v19 = vld [vmem:[#allocation5 + $0x500] ss:$16 sps:$4 sm:$0xff]   ;;  %v5334_v42 = vld [vmem:[#allocation5 + $0x26c] ss:$16 sps:$4 sm:$0xff]  }
  0xb5   : > { %1715 = vmatpush2.bf16.msra.mxu1 %v5187_v51  ;;  %1673 = vmatprep.subr.bf16.mxu0 %v5188_v52  ;;  %v5257_v51 = vld [vmem:[#allocation5 + $0x28] ss:$16 sps:$4 sm:$0xff]   ;;  %v5260_v52 = vld [vmem:[#allocation5 + $0x5e0] ss:$16 sps:$4 sm:$0xff]  }
  0xb6   : > { %1716 = vmatprep.subr.bf16.mxu1 %v5190_v55  ;;  %v5268_v55 = vld [vmem:[#allocation5 + $0x5c4] ss:$16 sps:$4 sm:$0xff]  }
  0xb7   : > { %v430_v20 = vld [vmem:[%s6303_s28 + $0x20] sm:$0xff] }
  0xb8   : > { %1674 = vmatpush2.bf16.msra.mxu0 %v5192_v56  ;;  %v5263_v56 = vld [vmem:[#allocation5 + $0x8] ss:$16 sps:$4 sm:$0xff]  }
  0xb9   : > { %1717 = vmatpush2.bf16.msra.mxu1 %v5193_v57  ;;  %1675 = vmatprep.subr.bf16.mxu0 %v5194_v58  ;;  %v5266_v57 = vld [vmem:[#allocation5 + $0x5c0] ss:$16 sps:$4 sm:$0xff]   ;;  %v5271_v58 = vld [vmem:[#allocation5 + $0x1ec] ss:$16 sps:$4 sm:$0xff]  }
  0xba   : > { %1718 = vmatprep.subr.bf16.mxu1 %v5196_v59  ;;  %v5274_v59 = vld [vmem:[#allocation5 + $0x5a4] ss:$16 sps:$4 sm:$0xff]  }
  0xbc   : > { %1676 = vmatpush2.bf16.msra.mxu0 %v5198_v60  ;;  %v5269_v60 = vld [vmem:[#allocation5 + $0x1e8] ss:$16 sps:$4 sm:$0xff]  }
  0xbd   : > { %1719 = vmatpush2.bf16.msra.mxu1 %v5199_v61  ;;  %1677 = vmatprep.subr.bf16.mxu0 %v5200_v62  ;;  %v5272_v61 = vld [vmem:[#allocation5 + $0x5a0] ss:$16 sps:$4 sm:$0xff]   ;;  %v5277_v62 = vld [vmem:[#allocation5 + $0x1cc] ss:$16 sps:$4 sm:$0xff]  }
  0xbe   : > { %1720 = vmatprep.subr.bf16.mxu1 %v5202_v63  ;;  %v5280_v63 = vld [vmem:[#allocation5 + $0x584] ss:$16 sps:$4 sm:$0xff]  }
  0xc0   : > { %1678 = vmatpush2.bf16.msra.mxu0 %v5204_v0  ;;  %v5275_v0 = vld [vmem:[#allocation5 + $0x1c8] ss:$16 sps:$4 sm:$0xff]  }
  0xc1   : > { %1721 = vmatpush2.bf16.msra.mxu1 %v5205_v1  ;;  %1679 = vmatprep.subr.bf16.mxu0 %v5206_v2  ;;  %v5278_v1 = vld [vmem:[#allocation5 + $0x580] ss:$16 sps:$4 sm:$0xff]   ;;  %v5283_v2 = vld [vmem:[#allocation5 + $0x1ac] ss:$16 sps:$4 sm:$0xff]  }
  0xc2   : > { %1722 = vmatprep.subr.bf16.mxu1 %v5208_v3  ;;  %v5286_v3 = vld [vmem:[#allocation5 + $0x564] ss:$16 sps:$4 sm:$0xff]  }
  0xc4   : > { %1680 = vmatpush2.bf16.msra.mxu0 %v5210_v4  ;;  %v5281_v4 = vld [vmem:[#allocation5 + $0x1a8] ss:$16 sps:$4 sm:$0xff]  }
  0xc5   : > { %1723 = vmatpush2.bf16.msra.mxu1 %v5211_v5  ;;  %1735 = vmatprep.subr.bf16.mxu0 %v5214_v10  ;;  %v5284_v5 = vld [vmem:[#allocation5 + $0x560] ss:$16 sps:$4 sm:$0xff]   ;;  %v5295_v10 = vld [vmem:[#allocation5 + $0x16c] ss:$16 sps:$4 sm:$0xff]  }
  0xc6   : > { %1792 = vmatprep.subr.bf16.mxu1 %v5217_v11  ;;  %v5298_v11 = vld [vmem:[#allocation5 + $0x524] ss:$16 sps:$4 sm:$0xff]  }
  0xc7   : > { %1682 = vmatmul.mubr.bf16.vlgmr.msra.gmra.mxu0 %v6335_v12 }
  0xc8   : > { %1725 = vmatmul.mubr.bf16.vlgmr.msra.gmra.mxu1 %v6337_v13  ;;  %1736 = vmatpush1.bf16.msra.mxu0 %v5212_v14  ;;  %v5293_v14 = vld [vmem:[#allocation5 + $0x168] ss:$16 sps:$4 sm:$0xff]  }
  0xc9   : > { %1793 = vmatpush1.bf16.msra.mxu1 %v5215_v15  ;;  %1737 = vmatprep.subr.bf16.mxu0 %v5220_v16  ;;  %v5296_v15 = vld [vmem:[#allocation5 + $0x520] ss:$16 sps:$4 sm:$0xff]   ;;  %v5301_v16 = vld [vmem:[#allocation5 + $0x14c] ss:$16 sps:$4 sm:$0xff]  }
  0xca   : > { %1810 = vmatprep.mubr.bf16.mxu1 %v6074_v21  ;;  %1821 = vmatprep.subr.bf16.mxu1 %v5223_v17  ;;  %v5304_v17 = vld [vmem:[#allocation5 + $0x504] ss:$16 sps:$4 sm:$0xff]  }
  0xcb   : > { %1767 = vmatprep.mubr.bf16.mxu0 %v6351_v44 }
  0xcc   : > { %1738 = vmatpush1.bf16.msra.mxu0 %v5218_v18  ;;  %v5299_v18 = vld [vmem:[#allocation5 + $0x148] ss:$16 sps:$4 sm:$0xff]  }
  0xcd   : > { %1739 = vmatprep.subr.bf16.mxu0 %v5226_v22  ;;  %v437_v22 = vld [vmem:[%s6303_s28 + $0x58] sm:$0xff]  ;;  %s4309_s28 = scalar_lea.sflag [#allocation4], %s6299_s14 }
  0xd0   : > { %4657 = vmatmul.mubr.msk.bf16.vlgmr.msra.gmra.mxu1 %vm1645_vm0, %v6344_v23  ;;  %1740 = vmatpush1.bf16.msra.mxu0 %v5224_v25  ;;  %v5310_v25 = vld [vmem:[#allocation5 + $0x2ec] ss:$16 sps:$4 sm:$0xff]  }
  0xd1   : > { %1822 = vmatpush1.bf16.msra.mxu1 %v5221_v24  ;;  %1741 = vmatprep.subr.bf16.mxu0 %v5232_v27  ;;  %v5307_v24 = vld [vmem:[#allocation5 + $0x12c] ss:$16 sps:$4 sm:$0xff]   ;;  %v5305_v27 = vld [vmem:[#allocation5 + $0x128] ss:$16 sps:$4 sm:$0xff]  }
  0xd2   : > { %1823 = vmatprep.subr.bf16.mxu1 %v5229_v26  ;;  %1853 = vmatprep.mubr.bf16.mxu1 %v6325_v53  ;;  %v5265_v53 = vld [vmem:[#allocation5 + $0xc] ss:$16 sps:$4 sm:$0xff]   ;;  %v6356_v26 = vpack.c.bf16 %v437_v22, %v430_v20  ;;  %v5389_v20 = vld [vmem:[#allocation5 + $0x568] ss:$16 sps:$4 sm:$0xff]  }
  0xd3   : > { %v5392_v22 = vld [vmem:[#allocation5 + $0x328] ss:$16 sps:$4 sm:$0xff]  }
  0xd4   : > { %1742 = vmatpush1.bf16.msra.mxu0 %v5230_v29  ;;  %v5313_v29 = vld [vmem:[#allocation5 + $0x10c] ss:$16 sps:$4 sm:$0xff]  }
  0xd5   : > { %1824 = vmatpush1.bf16.msra.mxu1 %v5227_v28  ;;  %1743 = vmatprep.subr.bf16.mxu0 %v5238_v31  ;;  %v5308_v28 = vld [vmem:[#allocation5 + $0x2e8] ss:$16 sps:$4 sm:$0xff]  }
  0xd6   : > { %1825 = vmatprep.subr.bf16.mxu1 %v5235_v30  ;;  %v5316_v30 = vld [vmem:[#allocation5 + $0x2cc] ss:$16 sps:$4 sm:$0xff]   ;;  %v5311_v31 = vld [vmem:[#allocation5 + $0x108] ss:$16 sps:$4 sm:$0xff]  }
  0xd8   : > { %1744 = vmatpush1.bf16.msra.mxu0 %v5236_v33  ;;  %v5319_v33 = vld [vmem:[#allocation5 + $0x4ec] ss:$16 sps:$4 sm:$0xff]  }
  0xd9   : > { %1826 = vmatpush1.bf16.msra.mxu1 %v5233_v32  ;;  %1745 = vmatprep.subr.bf16.mxu0 %v5244_v35  ;;  %v5314_v32 = vld [vmem:[#allocation5 + $0x2c8] ss:$16 sps:$4 sm:$0xff]  }
  0xda   : > { %1827 = vmatprep.subr.bf16.mxu1 %v5241_v34  ;;  %v5322_v34 = vld [vmem:[#allocation5 + $0x2ac] ss:$16 sps:$4 sm:$0xff]   ;;  %v5317_v35 = vld [vmem:[#allocation5 + $0x4e8] ss:$16 sps:$4 sm:$0xff]  }
  0xdc   : > { %1746 = vmatpush1.bf16.msra.mxu0 %v5242_v37  ;;  %v5325_v37 = vld [vmem:[#allocation5 + $0x4cc] ss:$16 sps:$4 sm:$0xff]  }
  0xdd   : > { %1828 = vmatpush1.bf16.msra.mxu1 %v5239_v36  ;;  %1747 = vmatprep.subr.bf16.mxu0 %v5250_v39  ;;  %v5320_v36 = vld [vmem:[#allocation5 + $0x2a8] ss:$16 sps:$4 sm:$0xff]  }
  0xde   : > { %1829 = vmatprep.subr.bf16.mxu1 %v5247_v38  ;;  %v5328_v38 = vld [vmem:[#allocation5 + $0x28c] ss:$16 sps:$4 sm:$0xff]   ;;  %v5323_v39 = vld [vmem:[#allocation5 + $0x4c8] ss:$16 sps:$4 sm:$0xff]  }
  0xe0   : > { %1748 = vmatpush1.bf16.msra.mxu0 %v5248_v43  ;;  %v5329_v43 = vld [vmem:[#allocation5 + $0x4a8] ss:$16 sps:$4 sm:$0xff]  }
  0xe1   : > { %1830 = vmatpush1.bf16.msra.mxu1 %v5245_v40  ;;  %1749 = vmatprep.subr.bf16.mxu0 %v5256_v46  ;;  %v5326_v40 = vld [vmem:[#allocation5 + $0x288] ss:$16 sps:$4 sm:$0xff]   ;;  %v5340_v46 = vld [vmem:[#allocation5 + $0x24c] ss:$16 sps:$4 sm:$0xff]  }
  0xe2   : > { %1831 = vmatprep.subr.bf16.mxu1 %v5253_v45  ;;  %v5332_v45 = vld [vmem:[#allocation5 + $0x268] ss:$16 sps:$4 sm:$0xff]  }
  0xe4   : > { %1750 = vmatpush1.bf16.msra.mxu0 %v5254_v48  ;;  %v5343_v48 = vld [vmem:[#allocation5 + $0x46c] ss:$16 sps:$4 sm:$0xff]  }
  0xe5   : > { %1832 = vmatpush1.bf16.msra.mxu1 %v5251_v47  ;;  %1751 = vmatprep.subr.bf16.mxu0 %v5262_v50  ;;  %v5335_v47 = vld [vmem:[#allocation5 + $0x488] ss:$16 sps:$4 sm:$0xff]  }
  0xe6   : > { %1833 = vmatprep.subr.bf16.mxu1 %v5259_v49  ;;  %v5346_v49 = vld [vmem:[#allocation5 + $0x22c] ss:$16 sps:$4 sm:$0xff]   ;;  %v5341_v50 = vld [vmem:[#allocation5 + $0x468] ss:$16 sps:$4 sm:$0xff]  }
  0xe8   : > { %1752 = vmatpush2.bf16.msra.mxu0 %v5260_v52  ;;  %v5352_v52 = vld [vmem:[#allocation5 + $0x20c] ss:$16 sps:$4 sm:$0xff]  }
  0xe9   : > { %1834 = vmatpush1.bf16.msra.mxu1 %v5257_v51  ;;  %1753 = vmatprep.subr.bf16.mxu0 %v5268_v55  ;;  %v5344_v51 = vld [vmem:[#allocation5 + $0x228] ss:$16 sps:$4 sm:$0xff]  }
  0xea   : > { %1835 = vmatprep.subr.bf16.mxu1 %v5265_v53  ;;  %v5347_v53 = vld [vmem:[#allocation5 + $0x448] ss:$16 sps:$4 sm:$0xff]  }
  0xeb   : > { %v5350_v55 = vld [vmem:[#allocation5 + $0x208] ss:$16 sps:$4 sm:$0xff]  }
  0xec   : > { %1754 = vmatpush2.bf16.msra.mxu0 %v5266_v57  ;;  %v5358_v57 = vld [vmem:[#allocation5 + $0x3ec] ss:$16 sps:$4 sm:$0xff]  }
  0xed   : > { %1836 = vmatpush1.bf16.msra.mxu1 %v5263_v56  ;;  %1755 = vmatprep.subr.bf16.mxu0 %v5274_v59  ;;  %v5355_v56 = vld [vmem:[#allocation5 + $0x42c] ss:$16 sps:$4 sm:$0xff]   ;;  %v5356_v59 = vld [vmem:[#allocation5 + $0x3e8] ss:$16 sps:$4 sm:$0xff]  }
  0xee   : > { %1837 = vmatprep.subr.bf16.mxu1 %v5271_v58  ;;  %v5353_v58 = vld [vmem:[#allocation5 + $0x428] ss:$16 sps:$4 sm:$0xff]  }
  0xf0   : > { %1756 = vmatpush2.bf16.msra.mxu0 %v5272_v61  ;;  %v5364_v61 = vld [vmem:[#allocation5 + $0x3cc] ss:$16 sps:$4 sm:$0xff]  }
  0xf1   : > { %1838 = vmatpush2.bf16.msra.mxu1 %v5269_v60  ;;  %1757 = vmatprep.subr.bf16.mxu0 %v5280_v63  ;;  %v5361_v60 = vld [vmem:[#allocation5 + $0x40c] ss:$16 sps:$4 sm:$0xff]   ;;  %v5362_v63 = vld [vmem:[#allocation5 + $0x3c8] ss:$16 sps:$4 sm:$0xff]  }
  0xf2   : > { %1839 = vmatprep.subr.bf16.mxu1 %v5277_v62  ;;  %v5359_v62 = vld [vmem:[#allocation5 + $0x408] ss:$16 sps:$4 sm:$0xff]  }
  0xf4   : > { %1758 = vmatpush2.bf16.msra.mxu0 %v5278_v1  ;;  %v5370_v1 = vld [vmem:[#allocation5 + $0x3ac] ss:$16 sps:$4 sm:$0xff]  }
  0xf5   : > { %1840 = vmatpush2.bf16.msra.mxu1 %v5275_v0  ;;  %1759 = vmatprep.subr.bf16.mxu0 %v5286_v3  ;;  %v5367_v0 = vld [vmem:[#allocation5 + $0x5ec] ss:$16 sps:$4 sm:$0xff]   ;;  %v5368_v3 = vld [vmem:[#allocation5 + $0x3a8] ss:$16 sps:$4 sm:$0xff]  }
  0xf6   : > { %1841 = vmatprep.subr.bf16.mxu1 %v5283_v2  ;;  %v5365_v2 = vld [vmem:[#allocation5 + $0x5e8] ss:$16 sps:$4 sm:$0xff]  }
  0xf8   : > { %1760 = vmatpush2.bf16.msra.mxu0 %v5284_v5  ;;  %v5376_v5 = vld [vmem:[#allocation5 + $0x38c] ss:$16 sps:$4 sm:$0xff]  }
  0xf9   : > { %1842 = vmatpush2.bf16.msra.mxu1 %v5281_v4  ;;  %1761 = vmatprep.subr.bf16.mxu0 %v5292_v7  ;;  %v5373_v4 = vld [vmem:[#allocation5 + $0x5cc] ss:$16 sps:$4 sm:$0xff]   ;;  %v5374_v7 = vld [vmem:[#allocation5 + $0x388] ss:$16 sps:$4 sm:$0xff]  }
  0xfa   : > { %1843 = vmatprep.subr.bf16.mxu1 %v5289_v6  ;;  %v5371_v6 = vld [vmem:[#allocation5 + $0x5c8] ss:$16 sps:$4 sm:$0xff]  }
  0xfc   : > { %1762 = vmatpush2.bf16.msra.mxu0 %v5290_v9  ;;  %v5382_v9 = vld [vmem:[#allocation5 + $0x36c] ss:$16 sps:$4 sm:$0xff]  }
  0xfd   : > { %1844 = vmatpush2.bf16.msra.mxu1 %v5287_v8  ;;  %1763 = vmatprep.subr.bf16.mxu0 %v5298_v11  ;;  %v5379_v8 = vld [vmem:[#allocation5 + $0x5ac] ss:$16 sps:$4 sm:$0xff]   ;;  %v5380_v11 = vld [vmem:[#allocation5 + $0x368] ss:$16 sps:$4 sm:$0xff]  }
  0xfe   : > { %1845 = vmatprep.subr.bf16.mxu1 %v5295_v10  ;;  %v5377_v10 = vld [vmem:[#allocation5 + $0x5a8] ss:$16 sps:$4 sm:$0xff]  }
 0x100   : > { %1764 = vmatpush2.bf16.msra.mxu0 %v5296_v15  ;;  %v5388_v15 = vld [vmem:[#allocation5 + $0x34c] ss:$16 sps:$4 sm:$0xff]  }
 0x101   : > { %1846 = vmatpush2.bf16.msra.mxu1 %v5293_v14  ;;  %1765 = vmatprep.subr.bf16.mxu0 %v5304_v17  ;;  %v5385_v14 = vld [vmem:[#allocation5 + $0x58c] ss:$16 sps:$4 sm:$0xff]   ;;  %v5386_v17 = vld [vmem:[#allocation5 + $0x348] ss:$16 sps:$4 sm:$0xff]  }
 0x102   : > { %1847 = vmatprep.subr.bf16.mxu1 %v5301_v16  ;;  %v5383_v16 = vld [vmem:[#allocation5 + $0x588] ss:$16 sps:$4 sm:$0xff]  }
 0x104   : > { %1766 = vmatpush2.bf16.msra.mxu0 %v5302_v19  ;;  %v5394_v19 = vld [vmem:[#allocation5 + $0x32c] ss:$16 sps:$4 sm:$0xff]  }
 0x105   : > { %1848 = vmatpush2.bf16.msra.mxu1 %v5299_v18  ;;  %1864 = vmatprep.subr.bf16.mxu0 %v5310_v25  ;;  %v5391_v18 = vld [vmem:[#allocation5 + $0x56c] ss:$16 sps:$4 sm:$0xff]  }
 0x106   : > { %1849 = vmatprep.subr.bf16.mxu1 %v5307_v24  ;;  %v5397_v24 = vld [vmem:[#allocation5 + $0x54c] ss:$16 sps:$4 sm:$0xff]  }
 0x107   : > { %1768 = vmatmul.mubr.bf16.vlgmr.msra.gmra.mxu0 %v6356_v26  ;;  %v5400_v25 = vld [vmem:[#allocation5 + $0x30c] ss:$16 sps:$4 sm:$0xff]  }
 0x108   : > { %1865 = vmatpush1.bf16.msra.mxu0 %v5308_v28  ;;  %1896 = vmatprep.mubr.bf16.mxu0 %v6327_v54  ;;  %v5337_v54 = vld [vmem:[#allocation5 + $0x48c] ss:$16 sps:$4 sm:$0xff]   ;;  %v5398_v28 = vld [vmem:[#allocation5 + $0x308] ss:$16 sps:$4 sm:$0xff]  }
 0x109   : > { %1850 = vmatpush2.bf16.msra.mxu1 %v5305_v27  ;;  %1866 = vmatprep.subr.bf16.mxu0 %v5316_v30  ;;  %v5395_v27 = vld [vmem:[#allocation5 + $0x548] ss:$16 sps:$4 sm:$0xff]   ;;  %v5406_v30 = vld [vmem:[#allocation5 + $0x60c] ss:$16 sps:$4 sm:$0xff]  }
 0x10a   : > { %1851 = vmatprep.subr.bf16.mxu1 %v5313_v29  ;;  %v5403_v29 = vld [vmem:[#allocation5 + $0x52c] ss:$16 sps:$4 sm:$0xff]  }
 0x10c   : > { %1867 = vmatpush1.bf16.msra.mxu0 %v5314_v32  ;;  %v5404_v32 = vld [vmem:[#allocation5 + $0x608] ss:$16 sps:$4 sm:$0xff]  }
 0x10d   : > { %1852 = vmatpush2.bf16.msra.mxu1 %v5311_v31  ;;  %1868 = vmatprep.subr.bf16.mxu0 %v5322_v34  ;;  %v5401_v31 = vld [vmem:[#allocation5 + $0x528] ss:$16 sps:$4 sm:$0xff]  }
 0x10e   : > { %1907 = vmatprep.subr.bf16.mxu1 %v5319_v33  ;;  %v5409_v33 = vld [vmem:[#allocation5 + $0x50c] ss:$16 sps:$4 sm:$0xff]   ;;  %v5412_v34 = vld [vmem:[#allocation8 + $0xe4] ss:$16 sps:$4 sm:$0xff]  }
 0x110   : > { %1854 = vmatmul.mubr.bf16.vlgmr.msra.gmra.mxu1 %v6335_v12  ;;  %1869 = vmatpush1.bf16.msra.mxu0 %v5320_v36  ;;  %v5338_v12 = vld [vmem:[#allocation5 + $0x248] ss:$16 sps:$4 sm:$0xff]   ;;  %v5410_v36 = vld [vmem:[#allocation8 + $0xe0] ss:$16 sps:$4 sm:$0xff]  }
 0x111   : > { %1908 = vmatpush1.bf16.msra.mxu1 %v5317_v35  ;;  %1870 = vmatprep.subr.bf16.mxu0 %v5328_v38  ;;  %v5407_v35 = vld [vmem:[#allocation5 + $0x508] ss:$16 sps:$4 sm:$0xff]   ;;  %v5413_v38 = vld [vmem:[#allocation8 + $0xc0] ss:$16 sps:$4 sm:$0xff]  }
 0x112   : > { %1909 = vmatprep.subr.bf16.mxu1 %v5325_v37  ;;  %1939 = vmatprep.mubr.bf16.mxu1 %v6351_v44  ;;  %v5349_v44 = vld [vmem:[#allocation5 + $0x44c] ss:$16 sps:$4 sm:$0xff]   ;;  %v5415_v37 = vld [vmem:[#allocation8 + $0xc4] ss:$16 sps:$4 sm:$0xff]  }
 0x114   : > { %1871 = vmatpush1.bf16.msra.mxu0 %v5326_v40  ;;  %v5416_v40 = vld [vmem:[#allocation8 + $0xa0] ss:$16 sps:$4 sm:$0xff]  }
 0x115   : > { %1910 = vmatpush1.bf16.msra.mxu1 %v5323_v39  ;;  %1872 = vmatprep.subr.bf16.mxu0 %v5334_v42  ;;  %v5418_v39 = vld [vmem:[#allocation8 + $0xa4] ss:$16 sps:$4 sm:$0xff]   ;;  %v5422_v42 = vld [vmem:[#allocation8 + $0x60] ss:$16 sps:$4 sm:$0xff]  }
 0x116   : > { %1911 = vmatprep.subr.bf16.mxu1 %v5331_v41  ;;  %v5419_v41 = vld [vmem:[#allocation8 + $0x80] ss:$16 sps:$4 sm:$0xff]  }
 0x118   : > { %1873 = vmatpush1.bf16.msra.mxu0 %v5332_v45  ;;  %v5466_v45 = vld [vmem:[#allocation8 + $0x2e4] ss:$16 sps:$4 sm:$0xff]  }
 0x119   : > { %1912 = vmatpush1.bf16.msra.mxu1 %v5329_v43  ;;  %1874 = vmatprep.subr.bf16.mxu0 %v5340_v46  ;;  %v5464_v43 = vld [vmem:[#allocation8 + $0x2e0] ss:$16 sps:$4 sm:$0xff]   ;;  %v5472_v46 = vld [vmem:[#allocation8 + $0x2c4] ss:$16 sps:$4 sm:$0xff]  }
 0x11a   : > { %1913 = vmatprep.subr.bf16.mxu1 %v5337_v54  ;;  %v5470_v54 = vld [vmem:[#allocation8 + $0x2c0] ss:$16 sps:$4 sm:$0xff]  }
 0x11c   : > { %1875 = vmatpush1.bf16.msra.mxu0 %v5338_v12  ;;  %v5428_v12 = vld [vmem:[#allocation8 + $0x20] ss:$16 sps:$4 sm:$0xff]  }
 0x11d   : > { %1914 = vmatpush1.bf16.msra.mxu1 %v5335_v47  ;;  %1876 = vmatprep.subr.bf16.mxu0 %v5346_v49  ;;  %v5430_v47 = vld [vmem:[#allocation8 + $0x24] ss:$16 sps:$4 sm:$0xff]  }
 0x11e   : > { %1915 = vmatprep.subr.bf16.mxu1 %v5343_v48  ;;  %v5476_v48 = vld [vmem:[#allocation8 + $0x2a0] ss:$16 sps:$4 sm:$0xff]   ;;  %v5478_v49 = vld [vmem:[#allocation8 + $0x2a4] ss:$16 sps:$4 sm:$0xff]  }
 0x120   : > { %1877 = vmatpush1.bf16.msra.mxu0 %v5344_v51  ;;  %v5431_v51 = vld [vmem:[#allocation8] ss:$16 sps:$4 sm:$0xff]  }
 0x121   : > { %1916 = vmatpush1.bf16.msra.mxu1 %v5341_v50  ;;  %1878 = vmatprep.subr.bf16.mxu0 %v5352_v52  ;;  %v5433_v50 = vld [vmem:[#allocation8 + $0x4] ss:$16 sps:$4 sm:$0xff]  }
 0x122   : > { %1917 = vmatprep.subr.bf16.mxu1 %v5349_v44  ;;  %v5482_v44 = vld [vmem:[#allocation8 + $0x280] ss:$16 sps:$4 sm:$0xff]   ;;  %v5484_v52 = vld [vmem:[#allocation8 + $0x284] ss:$16 sps:$4 sm:$0xff]  }
 0x124   : > { %1879 = vmatpush1.bf16.msra.mxu0 %v5350_v55  ;;  %v5434_v55 = vld [vmem:[#allocation8 + $0x1e0] ss:$16 sps:$4 sm:$0xff]  }
 0x125   : > { %1918 = vmatpush1.bf16.msra.mxu1 %v5347_v53  ;;  %1880 = vmatprep.subr.bf16.mxu0 %v5358_v57  ;;  %v5436_v53 = vld [vmem:[#allocation8 + $0x1e4] ss:$16 sps:$4 sm:$0xff]  }
 0x126   : > { %1919 = vmatprep.subr.bf16.mxu1 %v5355_v56  ;;  %v5488_v56 = vld [vmem:[#allocation8 + $0x260] ss:$16 sps:$4 sm:$0xff]   ;;  %v5490_v57 = vld [vmem:[#allocation8 + $0x264] ss:$16 sps:$4 sm:$0xff]  }
 0x128   : > { %1881 = vmatpush2.bf16.msra.mxu0 %v5356_v59  ;;  %v5437_v59 = vld [vmem:[#allocation8 + $0x1c0] ss:$16 sps:$4 sm:$0xff]  }
 0x129   : > { %1920 = vmatpush1.bf16.msra.mxu1 %v5353_v58  ;;  %1882 = vmatprep.subr.bf16.mxu0 %v5364_v61  ;;  %v5439_v58 = vld [vmem:[#allocation8 + $0x1c4] ss:$16 sps:$4 sm:$0xff]  }
 0x12a   : > { %1921 = vmatprep.subr.bf16.mxu1 %v5361_v60  ;;  %v5494_v60 = vld [vmem:[#allocation8 + $0x240] ss:$16 sps:$4 sm:$0xff]   ;;  %v5496_v61 = vld [vmem:[#allocation8 + $0x244] ss:$16 sps:$4 sm:$0xff]  }
 0x12c   : > { %1883 = vmatpush2.bf16.msra.mxu0 %v5362_v63  ;;  %v5440_v63 = vld [vmem:[#allocation8 + $0x1a0] ss:$16 sps:$4 sm:$0xff]  }
 0x12d   : > { %1922 = vmatpush1.bf16.msra.mxu1 %v5359_v62  ;;  %1884 = vmatprep.subr.bf16.mxu0 %v5370_v1  ;;  %v5442_v62 = vld [vmem:[#allocation8 + $0x1a4] ss:$16 sps:$4 sm:$0xff]  }
 0x12e   : > { %1923 = vmatprep.subr.bf16.mxu1 %v5367_v0  ;;  %v5500_v0 = vld [vmem:[#allocation8 + $0x220] ss:$16 sps:$4 sm:$0xff]   ;;  %v5502_v1 = vld [vmem:[#allocation8 + $0x224] ss:$16 sps:$4 sm:$0xff]  }
 0x130   : > { %1885 = vmatpush2.bf16.msra.mxu0 %v5368_v3  ;;  %v5443_v3 = vld [vmem:[#allocation8 + $0x180] ss:$16 sps:$4 sm:$0xff]  }
 0x131   : > { %1924 = vmatpush2.bf16.msra.mxu1 %v5365_v2  ;;  %1886 = vmatprep.subr.bf16.mxu0 %v5376_v5  ;;  %v5445_v2 = vld [vmem:[#allocation8 + $0x184] ss:$16 sps:$4 sm:$0xff]  }
 0x132   : > { %1925 = vmatprep.subr.bf16.mxu1 %v5373_v4  ;;  %v5506_v4 = vld [vmem:[#allocation8 + $0x200] ss:$16 sps:$4 sm:$0xff]   ;;  %v5508_v5 = vld [vmem:[#allocation8 + $0x204] ss:$16 sps:$4 sm:$0xff]  }
 0x134   : > { %1887 = vmatpush2.bf16.msra.mxu0 %v5374_v7  ;;  %v5446_v7 = vld [vmem:[#allocation8 + $0x160] ss:$16 sps:$4 sm:$0xff]  }
 0x135   : > { %1926 = vmatpush2.bf16.msra.mxu1 %v5371_v6  ;;  %1888 = vmatprep.subr.bf16.mxu0 %v5382_v9  ;;  %v5448_v6 = vld [vmem:[#allocation8 + $0x164] ss:$16 sps:$4 sm:$0xff]  }
 0x136   : > { %1927 = vmatprep.subr.bf16.mxu1 %v5379_v8  ;;  %v5512_v8 = vld [vmem:[#allocation8 + $0x3e0] ss:$16 sps:$4 sm:$0xff]   ;;  %v5514_v9 = vld [vmem:[#allocation8 + $0x3e4] ss:$16 sps:$4 sm:$0xff]  }
 0x138   : > { %1889 = vmatpush2.bf16.msra.mxu0 %v5380_v11  ;;  %v5449_v11 = vld [vmem:[#allocation8 + $0x140] ss:$16 sps:$4 sm:$0xff]  }
 0x139   : > { %1928 = vmatpush2.bf16.msra.mxu1 %v5377_v10  ;;  %1890 = vmatprep.subr.bf16.mxu0 %v5388_v15  ;;  %v5451_v10 = vld [vmem:[#allocation8 + $0x144] ss:$16 sps:$4 sm:$0xff]  }
 0x13a   : > { %1929 = vmatprep.subr.bf16.mxu1 %v5385_v14  ;;  %v5518_v14 = vld [vmem:[#allocation8 + $0x3c0] ss:$16 sps:$4 sm:$0xff]   ;;  %v5520_v15 = vld [vmem:[#allocation8 + $0x3c4] ss:$16 sps:$4 sm:$0xff]  }
 0x13c   : > { %1891 = vmatpush2.bf16.msra.mxu0 %v5386_v17  ;;  %v5452_v17 = vld [vmem:[#allocation8 + $0x120] ss:$16 sps:$4 sm:$0xff]  }
 0x13d   : > { %1930 = vmatpush2.bf16.msra.mxu1 %v5383_v16  ;;  %1892 = vmatprep.subr.bf16.mxu0 %v5394_v19  ;;  %v5454_v16 = vld [vmem:[#allocation8 + $0x124] ss:$16 sps:$4 sm:$0xff]  }
 0x13e   : > { %1931 = vmatprep.subr.bf16.mxu1 %v5391_v18  ;;  %v5524_v18 = vld [vmem:[#allocation8 + $0x3a0] ss:$16 sps:$4 sm:$0xff]   ;;  %v5526_v19 = vld [vmem:[#allocation8 + $0x3a4] ss:$16 sps:$4 sm:$0xff]  }
 0x140   : > { %1893 = vmatpush2.bf16.msra.mxu0 %v5392_v22  ;;  %v5455_v22 = vld [vmem:[#allocation8 + $0x100] ss:$16 sps:$4 sm:$0xff]  }
 0x141   : > { %1932 = vmatpush2.bf16.msra.mxu1 %v5389_v20  ;;  %1894 = vmatprep.subr.bf16.mxu0 %v5400_v25  ;;  %v5457_v20 = vld [vmem:[#allocation8 + $0x104] ss:$16 sps:$4 sm:$0xff]   ;;  %v5460_v25 = vld [vmem:[#allocation8 + $0xec] ss:$16 sps:$4 sm:$0xff]  }
 0x142   : > { %1933 = vmatprep.subr.bf16.mxu1 %v5397_v24  ;;  %v5532_v24 = vld [vmem:[#allocation8 + $0x384] ss:$16 sps:$4 sm:$0xff]  }
 0x144   : > { %1895 = vmatpush2.bf16.msra.mxu0 %v5398_v28  ;;  %v5538_v28 = vld [vmem:[#allocation8 + $0x364] ss:$16 sps:$4 sm:$0xff]  }
 0x145   : > { %1934 = vmatpush2.bf16.msra.mxu1 %v5395_v27  ;;  %1964 = vmatprep.subr.bf16.mxu0 %v5406_v30  ;;  %v5530_v27 = vld [vmem:[#allocation8 + $0x380] ss:$16 sps:$4 sm:$0xff]   ;;  %v5544_v30 = vld [vmem:[#allocation8 + $0x344] ss:$16 sps:$4 sm:$0xff]  }
 0x146   : > { %1935 = vmatprep.subr.bf16.mxu1 %v5403_v29  ;;  %v5536_v29 = vld [vmem:[#allocation8 + $0x360] ss:$16 sps:$4 sm:$0xff]  }
 0x147   : > { %1897 = vmatmul.mubr.bf16.vlgmr.msra.gmra.mxu0 %v6337_v13  ;;  %v5421_v13 = vld [vmem:[#allocation8 + $0x84] ss:$16 sps:$4 sm:$0xff]  }
 0x148   : > { %1965 = vmatpush1.bf16.msra.mxu0 %v5404_v32  ;;  %1982 = vmatprep.mubr.bf16.mxu0 %v6074_v21  ;;  %v5424_v21 = vld [vmem:[#allocation8 + $0x64] ss:$16 sps:$4 sm:$0xff]  }
 0x149   : > { %1936 = vmatpush2.bf16.msra.mxu1 %v5401_v31  ;;  %2795 = vmatprep.subr.bf16.mxu0 %v5412_v34  ;;  %v5542_v31 = vld [vmem:[#allocation8 + $0x340] ss:$16 sps:$4 sm:$0xff]   ;;  %v5550_v32 = vld [vmem:[#allocation8 + $0x324] ss:$16 sps:$4 sm:$0xff]  }
 0x14a   : > { %1937 = vmatprep.subr.bf16.mxu1 %v5409_v33  ;;  %v5548_v33 = vld [vmem:[#allocation8 + $0x320] ss:$16 sps:$4 sm:$0xff]   ;;  %v5553_v34 = vld [vmem:[#allocation8 + $0x304] ss:$16 sps:$4 sm:$0xff]  }
 0x14d   : > { %1938 = vmatpush2.bf16.msra.mxu1 %v5407_v35  ;;  %v5551_v35 = vld [vmem:[#allocation8 + $0x300] ss:$16 sps:$4 sm:$0xff]  }
 0x14e   : > { %2838 = vmatprep.subr.bf16.mxu1 %v5466_v45  ;;  %v6375_v45 = vld [vmem:[#allocation7] sm:$0xf] }
 0x14f   : > { %4658 = vmatmul.mubr.msk.bf16.vlgmr.msra.gmra.mxu0 %vm1645_vm0, %v6344_v23  ;;  %v5425_v23 = vld [vmem:[#allocation8 + $0x40] ss:$16 sps:$4 sm:$0xff]  }
 0x150   : > { %1940 = vmatmul.mubr.bf16.vlgmr.msra.gmra.mxu1 %v6356_v26  ;;  %2796 = vmatpush1.bf16.msra.mxu0 %v5410_v36  ;;  %v5427_v26 = vld [vmem:[#allocation8 + $0x44] ss:$16 sps:$4 sm:$0xff]   ;;  %v5556_v36 = vld [vmem:[#allocation8 + $0x2ec] ss:$16 sps:$4 sm:$0xff]  }
 0x151   : > { %2797 = vmatprep.subr.bf16.mxu0 %v5415_v37  ;;  %2839 = vmatpush1.bf16.msra.mxu1 %v5464_v43 }
 0x152   : > { %2840 = vmatprep.subr.bf16.mxu1 %v5472_v46 }
 0x154   : > { %2798 = vmatpush1.bf16.msra.mxu0 %v5413_v38  ;;  %v645_v38 = vlaneseq }
 0x155   : > { %2799 = vmatprep.subr.bf16.mxu0 %v5418_v39  ;;  %2841 = vmatpush1.bf16.msra.mxu1 %v5470_v54 }
 0x156   : > { %2842 = vmatprep.subr.bf16.mxu1 %v5478_v49 }
 0x158   : > { %2800 = vmatpush1.bf16.msra.mxu0 %v5416_v40  ;;  %v6367_v40 = vshrl.u32 %v645_v38, 7  ;;  %v5515_v38 = vld [vmem:[#allocation8 + $0x1a8] ss:$16 sps:$4 sm:$0xff]  }
 0x159   : > { %2801 = vmatprep.subr.bf16.mxu0 %v5421_v13  ;;  %2843 = vmatpush1.bf16.msra.mxu1 %v5476_v48 }
 0x15a   : > { %2844 = vmatprep.subr.bf16.mxu1 %v5484_v52 }
 0x15c   : > { %2802 = vmatpush1.bf16.msra.mxu0 %v5419_v41 }
 0x15d   : > { %2803 = vmatprep.subr.bf16.mxu0 %v5424_v21  ;;  %2845 = vmatpush1.bf16.msra.mxu1 %v5482_v44  ;;  %v6370_v21 = vsub.s32 1, %v6367_v40 }
 0x15e   : > { %2846 = vmatprep.subr.bf16.mxu1 %v5490_v57 }
 0x160   : > { %2804 = vmatpush1.bf16.msra.mxu0 %v5422_v42  ;;  %v6373_v42 = vsub.s32 0, %v6367_v40 }
 0x161   : > { %2805 = vmatprep.subr.bf16.mxu0 %v5427_v26  ;;  %2847 = vmatpush1.bf16.msra.mxu1 %v5488_v56 }
 0x162   : > { %2848 = vmatprep.subr.bf16.mxu1 %v5496_v61  ;;  %v648_v54 = vrot.slane %v6375_v45, %v6373_v42 }
 0x164   : > { %2806 = vmatpush1.bf16.msra.mxu0 %v5425_v23  ;;  %v652_v23 = vrot.slane %v6375_v45, %v6370_v21 }
 0x165   : > { %2807 = vmatprep.subr.bf16.mxu0 %v5430_v47  ;;  %2849 = vmatpush1.bf16.msra.mxu1 %v5494_v60 }
 0x166   : > { %2850 = vmatprep.subr.bf16.mxu1 %v5502_v1 }
 0x168   : > { %2808 = vmatpush1.bf16.msra.mxu0 %v5428_v12 }
 0x169   : > { %2809 = vmatprep.subr.bf16.mxu0 %v5433_v50  ;;  %2851 = vmatpush1.bf16.msra.mxu1 %v5500_v0 }
 0x16a   : > { %2852 = vmatprep.subr.bf16.mxu1 %v5508_v5 }
 0x16c   : > { %2810 = vmatpush1.bf16.msra.mxu0 %v5431_v51 }
 0x16d   : > { %2811 = vmatprep.subr.bf16.mxu0 %v5436_v53  ;;  %2853 = vmatpush1.bf16.msra.mxu1 %v5506_v4 }
 0x16e   : > { %2854 = vmatprep.subr.bf16.mxu1 %v5514_v9 }
 0x170   : > { %2812 = vmatpush2.bf16.msra.mxu0 %v5434_v55 }
 0x171   : > { %2813 = vmatprep.subr.bf16.mxu0 %v5439_v58  ;;  %2855 = vmatpush2.bf16.msra.mxu1 %v5512_v8 }
 0x172   : > { %2856 = vmatprep.subr.bf16.mxu1 %v5520_v15 }
 0x174   : > { %2814 = vmatpush2.bf16.msra.mxu0 %v5437_v59 }
 0x175   : > { %2815 = vmatprep.subr.bf16.mxu0 %v5442_v62  ;;  %2857 = vmatpush2.bf16.msra.mxu1 %v5518_v14  ;;  %v5458_v14 = vld [vmem:[#allocation8 + $0xe8] ss:$16 sps:$4 sm:$0xff]  }
 0x176   : > { %2858 = vmatprep.subr.bf16.mxu1 %v5526_v19  ;;  %v5467_v19 = vld [vmem:[#allocation8 + $0xa8] ss:$16 sps:$4 sm:$0xff]  }
 0x178   : > { %2816 = vmatpush2.bf16.msra.mxu0 %v5440_v63 }
 0x179   : > { %2817 = vmatprep.subr.bf16.mxu0 %v5445_v2  ;;  %2859 = vmatpush2.bf16.msra.mxu1 %v5524_v18  ;;  %v5469_v18 = vld [vmem:[#allocation8 + $0xac] ss:$16 sps:$4 sm:$0xff]  }
 0x17a   : > { %2860 = vmatprep.subr.bf16.mxu1 %v5532_v24  ;;  %v5481_v24 = vld [vmem:[#allocation8 + $0x6c] ss:$16 sps:$4 sm:$0xff]  }
 0x17c   : > { %2818 = vmatpush2.bf16.msra.mxu0 %v5443_v3 }
 0x17d   : > { %2819 = vmatprep.subr.bf16.mxu0 %v5448_v6  ;;  %2861 = vmatpush2.bf16.msra.mxu1 %v5530_v27  ;;  %v5487_v27 = vld [vmem:[#allocation8 + $0x4c] ss:$16 sps:$4 sm:$0xff]  }
 0x17e   : > { %2862 = vmatprep.subr.bf16.mxu1 %v5538_v28  ;;  %v5485_v28 = vld [vmem:[#allocation8 + $0x48] ss:$16 sps:$4 sm:$0xff]  }
 0x180   : > { %2820 = vmatpush2.bf16.msra.mxu0 %v5446_v7 }
 0x181   : > { %2821 = vmatprep.subr.bf16.mxu0 %v5451_v10  ;;  %2863 = vmatpush2.bf16.msra.mxu1 %v5536_v29  ;;  %v5493_v29 = vld [vmem:[#allocation8 + $0x2c] ss:$16 sps:$4 sm:$0xff]  }
 0x182   : > { %2864 = vmatprep.subr.bf16.mxu1 %v5544_v30  ;;  %v5491_v30 = vld [vmem:[#allocation8 + $0x28] ss:$16 sps:$4 sm:$0xff]  }
 0x184   : > { %2822 = vmatpush2.bf16.msra.mxu0 %v5449_v11 }
 0x185   : > { %2823 = vmatprep.subr.bf16.mxu0 %v5454_v16  ;;  %2865 = vmatpush2.bf16.msra.mxu1 %v5542_v31  ;;  %v5463_v16 = vld [vmem:[#allocation8 + $0xcc] ss:$16 sps:$4 sm:$0xff]  }
 0x186   : > { %2866 = vmatprep.subr.bf16.mxu1 %v5550_v32  ;;  %v5499_v31 = vld [vmem:[#allocation8 + $0xc] ss:$16 sps:$4 sm:$0xff]   ;;  %v5497_v32 = vld [vmem:[#allocation8 + $0x8] ss:$16 sps:$4 sm:$0xff]  }
 0x187   : > { %v1683_v13 = vpop.f32.mrf.mxu0 }
 0x188   : > { %2824 = vmatpush2.bf16.msra.mxu0 %v5452_v17  ;;  %v1726_v37 = vpop.f32.mrf.mxu1  ;;  %v1684_v48 = vadd.f32 %v1683_v13, %v648_v54  ;;  %v5461_v17 = vld [vmem:[#allocation8 + $0xc8] ss:$16 sps:$4 sm:$0xff]  }
 0x189   : > { %2825 = vmatprep.subr.bf16.mxu0 %v5457_v20  ;;  %2867 = vmatpush2.bf16.msra.mxu1 %v5548_v33  ;;  %v1685_v43 = vpop.f32.mrf.mxu0  ;;  %v5475_v20 = vld [vmem:[#allocation8 + $0x8c] ss:$16 sps:$4 sm:$0xff]   ;;  %v5521_v13 = vld [vmem:[#allocation8 + $0x188] ss:$16 sps:$4 sm:$0xff]  }
 0x18a   : > { %2868 = vmatprep.subr.bf16.mxu1 %v5553_v34  ;;  %v1728_v39 = vpop.f32.mrf.mxu1  ;;  %v1686_v12 = vadd.f32 %v1685_v43, %v652_v23  ;;  %v1727_v55 = vadd.f32 %v1726_v37, %v1684_v48  ;;  %v5505_v33 = vld [vmem:[#allocation8 + $0x1ec] ss:$16 sps:$4 sm:$0xff]   ;;  %v5503_v34 = vld [vmem:[#allocation8 + $0x1e8] ss:$16 sps:$4 sm:$0xff]  }
 0x18b   : > { %v1687_v46 = vpop.f32.mrf.mxu0  ;;  %v5517_v37 = vld [vmem:[#allocation8 + $0x1ac] ss:$16 sps:$4 sm:$0xff]   ;;  %v5533_v48 = vld [vmem:[#allocation8 + $0x148] ss:$16 sps:$4 sm:$0xff]  }
 0x18c   : > { %2826 = vmatpush2.bf16.msra.mxu0 %v5455_v22  ;;  %v1730_v41 = vpop.f32.mrf.mxu1  ;;  %v1688_v50 = vadd.f32 %v1687_v46, %v648_v54  ;;  %v1729_v52 = vadd.f32 %v1728_v39, %v1686_v12  ;;  %v5473_v22 = vld [vmem:[#allocation8 + $0x88] ss:$16 sps:$4 sm:$0xff]   ;;  %v5523_v39 = vld [vmem:[#allocation8 + $0x18c] ss:$16 sps:$4 sm:$0xff]   ;;  %v6385_v46 = vsub.s32 3, %v6367_v40 }
 0x18d   : > { %2881 = vmatprep.subr.bf16.mxu0 %v5460_v25  ;;  %2869 = vmatpush2.bf16.msra.mxu1 %v5551_v35  ;;  %v1689_v49 = vpop.f32.mrf.mxu0  ;;  %v5479_v25 = vld [vmem:[#allocation8 + $0x68] ss:$16 sps:$4 sm:$0xff]   ;;  %v5511_v35 = vld [vmem:[#allocation8 + $0x1cc] ss:$16 sps:$4 sm:$0xff]  }
 0x18e   : > { %2924 = vmatprep.subr.bf16.mxu1 %v5556_v36  ;;  %v1732_v26 = vpop.f32.mrf.mxu1  ;;  %v1690_v53 = vadd.f32 %v1689_v49, %v652_v23  ;;  %v1731_v57 = vadd.f32 %v1730_v41, %v1688_v50  ;;  %v5509_v36 = vld [vmem:[#allocation8 + $0x1c8] ss:$16 sps:$4 sm:$0xff]   ;;  %v5529_v43 = vld [vmem:[#allocation8 + $0x16c] ss:$16 sps:$4 sm:$0xff]  }
 0x18f   : > { %v5535_v54 = vld [vmem:[#allocation8 + $0x14c] ss:$16 sps:$4 sm:$0xff]  }
 0x190   : > { %v1812_v47 = vpop.f32.mrf.mxu1  ;;  %v1733_v62 = vadd.f32 %v1732_v26, %v1690_v53  ;;  %v5527_v26 = vld [vmem:[#allocation8 + $0x168] ss:$16 sps:$4 sm:$0xff]  }
 0x192   : > { %v1814_v51 = vpop.f32.mrf.mxu1 }
 0x194   : > { %v1816_v59 = vpop.f32.mrf.mxu1 }
 0x196   : > { %v1818_v4 = vpop.f32.mrf.mxu1 }
 0x1c7   : > { %v1769_v44 = vpop.f32.mrf.mxu0 }
 0x1c8   : > { %v1770_v60 = vadd.f32 %v1769_v44, %v1727_v55  ;;  %v660_v44 = vrot.slane %v6375_v45, %v6385_v46  ;;  %v5539_v55 = vld [vmem:[#allocation8 + $0x128] ss:$16 sps:$4 sm:$0xff]  }
 0x1c9   : > { %v1771_v56 = vpop.f32.mrf.mxu0 }
 0x1ca   : > { %v1772_v58 = vadd.f32 %v1771_v56, %v1729_v52  ;;  %v1813_v5 = vadd.f32 %v1812_v47, %v1770_v60  ;;  %v6388_v47 = vsub.s32 2, %v6367_v40  ;;  %v5547_v40 = vld [vmem:[#allocation8 + $0x10c] ss:$16 sps:$4 sm:$0xff]  }
 0x1cb   : > { %v1773_v61 = vpop.f32.mrf.mxu0 }
 0x1cc   : > { %v1774_v63 = vadd.f32 %v1773_v61, %v1731_v57  ;;  %v1815_v1 = vadd.f32 %v1814_v51, %v1772_v58  ;;  %v1993_v10 = vmax.f32 %v1813_v5, 0.0  ;;  %v5541_v51 = vld [vmem:[#allocation8 + $0x12c] ss:$16 sps:$4 sm:$0xff]   ;;  %v656_v52 = vrot.slane %v6375_v45, %v6388_v47 }
 0x1cd   : > { %v1775_v0 = vpop.f32.mrf.mxu0 }
 0x1ce   : > { %v1817_v2 = vadd.f32 %v1816_v59, %v1774_v63  ;;  %v1776_v3 = vadd.f32 %v1775_v0, %v1733_v62  ;;  %v1994_v8 = vmax.f32 %v1815_v1, 0.0  ;;  %v5545_v0 = vld [vmem:[#allocation8 + $0x108] ss:$16 sps:$4 sm:$0xff]  }
 0x1d0   : > { %v1819_v6 = vadd.f32 %v1818_v4, %v1776_v3  ;;  %v1997_v7 = vmax.f32 %v1817_v2, 0.0  ;;  %v1855_v41 = vpop.f32.mrf.mxu1 }
 0x1d1   : > { %v1856_v59 = vadd.f32 %v1855_v41, %v656_v52  ;;  %v5613_v41 = vld [vmem:[#allocation10 + $0x84] ss:$16 sps:$4 sm:$0xff]  }
 0x1d2   : > { %v1998_v9 = vmax.f32 %v1819_v6, 0.0  ;;  %v6381_v15 = vpack.c.bf16 %v1997_v7, %v1993_v10  ;;  %v1857_v23 = vpop.f32.mrf.mxu1 }
 0x1d3   : > { %v1858_v58 = vadd.f32 %v1857_v23, %v660_v44  ;;  %v5611_v23 = vld [vmem:[#allocation10 + $0x80] ss:$16 sps:$4 sm:$0xff]  }
 0x1d4   : > { %v2002_v11 = vpack.c.bf16 %v1998_v9, %v1994_v8  ;;  %v1859_v49 = vpop.f32.mrf.mxu1 }
 0x1d5   : > { %v1860_v62 = vadd.f32 %v1859_v49, %v656_v52  ;;  %v5614_v49 = vld [vmem:[#allocation10 + $0x60] ss:$16 sps:$4 sm:$0xff]  }
 0x1d6   : > { %2827 = vmatprep.mubr.bf16.mxu0 %v2002_v11  ;;  %v1861_v56 = vpop.f32.mrf.mxu1  ;;  %v5617_v52 = vld [vmem:[#allocation10 + $0x40] ss:$16 sps:$4 sm:$0xff]  }
 0x1d7   : > { %2828 = vmatmul.mubr.bf16.vlgmr.msra.gmra.mxu0 %v6381_v15  ;;  %v1862_v45 = vadd.f32 %v1861_v56, %v660_v44  ;;  %v5574_v44 = vld [vmem:[#allocation8 + $0x22c] ss:$16 sps:$4 sm:$0xff]  }
 0x1d8   : > { %2882 = vmatpush1.bf16.msra.mxu0 %v5458_v14  ;;  %2913 = vmatprep.mubr.bf16.mxu0 %v2002_v11  ;;  %v5577_v56 = vld [vmem:[#allocation8 + $0x20c] ss:$16 sps:$4 sm:$0xff]  }
 0x1d9   : > { %2883 = vmatprep.subr.bf16.mxu0 %v5463_v16 }
 0x1dc   : > { %2884 = vmatpush1.bf16.msra.mxu0 %v5461_v17 }
 0x1dd   : > { %2885 = vmatprep.subr.bf16.mxu0 %v5469_v18 }
 0x1e0   : > { %2886 = vmatpush1.bf16.msra.mxu0 %v5467_v19 }
 0x1e1   : > { %2887 = vmatprep.subr.bf16.mxu0 %v5475_v20 }
 0x1e4   : > { %2888 = vmatpush1.bf16.msra.mxu0 %v5473_v22 }
 0x1e5   : > { %2889 = vmatprep.subr.bf16.mxu0 %v5481_v24 }
 0x1e8   : > { %2890 = vmatpush1.bf16.msra.mxu0 %v5479_v25 }
 0x1e9   : > { %2891 = vmatprep.subr.bf16.mxu0 %v5487_v27 }
 0x1ec   : > { %2892 = vmatpush1.bf16.msra.mxu0 %v5485_v28 }
 0x1ed   : > { %2893 = vmatprep.subr.bf16.mxu0 %v5493_v29  ;;  %v5554_v29 = vld [vmem:[#allocation8 + $0x2e8] ss:$16 sps:$4 sm:$0xff]  }
 0x1f0   : > { %2894 = vmatpush1.bf16.msra.mxu0 %v5491_v30 }
 0x1f1   : > { %2895 = vmatprep.subr.bf16.mxu0 %v5499_v31  ;;  %v5559_v31 = vld [vmem:[#allocation8 + $0x2cc] ss:$16 sps:$4 sm:$0xff]  }
 0x1f4   : > { %2896 = vmatpush1.bf16.msra.mxu0 %v5497_v32  ;;  %v5602_v32 = vld [vmem:[#allocation10 + $0xe0] ss:$16 sps:$4 sm:$0xff]  }
 0x1f5   : > { %2897 = vmatprep.subr.bf16.mxu0 %v5505_v33  ;;  %v5604_v33 = vld [vmem:[#allocation10 + $0xe4] ss:$16 sps:$4 sm:$0xff]  }
 0x1f8   : > { %2898 = vmatpush2.bf16.msra.mxu0 %v5503_v34  ;;  %v5607_v34 = vld [vmem:[#allocation10 + $0xc4] ss:$16 sps:$4 sm:$0xff]  }
 0x1f9   : > { %2899 = vmatprep.subr.bf16.mxu0 %v5511_v35  ;;  %v5557_v35 = vld [vmem:[#allocation8 + $0x2c8] ss:$16 sps:$4 sm:$0xff]  }
 0x1fc   : > { %2900 = vmatpush2.bf16.msra.mxu0 %v5509_v36  ;;  %v5605_v36 = vld [vmem:[#allocation10 + $0xc0] ss:$16 sps:$4 sm:$0xff]  }
 0x1fd   : > { %2901 = vmatprep.subr.bf16.mxu0 %v5517_v37  ;;  %v5610_v37 = vld [vmem:[#allocation10 + $0xa4] ss:$16 sps:$4 sm:$0xff]  }
 0x200   : > { %2902 = vmatpush2.bf16.msra.mxu0 %v5515_v38  ;;  %v5560_v38 = vld [vmem:[#allocation8 + $0x2a8] ss:$16 sps:$4 sm:$0xff]  }
 0x201   : > { %2903 = vmatprep.subr.bf16.mxu0 %v5523_v39  ;;  %v5565_v39 = vld [vmem:[#allocation8 + $0x28c] ss:$16 sps:$4 sm:$0xff]  }
 0x204   : > { %2904 = vmatpush2.bf16.msra.mxu0 %v5521_v13  ;;  %v5608_v13 = vld [vmem:[#allocation10 + $0xa0] ss:$16 sps:$4 sm:$0xff]  }
 0x205   : > { %2905 = vmatprep.subr.bf16.mxu0 %v5529_v43  ;;  %v5563_v43 = vld [vmem:[#allocation8 + $0x288] ss:$16 sps:$4 sm:$0xff]  }
 0x207   : > { %v1898_v12 = vpop.f32.mrf.mxu0 }
 0x208   : > { %2906 = vmatpush2.bf16.msra.mxu0 %v5527_v26  ;;  %v1899_v1 = vadd.f32 %v1898_v12, %v1856_v59  ;;  %v5568_v26 = vld [vmem:[#allocation8 + $0x26c] ss:$16 sps:$4 sm:$0xff]   ;;  %v5566_v12 = vld [vmem:[#allocation8 + $0x268] ss:$16 sps:$4 sm:$0xff]  }
 0x209   : > { %v1900_v50 = vpop.f32.mrf.mxu0  ;;  %2907 = vmatprep.subr.bf16.mxu0 %v5535_v54  ;;  %v5616_v54 = vld [vmem:[#allocation10 + $0x64] ss:$16 sps:$4 sm:$0xff]   ;;  %v5580_v59 = vld [vmem:[#allocation8 + $0x3ec] ss:$16 sps:$4 sm:$0xff]  }
 0x20a   : > { %v1901_v63 = vadd.f32 %v1900_v50, %v1858_v58  ;;  %v5619_v50 = vld [vmem:[#allocation10 + $0x44] ss:$16 sps:$4 sm:$0xff]   ;;  %v5575_v58 = vld [vmem:[#allocation8 + $0x208] ss:$16 sps:$4 sm:$0xff]  }
 0x20b   : > { %v1902_v53 = vpop.f32.mrf.mxu0 }
 0x20c   : > { %2908 = vmatpush2.bf16.msra.mxu0 %v5533_v48  ;;  %v1903_v4 = vadd.f32 %v1902_v53, %v1860_v62  ;;  %v5571_v48 = vld [vmem:[#allocation8 + $0x24c] ss:$16 sps:$4 sm:$0xff]   ;;  %v5622_v53 = vld [vmem:[#allocation10 + $0x24] ss:$16 sps:$4 sm:$0xff]   ;;  %v5578_v62 = vld [vmem:[#allocation8 + $0x3e8] ss:$16 sps:$4 sm:$0xff]  }
 0x20d   : > { %v1904_v57 = vpop.f32.mrf.mxu0  ;;  %2909 = vmatprep.subr.bf16.mxu0 %v5541_v51  ;;  %v5569_v51 = vld [vmem:[#allocation8 + $0x248] ss:$16 sps:$4 sm:$0xff]  }
 0x20e   : > { %v1905_v9 = vadd.f32 %v1904_v57, %v1862_v45  ;;  %v5620_v57 = vld [vmem:[#allocation10 + $0x20] ss:$16 sps:$4 sm:$0xff]  }
 0x20f   : > { %v1984_v61 = vpop.f32.mrf.mxu0  ;;  %v5629_v45 = vld [vmem:[#allocation10 + $0x1c0] ss:$16 sps:$4 sm:$0xff]  }
 0x210   : > { %v1941_v60 = vpop.f32.mrf.mxu1  ;;  %2910 = vmatpush2.bf16.msra.mxu0 %v5539_v55  ;;  %v5572_v55 = vld [vmem:[#allocation8 + $0x228] ss:$16 sps:$4 sm:$0xff]  }
 0x211   : > { %v1986_v3 = vpop.f32.mrf.mxu0  ;;  %2911 = vmatprep.subr.bf16.mxu0 %v5547_v40  ;;  %v1942_v6 = vadd.f32 %v1941_v60, %v1899_v1  ;;  %v5625_v40 = vld [vmem:[#allocation10 + $0x4] ss:$16 sps:$4 sm:$0xff]   ;;  %v5623_v60 = vld [vmem:[#allocation10] ss:$16 sps:$4 sm:$0xff]  }
 0x212   : > { %v1943_v2 = vpop.f32.mrf.mxu1  ;;  %v5631_v1 = vld [vmem:[#allocation10 + $0x1c4] ss:$16 sps:$4 sm:$0xff]  }
 0x213   : > { %v1944_v5 = vadd.f32 %v1943_v2, %v1901_v63  ;;  %v1988_v8 = vpop.f32.mrf.mxu0  ;;  %v1985_v19 = vadd.f32 %v1984_v61, %v1942_v6  ;;  %v5628_v61 = vld [vmem:[#allocation10 + $0x1e4] ss:$16 sps:$4 sm:$0xff]   ;;  %v5583_v63 = vld [vmem:[#allocation8 + $0x3cc] ss:$16 sps:$4 sm:$0xff]   ;;  %v5581_v2 = vld [vmem:[#allocation8 + $0x3c8] ss:$16 sps:$4 sm:$0xff]  }
 0x214   : > { %v1945_v7 = vpop.f32.mrf.mxu1  ;;  %2912 = vmatpush2.bf16.msra.mxu0 %v5545_v0  ;;  %v5626_v0 = vld [vmem:[#allocation10 + $0x1e0] ss:$16 sps:$4 sm:$0xff]   ;;  %v5589_v6 = vld [vmem:[#allocation8 + $0x38c] ss:$16 sps:$4 sm:$0xff]  }
 0x215   : > { %v1946_v10 = vadd.f32 %v1945_v7, %v1903_v4  ;;  %v1990_v14 = vpop.f32.mrf.mxu0  ;;  %v1987_v16 = vadd.f32 %v1986_v3, %v1944_v5  ;;  %v1995_v27 = vmax.f32 %v1985_v19, 0.0  ;;  %3769 = vmatprep.subr.bf16.mxu0 %v5604_v33  ;;  %v5586_v3 = vld [vmem:[#allocation8 + $0x3ac] ss:$16 sps:$4 sm:$0xff]   ;;  %v5634_v4 = vld [vmem:[#allocation10 + $0x1a4] ss:$16 sps:$4 sm:$0xff]  }
 0x216   : > { %v1947_v11 = vpop.f32.mrf.mxu1  ;;  %v5584_v5 = vld [vmem:[#allocation8 + $0x3a8] ss:$16 sps:$4 sm:$0xff]   ;;  %v5632_v7 = vld [vmem:[#allocation10 + $0x1a0] ss:$16 sps:$4 sm:$0xff]   ;;  %v5637_v19 = vld [vmem:[#allocation10 + $0x184] ss:$16 sps:$4 sm:$0xff]  }
 0x217   : > { %v1989_v17 = vadd.f32 %v1988_v8, %v1946_v10  ;;  %v1948_v18 = vadd.f32 %v1947_v11, %v1905_v9  ;;  %2914 = vmatmul.mubr.bf16.vlgmr.msra.gmra.mxu0 %v6381_v15  ;;  %v1996_v24 = vmax.f32 %v1987_v16, 0.0  ;;  %v5562_v15 = vld [vmem:[#allocation8 + $0x2ac] ss:$16 sps:$4 sm:$0xff]   ;;  %v5587_v8 = vld [vmem:[#allocation8 + $0x388] ss:$16 sps:$4 sm:$0xff]  }
 0x218   : > { %3770 = vmatpush1.bf16.msra.mxu0 %v5602_v32  ;;  %v5592_v9 = vld [vmem:[#allocation8 + $0x36c] ss:$16 sps:$4 sm:$0xff]   ;;  %v5590_v10 = vld [vmem:[#allocation8 + $0x368] ss:$16 sps:$4 sm:$0xff]   ;;  %v5649_v32 = vld [vmem:[#allocation10 + $0x104] ss:$16 sps:$4 sm:$0xff]  }
 0x219   : > { %v1991_v20 = vadd.f32 %v1990_v14, %v1948_v18  ;;  %v1999_v22 = vmax.f32 %v1989_v17, 0.0  ;;  %3771 = vmatprep.subr.bf16.mxu0 %v5607_v34  ;;  %v5595_v11 = vld [vmem:[#allocation8 + $0x34c] ss:$16 sps:$4 sm:$0xff]   ;;  %v5593_v14 = vld [vmem:[#allocation8 + $0x348] ss:$16 sps:$4 sm:$0xff]  }
 0x21a   : > { %v5598_v16 = vld [vmem:[#allocation8 + $0x32c] ss:$16 sps:$4 sm:$0xff]   ;;  %v5596_v17 = vld [vmem:[#allocation8 + $0x328] ss:$16 sps:$4 sm:$0xff]   ;;  %v5647_v33 = vld [vmem:[#allocation10 + $0x100] ss:$16 sps:$4 sm:$0xff]  }
 0x21b   : > { %v2000_v25 = vmax.f32 %v1991_v20, 0.0  ;;  %v6395_v30 = vpack.c.bf16 %v1999_v22, %v1995_v27  ;;  %v5601_v18 = vld [vmem:[#allocation8 + $0x30c] ss:$16 sps:$4 sm:$0xff]   ;;  %v5599_v20 = vld [vmem:[#allocation8 + $0x308] ss:$16 sps:$4 sm:$0xff]  }
 0x21c   : > { %3772 = vmatpush1.bf16.msra.mxu0 %v5605_v36  ;;  %v5635_v22 = vld [vmem:[#allocation10 + $0x180] ss:$16 sps:$4 sm:$0xff]   ;;  %v5643_v27 = vld [vmem:[#allocation10 + $0x144] ss:$16 sps:$4 sm:$0xff]  }
 0x21d   : > { %v2004_v28 = vpack.c.bf16 %v2000_v25, %v1996_v24  ;;  %3773 = vmatprep.subr.bf16.mxu0 %v5610_v37  ;;  %v5640_v24 = vld [vmem:[#allocation10 + $0x164] ss:$16 sps:$4 sm:$0xff]   ;;  %v5638_v25 = vld [vmem:[#allocation10 + $0x160] ss:$16 sps:$4 sm:$0xff]  }
 0x21e   : > { %v5650_v34 = vld [vmem:[#allocation10 + $0x2e0] ss:$16 sps:$4 sm:$0xff]  }
 0x21f   : > { %2870 = vmatprep.mubr.bf16.mxu1 %v2004_v28  ;;  %v5656_v36 = vld [vmem:[#allocation10 + $0x2c0] ss:$16 sps:$4 sm:$0xff]  }
 0x220   : > { %2871 = vmatmul.mubr.bf16.vlgmr.msra.gmra.mxu1 %v6395_v30  ;;  %3774 = vmatpush1.bf16.msra.mxu0 %v5608_v13  ;;  %v5662_v37 = vld [vmem:[#allocation10 + $0x2a0] ss:$16 sps:$4 sm:$0xff]   ;;  %v5670_v13 = vld [vmem:[#allocation10 + $0x284] ss:$16 sps:$4 sm:$0xff]  }
 0x221   : > { %2925 = vmatpush1.bf16.msra.mxu1 %v5554_v29  ;;  %2956 = vmatprep.mubr.bf16.mxu1 %v2004_v28  ;;  %v5641_v28 = vld [vmem:[#allocation10 + $0x140] ss:$16 sps:$4 sm:$0xff]   ;;  %v5646_v29 = vld [vmem:[#allocation10 + $0x124] ss:$16 sps:$4 sm:$0xff]  }
 0x222   : > { %2926 = vmatprep.subr.bf16.mxu1 %v5559_v31  ;;  %3775 = vmatprep.subr.bf16.mxu0 %v5613_v41  ;;  %v5644_v31 = vld [vmem:[#allocation10 + $0x120] ss:$16 sps:$4 sm:$0xff]  }
 0x223   : > { %v5674_v41 = vld [vmem:[#allocation10 + $0x260] ss:$16 sps:$4 sm:$0xff]  }
 0x224   : > { %3776 = vmatpush1.bf16.msra.mxu0 %v5611_v23  ;;  %v5682_v23 = vld [vmem:[#allocation10 + $0x244] ss:$16 sps:$4 sm:$0xff]  }
 0x225   : > { %2927 = vmatpush1.bf16.msra.mxu1 %v5557_v35  ;;  %3777 = vmatprep.subr.bf16.mxu0 %v5616_v54  ;;  %v5652_v35 = vld [vmem:[#allocation10 + $0x2e4] ss:$16 sps:$4 sm:$0xff]   ;;  %v5686_v54 = vld [vmem:[#allocation10 + $0x220] ss:$16 sps:$4 sm:$0xff]  }
 0x226   : > { %2928 = vmatprep.subr.bf16.mxu1 %v5562_v15  ;;  %v5655_v15 = vld [vmem:[#allocation10 + $0xec] ss:$16 sps:$4 sm:$0xff]  }
 0x228   : > { %3778 = vmatpush1.bf16.msra.mxu0 %v5614_v49  ;;  %v5694_v49 = vld [vmem:[#allocation10 + $0x204] ss:$16 sps:$4 sm:$0xff]  }
 0x229   : > { %2929 = vmatpush1.bf16.msra.mxu1 %v5560_v38  ;;  %3779 = vmatprep.subr.bf16.mxu0 %v5619_v50  ;;  %v5664_v38 = vld [vmem:[#allocation10 + $0x2a4] ss:$16 sps:$4 sm:$0xff]   ;;  %v5698_v50 = vld [vmem:[#allocation10 + $0x3e0] ss:$16 sps:$4 sm:$0xff]  }
 0x22a   : > { %2930 = vmatprep.subr.bf16.mxu1 %v5565_v39  ;;  %v5668_v39 = vld [vmem:[#allocation10 + $0x280] ss:$16 sps:$4 sm:$0xff]  }
 0x22c   : > { %3780 = vmatpush1.bf16.msra.mxu0 %v5617_v52  ;;  %v5706_v52 = vld [vmem:[#allocation10 + $0x3c4] ss:$16 sps:$4 sm:$0xff]  }
 0x22d   : > { %2931 = vmatpush1.bf16.msra.mxu1 %v5563_v43  ;;  %3781 = vmatprep.subr.bf16.mxu0 %v5622_v53  ;;  %v5676_v43 = vld [vmem:[#allocation10 + $0x264] ss:$16 sps:$4 sm:$0xff]   ;;  %v5710_v53 = vld [vmem:[#allocation10 + $0x3a0] ss:$16 sps:$4 sm:$0xff]  }
 0x22e   : > { %2932 = vmatprep.subr.bf16.mxu1 %v5568_v26  ;;  %v5680_v26 = vld [vmem:[#allocation10 + $0x240] ss:$16 sps:$4 sm:$0xff]  }
 0x230   : > { %3782 = vmatpush1.bf16.msra.mxu0 %v5620_v57  ;;  %v5718_v57 = vld [vmem:[#allocation10 + $0x384] ss:$16 sps:$4 sm:$0xff]  }
 0x231   : > { %2933 = vmatpush1.bf16.msra.mxu1 %v5566_v12  ;;  %3783 = vmatprep.subr.bf16.mxu0 %v5625_v40  ;;  %v5688_v12 = vld [vmem:[#allocation10 + $0x224] ss:$16 sps:$4 sm:$0xff]   ;;  %v5722_v40 = vld [vmem:[#allocation10 + $0x360] ss:$16 sps:$4 sm:$0xff]  }
 0x232   : > { %2934 = vmatprep.subr.bf16.mxu1 %v5571_v48  ;;  %v5692_v48 = vld [vmem:[#allocation10 + $0x200] ss:$16 sps:$4 sm:$0xff]  }
 0x234   : > { %3784 = vmatpush1.bf16.msra.mxu0 %v5623_v60  ;;  %v5728_v60 = vld [vmem:[#allocation10 + $0x340] ss:$16 sps:$4 sm:$0xff]  }
 0x235   : > { %2935 = vmatpush1.bf16.msra.mxu1 %v5569_v51  ;;  %3785 = vmatprep.subr.bf16.mxu0 %v5628_v61  ;;  %v5700_v51 = vld [vmem:[#allocation10 + $0x3e4] ss:$16 sps:$4 sm:$0xff]  }
 0x236   : > { %2936 = vmatprep.subr.bf16.mxu1 %v5574_v44  ;;  %v5704_v44 = vld [vmem:[#allocation10 + $0x3c0] ss:$16 sps:$4 sm:$0xff]   ;;  %v5736_v61 = vld [vmem:[#allocation10 + $0x324] ss:$16 sps:$4 sm:$0xff]  }
 0x238   : > { %3786 = vmatpush2.bf16.msra.mxu0 %v5626_v0  ;;  %v5740_v0 = vld [vmem:[#allocation10 + $0x300] ss:$16 sps:$4 sm:$0xff]  }
 0x239   : > { %2937 = vmatpush1.bf16.msra.mxu1 %v5572_v55  ;;  %3787 = vmatprep.subr.bf16.mxu0 %v5631_v1  ;;  %v5712_v55 = vld [vmem:[#allocation10 + $0x3a4] ss:$16 sps:$4 sm:$0xff]   ;;  %v5748_v1 = vld [vmem:[#allocation10 + $0x2ec] ss:$16 sps:$4 sm:$0xff]  }
 0x23a   : > { %2938 = vmatprep.subr.bf16.mxu1 %v5577_v56  ;;  %v5716_v56 = vld [vmem:[#allocation10 + $0x380] ss:$16 sps:$4 sm:$0xff]  }
 0x23c   : > { %3788 = vmatpush2.bf16.msra.mxu0 %v5629_v45  ;;  %v6402_v45 = vld [vmem:[%s6484_s4] sm:$0xf] }
 0x23d   : > { %2939 = vmatpush1.bf16.msra.mxu1 %v5575_v58  ;;  %3789 = vmatprep.subr.bf16.mxu0 %v5634_v4  ;;  %v5724_v58 = vld [vmem:[#allocation10 + $0x364] ss:$16 sps:$4 sm:$0xff]  }
 0x23e   : > { %2940 = vmatprep.subr.bf16.mxu1 %v5580_v59  ;;  %v5730_v59 = vld [vmem:[#allocation10 + $0x344] ss:$16 sps:$4 sm:$0xff]  }
 0x240   : > { %3790 = vmatpush2.bf16.msra.mxu0 %v5632_v7 }
 0x241   : > { %2941 = vmatpush2.bf16.msra.mxu1 %v5578_v62  ;;  %3791 = vmatprep.subr.bf16.mxu0 %v5637_v19  ;;  %v5734_v62 = vld [vmem:[#allocation10 + $0x320] ss:$16 sps:$4 sm:$0xff]  }
 0x242   : > { %2942 = vmatprep.subr.bf16.mxu1 %v5583_v63  ;;  %v5742_v63 = vld [vmem:[#allocation10 + $0x304] ss:$16 sps:$4 sm:$0xff]  }
 0x244   : > { %3792 = vmatpush2.bf16.msra.mxu0 %v5635_v22 }
 0x245   : > { %2943 = vmatpush2.bf16.msra.mxu1 %v5581_v2  ;;  %3793 = vmatprep.subr.bf16.mxu0 %v5640_v24 }
 0x246   : > { %2944 = vmatprep.subr.bf16.mxu1 %v5586_v3 }
 0x248   : > { %3794 = vmatpush2.bf16.msra.mxu0 %v5638_v25 }
 0x249   : > { %2945 = vmatpush2.bf16.msra.mxu1 %v5584_v5  ;;  %3795 = vmatprep.subr.bf16.mxu0 %v5643_v27  ;;  %v2142_v5 = vrot.slane %v6402_v45, %v6370_v21 }
 0x24a   : > { %2946 = vmatprep.subr.bf16.mxu1 %v5589_v6  ;;  %v2138_v6 = vrot.slane %v6402_v45, %v6373_v42 }
 0x24c   : > { %3796 = vmatpush2.bf16.msra.mxu0 %v5641_v28 }
 0x24d   : > { %2947 = vmatpush2.bf16.msra.mxu1 %v5587_v8  ;;  %3797 = vmatprep.subr.bf16.mxu0 %v5646_v29 }
 0x24e   : > { %2948 = vmatprep.subr.bf16.mxu1 %v5592_v9 }
 0x250   : > { %3798 = vmatpush2.bf16.msra.mxu0 %v5644_v31 }
 0x251   : > { %2949 = vmatpush2.bf16.msra.mxu1 %v5590_v10  ;;  %3799 = vmatprep.subr.bf16.mxu0 %v5649_v32  ;;  %v5653_v32 = vld [vmem:[#allocation10 + $0xe8] ss:$16 sps:$4 sm:$0xff]  }
 0x252   : > { %2950 = vmatprep.subr.bf16.mxu1 %v5595_v11 }
 0x254   : > { %3800 = vmatpush2.bf16.msra.mxu0 %v5647_v33 }
 0x255   : > { %2951 = vmatpush2.bf16.msra.mxu1 %v5593_v14  ;;  %3855 = vmatprep.subr.bf16.mxu0 %v5655_v15  ;;  %v5667_v15 = vld [vmem:[#allocation10 + $0xac] ss:$16 sps:$4 sm:$0xff]  }
 0x256   : > { %2952 = vmatprep.subr.bf16.mxu1 %v5598_v16 }
 0x259   : > { %2953 = vmatpush2.bf16.msra.mxu1 %v5596_v17 }
 0x25a   : > { %2954 = vmatprep.subr.bf16.mxu1 %v5601_v18 }
 0x25d   : > { %2955 = vmatpush2.bf16.msra.mxu1 %v5599_v20 }
 0x25e   : > { %3812 = vmatprep.subr.bf16.mxu1 %v5652_v35  ;;  %v5659_v35 = vld [vmem:[#allocation10 + $0xc8] ss:$16 sps:$4 sm:$0xff]  }
 0x260   : > { %2957 = vmatmul.mubr.bf16.vlgmr.msra.gmra.mxu1 %v6395_v30  ;;  %v5658_v30 = vld [vmem:[#allocation10 + $0x2c4] ss:$16 sps:$4 sm:$0xff]  }
 0x261   : > { %3813 = vmatpush1.bf16.msra.mxu1 %v5650_v34  ;;  %v5661_v34 = vld [vmem:[#allocation10 + $0xcc] ss:$16 sps:$4 sm:$0xff]  }
 0x262   : > { %3814 = vmatprep.subr.bf16.mxu1 %v5658_v30  ;;  %v5673_v30 = vld [vmem:[#allocation10 + $0x8c] ss:$16 sps:$4 sm:$0xff]  }
 0x265   : > { %3815 = vmatpush1.bf16.msra.mxu1 %v5656_v36  ;;  %v5665_v36 = vld [vmem:[#allocation10 + $0xa8] ss:$16 sps:$4 sm:$0xff]  }
 0x266   : > { %3816 = vmatprep.subr.bf16.mxu1 %v5664_v38  ;;  %v5679_v38 = vld [vmem:[#allocation10 + $0x6c] ss:$16 sps:$4 sm:$0xff]  }
 0x269   : > { %3817 = vmatpush1.bf16.msra.mxu1 %v5662_v37  ;;  %v5671_v37 = vld [vmem:[#allocation10 + $0x88] ss:$16 sps:$4 sm:$0xff]  }
 0x26a   : > { %3818 = vmatprep.subr.bf16.mxu1 %v5670_v13  ;;  %v5685_v13 = vld [vmem:[#allocation10 + $0x4c] ss:$16 sps:$4 sm:$0xff]  }
 0x26d   : > { %3819 = vmatpush1.bf16.msra.mxu1 %v5668_v39  ;;  %v5677_v39 = vld [vmem:[#allocation10 + $0x68] ss:$16 sps:$4 sm:$0xff]  }
 0x26e   : > { %3820 = vmatprep.subr.bf16.mxu1 %v5676_v43  ;;  %v5691_v43 = vld [vmem:[#allocation10 + $0x2c] ss:$16 sps:$4 sm:$0xff]  }
 0x271   : > { %3821 = vmatpush1.bf16.msra.mxu1 %v5674_v41  ;;  %v5683_v41 = vld [vmem:[#allocation10 + $0x48] ss:$16 sps:$4 sm:$0xff]  }
 0x272   : > { %3822 = vmatprep.subr.bf16.mxu1 %v5682_v23  ;;  %v5697_v23 = vld [vmem:[#allocation10 + $0xc] ss:$16 sps:$4 sm:$0xff]  }
 0x275   : > { %3823 = vmatpush1.bf16.msra.mxu1 %v5680_v26  ;;  %v5689_v26 = vld [vmem:[#allocation10 + $0x28] ss:$16 sps:$4 sm:$0xff]  }
 0x276   : > { %3824 = vmatprep.subr.bf16.mxu1 %v5688_v12  ;;  %v5703_v12 = vld [vmem:[#allocation10 + $0x1ec] ss:$16 sps:$4 sm:$0xff]  }
 0x279   : > { %3825 = vmatpush1.bf16.msra.mxu1 %v5686_v54  ;;  %v5695_v54 = vld [vmem:[#allocation10 + $0x8] ss:$16 sps:$4 sm:$0xff]  }
 0x27a   : > { %3826 = vmatprep.subr.bf16.mxu1 %v5694_v49  ;;  %v5709_v49 = vld [vmem:[#allocation10 + $0x1cc] ss:$16 sps:$4 sm:$0xff]  }
 0x27d   : > { %3827 = vmatpush1.bf16.msra.mxu1 %v5692_v48  ;;  %v5701_v48 = vld [vmem:[#allocation10 + $0x1e8] ss:$16 sps:$4 sm:$0xff]  }
 0x27e   : > { %3828 = vmatprep.subr.bf16.mxu1 %v5700_v51  ;;  %v5715_v51 = vld [vmem:[#allocation10 + $0x1ac] ss:$16 sps:$4 sm:$0xff]  }
 0x281   : > { %3829 = vmatpush2.bf16.msra.mxu1 %v5698_v50  ;;  %v5707_v50 = vld [vmem:[#allocation10 + $0x1c8] ss:$16 sps:$4 sm:$0xff]  }
 0x282   : > { %3830 = vmatprep.subr.bf16.mxu1 %v5706_v52  ;;  %v5721_v52 = vld [vmem:[#allocation10 + $0x18c] ss:$16 sps:$4 sm:$0xff]  }
 0x285   : > { %3831 = vmatpush2.bf16.msra.mxu1 %v5704_v44  ;;  %v5713_v44 = vld [vmem:[#allocation10 + $0x1a8] ss:$16 sps:$4 sm:$0xff]  }
 0x286   : > { %3832 = vmatprep.subr.bf16.mxu1 %v5712_v55  ;;  %v5719_v55 = vld [vmem:[#allocation10 + $0x188] ss:$16 sps:$4 sm:$0xff]  }
 0x289   : > { %3833 = vmatpush2.bf16.msra.mxu1 %v5710_v53 }
 0x28a   : > { %3834 = vmatprep.subr.bf16.mxu1 %v5718_v57 }
 0x28d   : > { %3835 = vmatpush2.bf16.msra.mxu1 %v5716_v56  ;;  %v5727_v56 = vld [vmem:[#allocation10 + $0x16c] ss:$16 sps:$4 sm:$0xff]  }
 0x28e   : > { %3836 = vmatprep.subr.bf16.mxu1 %v5724_v58  ;;  %v5733_v58 = vld [vmem:[#allocation10 + $0x14c] ss:$16 sps:$4 sm:$0xff]  }
 0x291   : > { %3837 = vmatpush2.bf16.msra.mxu1 %v5722_v40  ;;  %v5725_v40 = vld [vmem:[#allocation10 + $0x168] ss:$16 sps:$4 sm:$0xff]  }
 0x292   : > { %3838 = vmatprep.subr.bf16.mxu1 %v5730_v59 }
 0x295   : > { %3839 = vmatpush2.bf16.msra.mxu1 %v5728_v60  ;;  %v2150_v60 = vrot.slane %v6402_v45, %v6385_v46 }
 0x296   : > { %3840 = vmatprep.subr.bf16.mxu1 %v5736_v61  ;;  %v5731_v61 = vld [vmem:[#allocation10 + $0x148] ss:$16 sps:$4 sm:$0xff]  }
 0x297   : > { %v2829_v2 = vpop.f32.mrf.mxu0 }
 0x298   : > { %v2830_v14 = vadd.f32 %v2829_v2, %v2138_v6 }
 0x299   : > { %3841 = vmatpush2.bf16.msra.mxu1 %v5734_v62  ;;  %v2831_v3 = vpop.f32.mrf.mxu0  ;;  %v2146_v62 = vrot.slane %v6402_v45, %v6388_v47  ;;  %v5743_v45 = vld [vmem:[#allocation10 + $0x108] ss:$16 sps:$4 sm:$0xff]  }
 0x29a   : > { %3842 = vmatprep.subr.bf16.mxu1 %v5742_v63  ;;  %v2832_v10 = vadd.f32 %v2831_v3, %v2142_v5 }
 0x29b   : > { %v2833_v4 = vpop.f32.mrf.mxu0 }
 0x29c   : > { %v2834_v11 = vadd.f32 %v2833_v4, %v2138_v6 }
 0x29d   : > { %3843 = vmatpush2.bf16.msra.mxu1 %v5740_v0  ;;  %v2835_v8 = vpop.f32.mrf.mxu0  ;;  %v5739_v0 = vld [vmem:[#allocation10 + $0x12c] ss:$16 sps:$4 sm:$0xff]  }
 0x29e   : > { %3898 = vmatprep.subr.bf16.mxu1 %v5748_v1  ;;  %v2836_v17 = vadd.f32 %v2835_v8, %v2142_v5  ;;  %v5737_v5 = vld [vmem:[#allocation10 + $0x128] ss:$16 sps:$4 sm:$0xff]   ;;  %v5745_v8 = vld [vmem:[#allocation10 + $0x10c] ss:$16 sps:$4 sm:$0xff]  }
 0x2d7   : > { %v2915_v53 = vpop.f32.mrf.mxu0 }
 0x2d8   : > { %v2916_v6 = vadd.f32 %v2915_v53, %v2146_v62  ;;  %v5775_v53 = vld [vmem:[#allocation10 + $0x3cc] ss:$16 sps:$4 sm:$0xff]  }
 0x2d9   : > { %v2917_v57 = vpop.f32.mrf.mxu0 }
 0x2da   : > { %v2918_v3 = vadd.f32 %v2917_v57, %v2150_v60  ;;  %v5776_v57 = vld [vmem:[#allocation10 + $0x3a8] ss:$16 sps:$4 sm:$0xff]  }
 0x2db   : > { %v2919_v59 = vpop.f32.mrf.mxu0 }
 0x2dc   : > { %v2920_v4 = vadd.f32 %v2919_v59, %v2146_v62  ;;  %v5784_v59 = vld [vmem:[#allocation10 + $0x36c] ss:$16 sps:$4 sm:$0xff]   ;;  %v5785_v62 = vld [vmem:[#allocation10 + $0x348] ss:$16 sps:$4 sm:$0xff]  }
 0x2dd   : > { %v2921_v1 = vpop.f32.mrf.mxu0 }
 0x2e0   : > { %v2872_v7 = vpop.f32.mrf.mxu1 }
 0x2e1   : > { %v2873_v20 = vadd.f32 %v2872_v7, %v2830_v14 }
 0x2e2   : > { %v2874_v9 = vpop.f32.mrf.mxu1 }
 0x2e3   : > { %v2875_v18 = vadd.f32 %v2874_v9, %v2832_v10  ;;  %v2967_v29 = vmax.f32 %v2873_v20, 0.0  ;;  %v2922_v9 = vadd.f32 %v2921_v1, %v2150_v60  ;;  %v5782_v60 = vld [vmem:[#allocation10 + $0x368] ss:$16 sps:$4 sm:$0xff]   ;;  %v5793_v1 = vld [vmem:[#allocation10 + $0x30c] ss:$16 sps:$4 sm:$0xff]  }
 0x2e4   : > { %v2876_v16 = vpop.f32.mrf.mxu1 }
 0x2e5   : > { %v2877_v19 = vadd.f32 %v2876_v16, %v2834_v11  ;;  %v2968_v27 = vmax.f32 %v2875_v18, 0.0 }
 0x2e6   : > { %v2878_v22 = vpop.f32.mrf.mxu1 }
 0x2e7   : > { %v2879_v24 = vadd.f32 %v2878_v22, %v2836_v17  ;;  %v2971_v25 = vmax.f32 %v2877_v19, 0.0 }
 0x2e9   : > { %v2972_v28 = vmax.f32 %v2879_v24, 0.0  ;;  %v6408_v33 = vpack.c.bf16 %v2971_v25, %v2967_v29  ;;  %v5746_v25 = vld [vmem:[#allocation10 + $0x2e8] ss:$16 sps:$4 sm:$0xff]  }
 0x2ea   : > { %v5749_v29 = vld [vmem:[#allocation10 + $0x2c8] ss:$16 sps:$4 sm:$0xff]  }
 0x2eb   : > { %v2976_v31 = vpack.c.bf16 %v2972_v28, %v2968_v27  ;;  %v5751_v28 = vld [vmem:[#allocation10 + $0x2cc] ss:$16 sps:$4 sm:$0xff]  }
 0x2ed   : > { %3801 = vmatprep.mubr.bf16.mxu0 %v2976_v31 }
 0x2ee   : > { %3802 = vmatmul.mubr.bf16.vlgmr.msra.gmra.mxu0 %v6408_v33 }
 0x2ef   : > { %3856 = vmatpush1.bf16.msra.mxu0 %v5653_v32  ;;  %3887 = vmatprep.mubr.bf16.mxu0 %v2976_v31  ;;  %v5754_v31 = vld [vmem:[#allocation10 + $0x2ac] ss:$16 sps:$4 sm:$0xff]   ;;  %v5752_v32 = vld [vmem:[#allocation10 + $0x2a8] ss:$16 sps:$4 sm:$0xff]  }
 0x2f0   : > { %3857 = vmatprep.subr.bf16.mxu0 %v5661_v34  ;;  %v5757_v34 = vld [vmem:[#allocation10 + $0x28c] ss:$16 sps:$4 sm:$0xff]  }
 0x2f3   : > { %3858 = vmatpush1.bf16.msra.mxu0 %v5659_v35  ;;  %v5794_v35 = vld [vmem:[#allocation11 + $0x78] sm:$0xff]  }
 0x2f4   : > { %3859 = vmatprep.subr.bf16.mxu0 %v5667_v15  ;;  %v5795_v15 = vld [vmem:[#allocation11 + $0x38] sm:$0xff]  }
 0x2f7   : > { %3860 = vmatpush1.bf16.msra.mxu0 %v5665_v36  ;;  %v5796_v36 = vld [vmem:[#allocation11 + $0x70] sm:$0xff]  }
 0x2f8   : > { %3861 = vmatprep.subr.bf16.mxu0 %v5673_v30  ;;  %v5755_v30 = vld [vmem:[#allocation10 + $0x288] ss:$16 sps:$4 sm:$0xff]  }
 0x2fb   : > { %3862 = vmatpush1.bf16.msra.mxu0 %v5671_v37  ;;  %v5760_v37 = vld [vmem:[#allocation10 + $0x26c] ss:$16 sps:$4 sm:$0xff]  }
 0x2fc   : > { %3863 = vmatprep.subr.bf16.mxu0 %v5679_v38  ;;  %v5797_v38 = vld [vmem:[#allocation11 + $0x30] sm:$0xff]  }
 0x2ff   : > { %3864 = vmatpush1.bf16.msra.mxu0 %v5677_v39  ;;  %v5758_v39 = vld [vmem:[#allocation10 + $0x268] ss:$16 sps:$4 sm:$0xff]  }
 0x300   : > { %3865 = vmatprep.subr.bf16.mxu0 %v5685_v13  ;;  %v5763_v13 = vld [vmem:[#allocation10 + $0x24c] ss:$16 sps:$4 sm:$0xff]  }
 0x303   : > { %3866 = vmatpush1.bf16.msra.mxu0 %v5683_v41  ;;  %v5799_v41 = vld [vmem:[#allocation11 + $0x28] sm:$0xff]  }
 0x304   : > { %3867 = vmatprep.subr.bf16.mxu0 %v5691_v43  ;;  %v5800_v43 = vld [vmem:[#allocation11 + $0x60] sm:$0xff]  }
 0x307   : > { %3868 = vmatpush1.bf16.msra.mxu0 %v5689_v26  ;;  %v5761_v26 = vld [vmem:[#allocation10 + $0x248] ss:$16 sps:$4 sm:$0xff]  }
 0x308   : > { %3869 = vmatprep.subr.bf16.mxu0 %v5697_v23  ;;  %v5766_v23 = vld [vmem:[#allocation10 + $0x22c] ss:$16 sps:$4 sm:$0xff]  }
 0x30b   : > { %3870 = vmatpush1.bf16.msra.mxu0 %v5695_v54  ;;  %v5801_v54 = vld [vmem:[#allocation11 + $0x20] sm:$0xff]  }
 0x30c   : > { %3871 = vmatprep.subr.bf16.mxu0 %v5703_v12  ;;  %v5802_v12 = vld [vmem:[#allocation11 + $0x58] sm:$0xff]  }
 0x30f   : > { %3872 = vmatpush2.bf16.msra.mxu0 %v5701_v48  ;;  %v5764_v48 = vld [vmem:[#allocation10 + $0x228] ss:$16 sps:$4 sm:$0xff]  }
 0x310   : > { %3873 = vmatprep.subr.bf16.mxu0 %v5709_v49  ;;  %v5769_v49 = vld [vmem:[#allocation10 + $0x20c] ss:$16 sps:$4 sm:$0xff]  }
 0x313   : > { %3874 = vmatpush2.bf16.msra.mxu0 %v5707_v50  ;;  %v5803_v50 = vld [vmem:[#allocation11 + $0x18] sm:$0xff]  }
 0x314   : > { %3875 = vmatprep.subr.bf16.mxu0 %v5715_v51  ;;  %v5767_v51 = vld [vmem:[#allocation10 + $0x208] ss:$16 sps:$4 sm:$0xff]  }
 0x317   : > { %3876 = vmatpush2.bf16.msra.mxu0 %v5713_v44  ;;  %v5772_v44 = vld [vmem:[#allocation10 + $0x3ec] ss:$16 sps:$4 sm:$0xff]  }
 0x318   : > { %3877 = vmatprep.subr.bf16.mxu0 %v5721_v52  ;;  %v5770_v52 = vld [vmem:[#allocation10 + $0x3e8] ss:$16 sps:$4 sm:$0xff]  }
 0x31b   : > { %3878 = vmatpush2.bf16.msra.mxu0 %v5719_v55  ;;  %v5773_v55 = vld [vmem:[#allocation10 + $0x3c8] ss:$16 sps:$4 sm:$0xff]  }
 0x31c   : > { %3879 = vmatprep.subr.bf16.mxu0 %v5727_v56  ;;  %v5778_v56 = vld [vmem:[#allocation10 + $0x3ac] ss:$16 sps:$4 sm:$0xff]  }
 0x31f   : > { %3880 = vmatpush2.bf16.msra.mxu0 %v5725_v40  ;;  %v5781_v40 = vld [vmem:[#allocation10 + $0x38c] ss:$16 sps:$4 sm:$0xff]  }
 0x320   : > { %v2958_v63 = vpop.f32.mrf.mxu1  ;;  %3881 = vmatprep.subr.bf16.mxu0 %v5733_v58  ;;  %v5779_v58 = vld [vmem:[#allocation10 + $0x388] ss:$16 sps:$4 sm:$0xff]  }
 0x321   : > { %v2959_v14 = vadd.f32 %v2958_v63, %v2916_v6  ;;  %v5790_v63 = vld [vmem:[#allocation10 + $0x32c] ss:$16 sps:$4 sm:$0xff]  }
 0x322   : > { %v2960_v2 = vpop.f32.mrf.mxu1  ;;  %v5807_v6 = vld [vmem:[#allocation11 + $0x8] sm:$0xff]  }
 0x323   : > { %3882 = vmatpush2.bf16.msra.mxu0 %v5731_v61  ;;  %v2961_v10 = vadd.f32 %v2960_v2, %v2918_v3  ;;  %v2969_v22 = vmax.f32 %v2959_v14, 0.0  ;;  %v5787_v61 = vld [vmem:[#allocation10 + $0x34c] ss:$16 sps:$4 sm:$0xff]   ;;  %v5791_v2 = vld [vmem:[#allocation10 + $0x308] ss:$16 sps:$4 sm:$0xff]   ;;  %v5804_v3 = vld [vmem:[#allocation11 + $0x50] sm:$0xff]  }
 0x324   : > { %v2962_v7 = vpop.f32.mrf.mxu1  ;;  %3883 = vmatprep.subr.bf16.mxu0 %v5739_v0  ;;  %v5788_v0 = vld [vmem:[#allocation10 + $0x328] ss:$16 sps:$4 sm:$0xff]   ;;  %v5813_v14 = vld [vmem:[#allocation11 + $0xb0] sm:$0xff]  }
 0x325   : > { %v2963_v11 = vadd.f32 %v2962_v7, %v2920_v4  ;;  %v2970_v19 = vmax.f32 %v2961_v10, 0.0  ;;  %v5805_v4 = vld [vmem:[#allocation11 + $0x10] sm:$0xff]   ;;  %v5808_v7 = vld [vmem:[#allocation11 + $0x40] sm:$0xff]   ;;  %v5811_v10 = vld [vmem:[#allocation11 + $0xb8] sm:$0xff]  }
 0x326   : > { %v2964_v16 = vpop.f32.mrf.mxu1 }
 0x327   : > { %v2965_v17 = vadd.f32 %v2964_v16, %v2922_v9  ;;  %3884 = vmatpush2.bf16.msra.mxu0 %v5737_v5  ;;  %v2973_v18 = vmax.f32 %v2963_v11, 0.0  ;;  %v5806_v5 = vld [vmem:[#allocation11 + $0x48] sm:$0xff]   ;;  %v5810_v9 = vld [vmem:[#allocation11 + $0xf8] sm:$0xff]   ;;  %v5812_v11 = vld [vmem:[#allocation11 + $0xf0] sm:$0xff]  }
 0x328   : > { %3885 = vmatprep.subr.bf16.mxu0 %v5745_v8  ;;  %v5809_v8 = vld [vmem:[#allocation11] sm:$0xff]   ;;  %v5814_v16 = vld [vmem:[#allocation11 + $0xe8] sm:$0xff]  }
 0x329   : > { %v2974_v20 = vmax.f32 %v2965_v17, 0.0  ;;  %v6415_v27 = vpack.c.bf16 %v2973_v18, %v2969_v22  ;;  %v5815_v17 = vld [vmem:[#allocation11 + $0xa8] sm:$0xff]   ;;  %v5817_v18 = vld [vmem:[#allocation11 + $0xa0] sm:$0xff]   ;;  %v5820_v22 = vld [vmem:[#allocation11 + $0xd0] sm:$0xff]  }
 0x32b   : > { %v2978_v24 = vpack.c.bf16 %v2974_v20, %v2970_v19  ;;  %3886 = vmatpush2.bf16.msra.mxu0 %v5743_v45  ;;  %v5816_v45 = vld [vmem:[#allocation11 + $0xe0] sm:$0xff]   ;;  %v5818_v19 = vld [vmem:[#allocation11 + $0xd8] sm:$0xff]  }
 0x32c   : > { %4963 = vmatprep.subr.bf16.mxu0 %v5794_v35  ;;  %v5819_v20 = vld [vmem:[#allocation11 + $0x98] sm:$0xff]  }
 0x32d   : > { %3844 = vmatprep.mubr.bf16.mxu1 %v2978_v24 }
 0x32e   : > { %3845 = vmatmul.mubr.bf16.vlgmr.msra.gmra.mxu1 %v6415_v27  ;;  %3888 = vmatmul.mubr.bf16.vlgmr.msra.gmra.mxu0 %v6408_v33  ;;  %v5798_v33 = vld [vmem:[#allocation11 + $0x68] sm:$0xff]  }
 0x32f   : > { %3899 = vmatpush1.bf16.msra.mxu1 %v5746_v25  ;;  %3930 = vmatprep.mubr.bf16.mxu1 %v2978_v24  ;;  %v5821_v24 = vld [vmem:[#allocation11 + $0x90] sm:$0xff]   ;;  %v5822_v25 = vld [vmem:[#allocation11 + $0xc8] sm:$0xff]  }
 0x330   : > { %3900 = vmatprep.subr.bf16.mxu1 %v5751_v28  ;;  %4964 = vmatpush3.bf16.msra.mxu0 %v5795_v15  ;;  %v5824_v28 = vld [vmem:[#allocation11 + $0xc0] sm:$0xff]  }
 0x331   : > { %4965 = vmatprep.subr.bf16.mxu0 %v5796_v36 }
 0x333   : > { %3901 = vmatpush1.bf16.msra.mxu1 %v5749_v29  ;;  %v5825_v29 = vld [vmem:[#allocation11 + $0x80] sm:$0xff]  }
 0x334   : > { %3902 = vmatprep.subr.bf16.mxu1 %v5754_v31  ;;  %4966 = vmatpush3.bf16.msra.mxu0 %v5797_v38 }
 0x335   : > { %4967 = vmatprep.subr.bf16.mxu0 %v5798_v33 }
 0x337   : > { %3903 = vmatpush1.bf16.msra.mxu1 %v5752_v32 }
 0x338   : > { %3904 = vmatprep.subr.bf16.mxu1 %v5757_v34  ;;  %4968 = vmatpush3.bf16.msra.mxu0 %v5799_v41  ;;  %v3107_v34 = vld [vmem:[%s6486_s6] sm:$0xf] }
 0x339   : > { %4969 = vmatprep.subr.bf16.mxu0 %v5800_v43  ;;  %v3116_v15 = vrot.slane %v3107_v34, %v6370_v21  ;;  %v3112_v36 = vrot.slane %v3107_v34, %v6373_v42 }
 0x33b   : > { %3905 = vmatpush1.bf16.msra.mxu1 %v5755_v30 }
 0x33c   : > { %3906 = vmatprep.subr.bf16.mxu1 %v5760_v37  ;;  %4970 = vmatpush3.bf16.msra.mxu0 %v5801_v54 }
 0x33d   : > { %4971 = vmatprep.subr.bf16.mxu0 %v5802_v12 }
 0x33f   : > { %3907 = vmatpush1.bf16.msra.mxu1 %v5758_v39 }
 0x340   : > { %3908 = vmatprep.subr.bf16.mxu1 %v5763_v13  ;;  %4972 = vmatpush3.bf16.msra.mxu0 %v5803_v50 }
 0x341   : > { %4973 = vmatprep.subr.bf16.mxu0 %v5804_v3 }
 0x343   : > { %3909 = vmatpush1.bf16.msra.mxu1 %v5761_v26 }
 0x344   : > { %3910 = vmatprep.subr.bf16.mxu1 %v5766_v23  ;;  %4974 = vmatpush3.bf16.msra.mxu0 %v5805_v4 }
 0x345   : > { %4975 = vmatprep.subr.bf16.mxu0 %v5806_v5 }
 0x347   : > { %3911 = vmatpush1.bf16.msra.mxu1 %v5764_v48 }
 0x348   : > { %3912 = vmatprep.subr.bf16.mxu1 %v5769_v49  ;;  %4976 = vmatpush3.bf16.msra.mxu0 %v5807_v6 }
 0x349   : > { %4977 = vmatprep.subr.bf16.mxu0 %v5808_v7 }
 0x34b   : > { %3913 = vmatpush1.bf16.msra.mxu1 %v5767_v51 }
 0x34c   : > { %3914 = vmatprep.subr.bf16.mxu1 %v5772_v44  ;;  %4978 = vmatpush3.bf16.msra.mxu0 %v5809_v8 }
 0x34f   : > { %3915 = vmatpush2.bf16.msra.mxu1 %v5770_v52 }
 0x350   : > { %3916 = vmatprep.subr.bf16.mxu1 %v5775_v53 }
 0x353   : > { %3917 = vmatpush2.bf16.msra.mxu1 %v5773_v55 }
 0x354   : > { %3918 = vmatprep.subr.bf16.mxu1 %v5778_v56  ;;  %v3124_v56 = vrot.slane %v3107_v34, %v6385_v46 }
 0x357   : > { %3919 = vmatpush2.bf16.msra.mxu1 %v5776_v57  ;;  %v3120_v57 = vrot.slane %v3107_v34, %v6388_v47 }
 0x358   : > { %3920 = vmatprep.subr.bf16.mxu1 %v5781_v40 }
 0x35b   : > { %3921 = vmatpush2.bf16.msra.mxu1 %v5779_v58 }
 0x35c   : > { %3922 = vmatprep.subr.bf16.mxu1 %v5784_v59 }
 0x35f   : > { %3923 = vmatpush2.bf16.msra.mxu1 %v5782_v60 }
 0x360   : > { %3924 = vmatprep.subr.bf16.mxu1 %v5787_v61 }
 0x363   : > { %3925 = vmatpush2.bf16.msra.mxu1 %v5785_v62 }
 0x364   : > { %3926 = vmatprep.subr.bf16.mxu1 %v5790_v63 }
 0x367   : > { %3927 = vmatpush2.bf16.msra.mxu1 %v5788_v0 }
 0x368   : > { %3928 = vmatprep.subr.bf16.mxu1 %v5793_v1 }
 0x36b   : > { %3929 = vmatpush2.bf16.msra.mxu1 %v5791_v2 }
 0x36c   : > { %4985 = vmatprep.subr.bf16.mxu1 %v5810_v9 }
 0x36e   : > { %3931 = vmatmul.mubr.bf16.vlgmr.msra.gmra.mxu1 %v6415_v27  ;;  %v5823_v27 = vld [vmem:[#allocation11 + $0x88] sm:$0xff]  }
 0x36f   : > { %4986 = vmatpush3.bf16.msra.mxu1 %v5811_v10 }
 0x370   : > { %4987 = vmatprep.subr.bf16.mxu1 %v5812_v11 }
 0x373   : > { %4988 = vmatpush3.bf16.msra.mxu1 %v5813_v14 }
 0x374   : > { %4989 = vmatprep.subr.bf16.mxu1 %v5814_v16 }
 0x377   : > { %4990 = vmatpush3.bf16.msra.mxu1 %v5815_v17 }
 0x378   : > { %4991 = vmatprep.subr.bf16.mxu1 %v5816_v45 }
 0x37b   : > { %4992 = vmatpush3.bf16.msra.mxu1 %v5817_v18 }
 0x37c   : > { %4993 = vmatprep.subr.bf16.mxu1 %v5818_v19 }
 0x37f   : > { %4994 = vmatpush3.bf16.msra.mxu1 %v5819_v20  ;;  %v4915_v20 = vld [vmem:[%s6488_s8] ss:$0 sm:$0xff] }
 0x380   : > { %4995 = vmatprep.subr.bf16.mxu1 %v5820_v22 }
 0x383   : > { %4996 = vmatpush3.bf16.msra.mxu1 %v5821_v24 }
 0x384   : > { %4997 = vmatprep.subr.bf16.mxu1 %v5822_v25 }
 0x387   : > { %4998 = vmatpush3.bf16.msra.mxu1 %v5823_v27 }
 0x388   : > { %4999 = vmatprep.subr.bf16.mxu1 %v5824_v28 }
 0x38b   : > { %5000 = vmatpush3.bf16.msra.mxu1 %v5825_v29 }
 0x3ae   : > { %v3803_v31 = vpop.f32.mrf.mxu0 }
 0x3af   : > { %v3804_v13 = vadd.f32 %v3803_v31, %v3112_v36 }
 0x3b0   : > { %v3805_v32 = vpop.f32.mrf.mxu0 }
 0x3b1   : > { %v3806_v33 = vadd.f32 %v3805_v32, %v3116_v15 }
 0x3b2   : > { %v3807_v35 = vpop.f32.mrf.mxu0 }
 0x3b3   : > { %v3808_v39 = vadd.f32 %v3807_v35, %v3112_v36 }
 0x3b4   : > { %v3809_v37 = vpop.f32.mrf.mxu0 }
 0x3b5   : > { %v3810_v43 = vadd.f32 %v3809_v37, %v3116_v15 }
 0x3ee   : > { %v3846_v30 = vpop.f32.mrf.mxu1  ;;  %v3889_v42 = vpop.f32.mrf.mxu0 }
 0x3ef   : > { %v3847_v54 = vadd.f32 %v3846_v30, %v3804_v13  ;;  %v3890_v62 = vadd.f32 %v3889_v42, %v3120_v57 }
 0x3f0   : > { %v3848_v38 = vpop.f32.mrf.mxu1  ;;  %v3891_v53 = vpop.f32.mrf.mxu0 }
 0x3f1   : > { %v3849_v26 = vadd.f32 %v3848_v38, %v3806_v33  ;;  %v3941_v44 = vmax.f32 %v3847_v54, 0.0  ;;  %v3892_v60 = vadd.f32 %v3891_v53, %v3124_v56 }
 0x3f2   : > { %v3850_v41 = vpop.f32.mrf.mxu1  ;;  %v3893_v55 = vpop.f32.mrf.mxu0 }
 0x3f3   : > { %v3851_v23 = vadd.f32 %v3850_v41, %v3808_v39  ;;  %v3942_v50 = vmax.f32 %v3849_v26, 0.0  ;;  %v3894_v61 = vadd.f32 %v3893_v55, %v3120_v57 }
 0x3f4   : > { %v3852_v12 = vpop.f32.mrf.mxu1  ;;  %v3895_v58 = vpop.f32.mrf.mxu0 }
 0x3f5   : > { %v3853_v48 = vadd.f32 %v3852_v12, %v3810_v43  ;;  %v3945_v49 = vmax.f32 %v3851_v23, 0.0  ;;  %v3896_v0 = vadd.f32 %v3895_v58, %v3124_v56 }
 0x3f7   : > { %v3946_v51 = vmax.f32 %v3853_v48, 0.0  ;;  %v3949_v52 = vpack.c.bf16 %v3945_v49, %v3941_v44 }
 0x3f9   : > { %v3950_v21 = vpack.c.bf16 %v3946_v51, %v3942_v50 }
 0x3fb   : > { %4248 = vmatprep.mubr.bf16.mxu0 %v3950_v21 }
 0x3fc   : > { %4249 = vmatmul.mubr.bf16.vlgmr.msra.gmra.mxu0 %v3949_v52 }
 0x42e   : > { %v3932_v40 = vpop.f32.mrf.mxu1 }
 0x42f   : > { %v3933_v3 = vadd.f32 %v3932_v40, %v3890_v62 }
 0x430   : > { %v3934_v59 = vpop.f32.mrf.mxu1 }
 0x431   : > { %v3935_v1 = vadd.f32 %v3934_v59, %v3892_v60  ;;  %v3943_v46 = vmax.f32 %v3933_v3, 0.0 }
 0x432   : > { %v3936_v63 = vpop.f32.mrf.mxu1 }
 0x433   : > { %v3937_v2 = vadd.f32 %v3936_v63, %v3894_v61  ;;  %v3944_v7 = vmax.f32 %v3935_v1, 0.0 }
 0x434   : > { %v3938_v4 = vpop.f32.mrf.mxu1 }
 0x435   : > { %v3939_v5 = vadd.f32 %v3938_v4, %v3896_v0  ;;  %v3947_v6 = vmax.f32 %v3937_v2, 0.0 }
 0x437   : > { %v3948_v8 = vmax.f32 %v3939_v5, 0.0  ;;  %v3951_v47 = vpack.c.bf16 %v3947_v6, %v3943_v46 }
 0x439   : > { %v3952_v9 = vpack.c.bf16 %v3948_v8, %v3944_v7 }
 0x43b   : > { %4289 = vmatprep.mubr.bf16.mxu1 %v3952_v9 }
 0x43c   : > { %4290 = vmatmul.mubr.bf16.vlgmr.msra.gmra.mxu1 %v3951_v47 }
 0x4bc   : > { %v4979_v10 = vpop.f32.mrf.mxu0 }
 0x4be   : > { %v4980_v11 = vpop.f32.mrf.mxu0 }
 0x4bf   : > { %v4981_v18 = vadd.f32 %v4980_v11, %v4979_v10 }
 0x4c0   : > { %v4982_v14 = vpop.f32.mrf.mxu0 }
 0x4c1   : > { %v4251_v27 = vadd.f32 %v4981_v18, %v4915_v20 }
 0x4c2   : > { %v4983_v16 = vpop.f32.mrf.mxu0 }
 0x4c3   : > { %v4984_v19 = vadd.f32 %v4983_v16, %v4982_v14 }
 0x4c5   : > { %v4254_v28 = vadd.f32 %v4984_v19, %v4915_v20 }
 0x4fc   : > { %v5001_v17 = vpop.f32.mrf.mxu1 }
 0x4fe   : > { %v5002_v45 = vpop.f32.mrf.mxu1 }
 0x4ff   : > { %v5003_v24 = vadd.f32 %v5002_v45, %v5001_v17 }
 0x500   : > { %v5004_v22 = vpop.f32.mrf.mxu1 }
 0x501   : > { %v4292_v31 = vadd.f32 %v5003_v24, %v4251_v27 }
 0x502   : > { %v5005_v25 = vpop.f32.mrf.mxu1 }
 0x503   : > { %v5006_v29 = vadd.f32 %v5005_v25, %v5004_v22 }
 0x505   : > { %v4295_v32 = vadd.f32 %v5006_v29, %v4254_v28 }
 0x507   : > { %v4961_v34 = vpack.c.bf16 %v4295_v32, %v4292_v31 }
 0x509   : > { %4962 = vst [vmem:[%s422_s2] sm:$0xff] %v4961_v34  }
 0x50a   : > { %5997 = shalt.err (!%p5994_p3)
}
 0x50b   : > { %s5998_s25 = scalar_lea.hbm %s6435_s24, 128  ;;  %s6002_s29 = scalar_lea.hbm %s6489_s9, 256 }
 0x50c   : > { %p5999_p4 = scmp.ne.s32.totalorder %s6435_s24, %s5998_s25  ;;  %p6003_p2 = scmp.lt.s32.totalorder %s6435_s24, %s6489_s9 }
 0x50d   : > { %p6004_p5 = scmp.lt.s32.totalorder %s6002_s29, %s5998_s25 }
 0x50e   : > { %p6000_p12 = pnand %p5999_p4, %p6515_p11 }
 0x50f   : > { %p6005_p8 = por %p6004_p5, %p6003_p2 }
 0x510   : > { %p6001_p6 = pneg %p6000_p12 }
 0x512   : > { %p6006_p10 = pnand %p6005_p8, %p6001_p6 }
 0x514   : > { %6009 = shalt.err (!%p6006_p10)
}
 0x515   : > { %s6076_s3 = smov 64   ;;  %s6077_s22 = smov 4  }
 0x516   : > { %5032 = dma.vmem_to_hbm [thread:$0]  (%p6515_p11), %s6437_s1, 128, %s6435_s24, %s4309_s28, %s6076_s3, %s6076_s3, %s6077_s22  }
 0x517 PF: > { %s4337_s16 = sand.u32 1, %s6048_s30   ;;  %p6516_p0 = scmp.ne.s32.totalorder %s6505_s21, 0 }
 0x518   : > { %p6517_p13 = scmp.ge.s32.totalorder %s6060_s12, 2  ;;  %s4338_s15 = scalar_lea.sflag [#allocation4], %s4337_s16 }
 0x51a   : > { %p5055_p7 = pnand %p6517_p13, %p6516_p0 }
 0x51c   : > { %p5056_p9 = pneg %p5055_p7 }
 0x51e   : > { %6043 = dma.done.wait (%p5056_p9), %s4338_s15, 128  }
 0x51f   : > { %6045 = vsyncadd (%p5056_p9), %s4338_s15, 4294967168  ;;  %p25_p1 = scmp.ge.s32.totalorder %s6233_s20, 4   ;;  %s6518_s30 = smov %s6052_s10 }
 0x520   : > { %s6519_s10 = smov %s6056_s11  ;;  %s6520_s11 = smov %s6245_s26 }
 0x521   : > { %s6521_s12 = smov %s6233_s20  ;;  %27 = sbr.rel (!%p25_p1) target bundleno = 12 (0xc), region = 121 }
 0x526   :  { %4343 = vsyncpa [#allocation3], 1 }
 0x527   :  { %4345 = vsyncpa [#allocation3 + $0x1], 1 }
 0x528   :  { %4346 = vsyncpa [#allocation6], 1 }
 0x529   :  { %4347 = vsyncpa [#allocation9], 1 }
 0x52a   :  { %4348 = vsyncpa [#allocation12], 1 }
 0x52b   :  { %4349 = vsyncpa [#allocation4], 1 }
 0x52c   :  { %4351 = vsyncpa [#allocation4 + $0x1], 1 }

// kernel: tpu_custom_call.1
= control target key start
LH: loop header
LB: loop body
LE: loop exit
PB: predicated region body
PF: predicated region fallthrough
CT: control target
= control target key end

     0   :  { %s6480_s0 = inlined_call_operand.hbm [shape: f32[32,784], index: 0, kind: input, shape index: {}]   ;;  %s6481_s1 = inlined_call_operand.hbm [shape: bf16[784,512], index: 1, kind: input, shape index: {}]   ;;  %s6482_s2 = inlined_call_operand.hbm [shape: f32[1,512], index: 2, kind: input, shape index: {}]   ;;  %s6483_s3 = inlined_call_operand.hbm [shape: bf16[512,512], index: 3, kind: input, shape index: {}]   ;;  %s6484_s4 = inlined_call_operand.vmem [shape: f32[1,512], index: 4, kind: input, shape index: {}]   ;;  %s6485_s5 = inlined_call_operand.hbm [shape: bf16[512,512], index: 5, kind: input, shape index: {}]   ;;  %s6486_s6 = inlined_call_operand.vmem [shape: f32[1,512], index: 6, kind: input, shape index: {}]   ;;  %s6487_s7 = inlined_call_operand.hbm [shape: bf16[512,128], index: 7, kind: input, shape index: {}]   ;;  %s6488_s8 = inlined_call_operand.vmem [shape: f32[1,128], index: 8, kind: input, shape index: {}]   ;;  %s6489_s9 = inlined_call_operand.hbm [shape: bf16[32,128], index: 9, kind: output, shape index: {}]  }
   0x1   :  { %6494 = sst [smem:[#allocation19_spill]] %s6481_s1 }
   0x2   :  { %6495 = sst [smem:[#allocation20_spill]] %s6482_s2 }
   0x3   :  { %6496 = sst [smem:[#allocation21_spill]] %s6483_s3 }
   0x4   :  { %14 = vsyncpa [#allocation3], 0 }
   0x5   :  { %16 = vsyncpa [#allocation3 + $0x1], 0 }
   0x6   :  { %17 = vsyncpa [#allocation6], 0 }
   0x7   :  { %18 = vsyncpa [#allocation9], 0 }
   0x8   :  { %19 = vsyncpa [#allocation12], 0 }
   0x9   :  { %20 = vsyncpa [#allocation4], 0 }
   0xa   :  { %22 = vsyncpa [#allocation4 + $0x1], 0  ;;  %s6128_s30 = smov 0   ;;  %s6130_s10 = smov 0  }
   0xb   :  { %s6132_s11 = smov 0   ;;  %s6134_s12 = smov 0  }
   0xc LB: > { %s6062_s13 = smov [#allocation5]   ;;  %s6149_s15 = sadd.s32 4294967295, %s6060_s12   ;;  %s6060_s12 = sphi %s6134_s12, %s6521_s12   ;;  %s6056_s11 = sphi %s6132_s11, %s6520_s11   ;;  %s6052_s10 = sphi %s6130_s10, %s6519_s10   ;;  %s6048_s30 = sphi %s6128_s30, %s6518_s30  }
   0xd   : > { %s265_s14 = sshll.u32 %s6062_s13, 4  ;;  %p4444_p0 = scmp.ge.s32.totalorder %s6060_s12, 1  ;;  %s266_s14 = int_to_ptr.vmem [resolvable:$true] %s265_s14 }
   0xe   : > { %p6490_p1 = scmp.eq.s32.totalorder %s6149_s15, 0  ;;  %p253_p2 = scmp.lt.s32.totalorder %s6060_s12, 3 }
   0xf   : > { %s6063_s17 = smov [#allocation8]   ;;  %s6064_s20 = smov [#allocation7]  }
  0x10   : > { %p6154_p3 = pnand %p4444_p0, %p253_p2  ;;  %s289_s18 = sshll.u32 %s6063_s17, 4  ;;  %s6167_s18 = int_to_ptr.vmem [resolvable:$true] %s289_s18 }
  0x11   : > { %s279_s21 = sshll.u32 %s6064_s20, 4  ;;  %s5837_s23 = scalar_lea.vmem %s266_s14, 25088  ;;  %s6169_s21 = int_to_ptr.vmem [resolvable:$true] %s279_s21 }
  0x12   : > { %s6497_s16 = scalar_select %p6154_p3, 1, 0 }
  0x13   : > { %p5034_p5 = pneg %p6154_p3  ;;  %p5838_p8 = scmp.ne.s32.totalorder %s266_s14, %s5837_s23 }
  0x14   : > { %p5845_p11 = scmp.lt.s32.totalorder %s266_s14, %s266_s14  ;;  %p5846_p12 = scmp.lt.s32.totalorder %s5837_s23, %s5837_s23 }
  0x15   : > { %p6163_p6 = pnand %p5034_p5, %p6490_p1 }
  0x16   : > { %p5847_p13 = por %p5846_p12, %p5845_p11 }
  0x17   : > { %p6173_p7 = pneg %p6163_p6 }
  0x19   : > { %p5840_p9 = pnand %p5838_p8, %p6173_p7 }
  0x1b   : > { %p5841_p10 = pneg %p5840_p9 }
  0x1d   : > { %p5848_p0 = pnand %p5847_p13, %p5841_p10 }
  0x1f   : > { %5851 = shalt.err (!%p5848_p0)
}
  0x20   : > { %s6065_s24 = smov 256   ;;  %s6066_s25 = smov 16  }
  0x21   : > { %s6500_s1 = sld [smem:[#allocation19_spill]]  ;;  %s5863_s28 = scalar_lea.vmem %s6167_s18, 16384 }
  0x22   : > { %p5864_p2 = scmp.ne.s32.totalorder %s6167_s18, %s5863_s28  ;;  %p5871_p9 = scmp.lt.s32.totalorder %s6167_s18, %s6167_s18 }
  0x23   : > { %p5872_p10 = scmp.lt.s32.totalorder %s5863_s28, %s5863_s28 }
  0x24   : > { %p5866_p5 = pnand %p5864_p2, %p6173_p7 }
  0x25   : > { %p5873_p11 = por %p5872_p10, %p5871_p9 }
  0x26   : > { %p5867_p8 = pneg %p5866_p5 }
  0x27   : > { %5037 = dma.hbm_to_vmem [thread:$0]  (!%p6163_p6), %s6500_s1, 25088, %s266_s14, [#allocation6], %s6065_s24, %s6065_s24, %s6066_s25  }
  0x28   : > { %p5874_p12 = pnand %p5873_p11, %p5867_p8 }
  0x2a   : > { %5877 = shalt.err (!%p5874_p12)
}
  0x2b   : > { %s6501_s3 = sld [smem:[#allocation21_spill]]  ;;  %s5889_s14 = scalar_lea.vmem %s6169_s21, 64 }
  0x2c   : > { %p5890_p13 = scmp.ne.s32.totalorder %s6169_s21, %s5889_s14  ;;  %p5897_p5 = scmp.lt.s32.totalorder %s6169_s21, %s6169_s21 }
  0x2d   : > { %p5898_p8 = scmp.lt.s32.totalorder %s5889_s14, %s5889_s14 }
  0x2e   : > { %p5892_p0 = pnand %p5890_p13, %p6173_p7 }
  0x2f   : > { %p5899_p9 = por %p5898_p8, %p5897_p5 }
  0x30   : > { %p5893_p2 = pneg %p5892_p0 }
  0x31   : > { %5043 = dma.hbm_to_vmem [thread:$0]  (!%p6163_p6), %s6501_s3, 16384, %s6167_s18, [#allocation9], %s6065_s24, %s6065_s24, %s6066_s25  }
  0x32   : > { %p5900_p10 = pnand %p5899_p9, %p5893_p2 }
  0x34   : > { %5903 = shalt.err (!%p5900_p10)
}
  0x35   : > { %s6502_s2 = sld [smem:[#allocation20_spill]]  ;;  %s6067_s18 = smov [#allocation10]  }
  0x36   : > { %s305_s23 = sshll.u32 %s6067_s18, 4  ;;  %s6068_s26 = smov [#allocation11]   ;;  %s306_s23 = int_to_ptr.vmem [resolvable:$true] %s305_s23 }
  0x37   : > { %s321_s27 = sshll.u32 %s6068_s26, 4  ;;  %s5915_s28 = scalar_lea.vmem %s306_s23, 16384  ;;  %s322_s27 = int_to_ptr.vmem [resolvable:$true] %s321_s27 }
  0x38   : > { %p5916_p11 = scmp.ne.s32.totalorder %s306_s23, %s5915_s28  ;;  %p5923_p0 = scmp.lt.s32.totalorder %s306_s23, %s306_s23 }
  0x39   : > { %p5924_p2 = scmp.lt.s32.totalorder %s5915_s28, %s5915_s28 }
  0x3a   : > { %p5918_p12 = pnand %p5916_p11, %p6173_p7 }
  0x3b   : > { %5040 = dma.hbm_to_vmem [thread:$0]  (!%p6163_p6), %s6502_s2, 64, %s6169_s21, [#allocation6]  }
  0x3c   : > { %p5919_p13 = pneg %p5918_p12  ;;  %p5925_p5 = por %p5924_p2, %p5923_p0 }
  0x3e   : > { %p5926_p8 = pnand %p5925_p5, %p5919_p13 }
  0x40   : > { %5929 = shalt.err (!%p5926_p8)
}
  0x41   : > { %5046 = dma.hbm_to_vmem [thread:$0]  (!%p6163_p6), %s6485_s5, 16384, %s306_s23, [#allocation9], %s6065_s24, %s6065_s24, %s6066_s25  }
  0x42   : > { %s5941_s13 = scalar_lea.vmem %s322_s27, 4096  ;;  %p5949_p12 = scmp.lt.s32.totalorder %s322_s27, %s322_s27 }
  0x43   : > { %p5942_p9 = scmp.ne.s32.totalorder %s322_s27, %s5941_s13  ;;  %p5950_p0 = scmp.lt.s32.totalorder %s5941_s13, %s5941_s13 }
  0x45   : > { %p5944_p10 = pnand %p5942_p9, %p6173_p7  ;;  %p5951_p13 = por %p5950_p0, %p5949_p12 }
  0x47   : > { %p5945_p11 = pneg %p5944_p10 }
  0x49   : > { %p5952_p2 = pnand %p5951_p13, %p5945_p11 }
  0x4b   : > { %5955 = shalt.err (!%p5952_p2)
}
  0x4c   : > { %s6069_s14 = smov 64   ;;  %s6070_s22 = smov 4  }
  0x4d   : > { %5049 = dma.hbm_to_vmem [thread:$0]  (!%p6163_p6), %s6487_s7, 4096, %s322_s27, [#allocation12], %s6069_s14, %s6069_s14, %s6070_s22  }
  0x4e   : > { %s4443_s17 = sadd.s32 4294967294, %s6060_s12   ;;  %s6233_s20 = sadd.s32 1, %s6060_s12  }
  0x4f   : > { %s35_s18 = sadd.s32 1, %s6056_s11  ;;  %s32_s23 = ssub.s32 %s6060_s12, %s6233_s20 }
  0x50   : > { %p42_p7 = scmp.ne.s32.totalorder %s6056_s11, %s6052_s10  ;;  %p33_p5 = scmp.eq.s32.totalorder %s32_s23, 0 }
  0x51   : > { %p43_p8 = scmp.eq.s32.totalorder %s6060_s12, 0  ;;  %p48_p9 = scmp.ne.s32.totalorder %s6052_s10, %s6048_s30 }
  0x52   : > { %p240_p10 = scmp.eq.s32.totalorder %s6149_s15, 1  ;;  %p246_p0 = scmp.eq.s32.totalorder %s4443_s17, 1 }
  0x53   : > { %s6245_s26 = scalar_select %p33_p5, %s6056_s11, %s35_s18  }
  0x54   : > { %p44_p11 = por %p43_p8, %p42_p7  ;;  %p6249_p12 = por %p6490_p1, %p48_p9 }
  0x55   : > { %p6253_p6 = por %p240_p10, %p42_p7  ;;  %p5063_p13 = scmp.lt.s32.totalorder %s6060_s12, 2 }
  0x56   : > { %s6503_s19 = scalar_select %p6249_p12, 1, 0 }
  0x57   : > { %s6504_s27 = scalar_select %p6253_p6, 1, 0 }
  0x58   : > { %s338_s28 = sand.u32 1, %s6056_s11   ;;  %p6259_p2 = por %p246_p0, %p48_p9 }
  0x59   : > { %s5007_s29 = smul.u32 112, %s338_s28  ;;  %p6263_p5 = pnand %p5063_p13, %p44_p11 }
  0x5a   : > { %s6505_s21 = scalar_select %p6259_p2, 1, 0 }
  0x5b   : > { %s5008_s14 = smul.u32 1792, %s6060_s12  ;;  %s342_s17 = scalar_lea.vmem [#allocation2], %s5007_s29 }
  0x5c   : > { %s350_s18 = sshll.u32 %s342_s17, 4  ;;  %s6275_s23 = scalar_lea.sflag [#allocation3], %s338_s28  ;;  %s6273_s18 = int_to_ptr.vmem [resolvable:$true] %s350_s18 }
  0x5d   : > { %s6271_s25 = scalar_lea.hbm %s6480_s0, %s5008_s14  ;;  %p5958_p8 = pneg %p6263_p5 }
  0x5e   : > { %s5956_s1 = scalar_lea.hbm %s6271_s25, 1792  ;;  %s5961_s14 = scalar_lea.hbm %s6480_s0, 3584 }
  0x5f   : > { %p5957_p7 = scmp.ne.s32.totalorder %s6271_s25, %s5956_s1  ;;  %p5962_p11 = scmp.lt.s32.totalorder %s6271_s25, %s6480_s0 }
  0x60   : > { %p5963_p0 = scmp.lt.s32.totalorder %s5961_s14, %s5956_s1 }
  0x61   : > { %p5959_p9 = pnand %p5958_p8, %p5957_p7 }
  0x62   : > { %p5964_p13 = por %p5963_p0, %p5962_p11 }
  0x63   : > { %p5960_p10 = pneg %p5959_p9 }
  0x65   : > { %p5965_p4 = pnand %p5964_p13, %p5960_p10 }
  0x67   : > { %5968 = shalt.err (!%p5965_p4)
}
  0x68   : > { %s5969_s28 = scalar_lea.vmem %s6273_s18, 1792  ;;  %s6071_s29 = smov [#allocation2]  }
  0x69   : > { %p5970_p1 = scmp.ne.s32.totalorder %s6273_s18, %s5969_s28  ;;  %s5974_s17 = sshll.u32 %s6071_s29, 4  ;;  %s5975_s17 = int_to_ptr.vmem [resolvable:$false] %s5974_s17 }
  0x6a   : > { %s5976_s2 = scalar_lea.vmem %s5975_s17, 3584  ;;  %p5977_p9 = scmp.lt.s32.totalorder %s6273_s18, %s5975_s17 }
  0x6b   : > { %p5972_p2 = pnand %p5970_p1, %p5958_p8  ;;  %p5978_p6 = scmp.lt.s32.totalorder %s5976_s2, %s5969_s28 }
  0x6d   : > { %p5973_p7 = pneg %p5972_p2  ;;  %p5979_p12 = por %p5978_p6, %p5977_p9 }
  0x6f   : > { %p5980_p3 = pnand %p5979_p12, %p5973_p7 }
  0x71   : > { %5983 = shalt.err (!%p5980_p3)
}
  0x72   : > { %s6072_s1 = smov 896   ;;  %s6073_s3 = smov 56  }
  0x73   : > { %5053 = dma.hbm_to_vmem [thread:$0]  (!%p6263_p5), %s6271_s25, 1792, %s6273_s18, %s6275_s23, %s6072_s1, %s6072_s1, %s6073_s3  }
  0x74   : > { %p6507_p1 = scmp.ne.s32.totalorder %s6497_s16, 0 }
  0x75   : > { %s6299_s14 = sand.u32 (!%p6507_p1), 1, %s6052_s10   ;;  %p6508_p3 = scmp.ne.s32.totalorder (!%p6507_p1), %s6503_s19, 0 }
  0x76   : > { %362 = sbr.rel (%p6507_p1) target bundleno = 1303 (0x517), region = 56  ;;  %s365_s24 = scalar_lea.sflag (!%p6507_p1), [#allocation3], %s6299_s14 }
  0x77   : > { %s5009_s22 = smul.u32 (!%p6507_p1), 112, %s6299_s14 }
  0x79   : > { %s6303_s28 = scalar_lea.vmem (!%p6507_p1), [#allocation2], %s5009_s22 }
  0x7b   : > { %6027 = dma.done.wait (%p6508_p3), %s365_s24, 1792  }
  0x7c   : > { %6029 = vsyncadd (%p6508_p3), %s365_s24, 4294965504  ;;  %p6509_p4 = scmp.eq.s32.totalorder %s6149_s15, 0 }
  0x7e   : > { %6031 = dma.done.wait (%p6509_p4), [#allocation6], 25152   ;;  %p6510_p12 = pmov %p6509_p4 }
  0x7f   : > { %p6511_p6 = pmov %p6509_p4 }
  0x80   : > { %6033 = vsyncadd (%p6510_p12), [#allocation6], 4294942144 }
  0x81   : > { %6035 = dma.done.wait (%p6511_p6), [#allocation9], 32768   ;;  %p6512_p2 = pmov %p6509_p4 }
  0x83   : > { %6037 = vsyncadd (%p6512_p2), [#allocation9], 4294934528  ;;  %p6513_p5 = pmov %p6512_p2 }
  0x84   : > { %p6514_p8 = pmov %p6512_p2 }
  0x85   : > { %6039 = dma.done.wait (%p6513_p5), [#allocation12], 4096  }
  0x86   : > { %6041 = vsyncadd (%p6514_p8), [#allocation12], 4294963200  ;;  %v5116_v0 = vld [vmem:[#allocation5 + $0xe4] ss:$16 sps:$4 sm:$0xff]   ;;  %v5120_v2 = vld [vmem:[#allocation5 + $0xe0] ss:$16 sps:$4 sm:$0xff]  }
  0x87   : > { %v5118_v1 = vld [vmem:[#allocation5 + $0x2e4] ss:$16 sps:$4 sm:$0xff]   ;;  %1649 = vmatprep.subr.bf16.mxu0 %v5116_v0  ;;  %v5121_v3 = vld [vmem:[#allocation5 + $0x2e0] ss:$16 sps:$4 sm:$0xff]   ;;  %v427_v46 = vld [vmem:[%s6303_s28 + $0x8] sm:$0xff]  ;;  %vm1645_vm0 = vcmask 130048  }
  0x88   : > { %1692 = vmatprep.subr.bf16.mxu1 %v5118_v1  ;;  %v5122_v4 = vld [vmem:[#allocation5 + $0xc4] ss:$16 sps:$4 sm:$0xff]   ;;  %1650 = vmatpush1.bf16.msra.mxu0 %v5120_v2  ;;  %v5126_v6 = vld [vmem:[#allocation5 + $0xc0] ss:$16 sps:$4 sm:$0xff]   ;;  %v429_v48 = vld [vmem:[%s6303_s28 + $0x18] sm:$0xff]  ;;  %s4460_s18 = sshll.u32 %s6299_s14, 3 }
  0x89   : > { %1693 = vmatpush1.bf16.msra.mxu1 %v5121_v3  ;;  %v5124_v5 = vld [vmem:[#allocation5 + $0x2c4] ss:$16 sps:$4 sm:$0xff]   ;;  %1651 = vmatprep.subr.bf16.mxu0 %v5122_v4  ;;  %v5127_v7 = vld [vmem:[#allocation5 + $0x2c0] ss:$16 sps:$4 sm:$0xff]   ;;  %s4957_s17 = sshll.u32 %s6149_s15, 7  ;;  %s422_s2 = scalar_lea.vmem [#allocation13], %s4460_s18 }
  0x8a   : > { %1694 = vmatprep.subr.bf16.mxu1 %v5124_v5  ;;  %v5128_v8 = vld [vmem:[#allocation5 + $0xa4] ss:$16 sps:$4 sm:$0xff]   ;;  %v5132_v10 = vld [vmem:[#allocation5 + $0xa0] ss:$16 sps:$4 sm:$0xff]   ;;  %s4322_s1 = sshll.u32 %s422_s2, 4  ;;  %s6435_s24 = scalar_lea.hbm %s6489_s9, %s4957_s17  ;;  %s6437_s1 = int_to_ptr.vmem [resolvable:$true] %s4322_s1 }
  0x8b   : > { %v5130_v9 = vld [vmem:[#allocation5 + $0x2a4] ss:$16 sps:$4 sm:$0xff]   ;;  %v5133_v11 = vld [vmem:[#allocation5 + $0x2a0] ss:$16 sps:$4 sm:$0xff]   ;;  %s5984_s16 = scalar_lea.vmem %s6437_s1, 128  ;;  %p6515_p11 = scmp.ne.s32.totalorder %s6504_s27, 0 }
  0x8c   : > { %1652 = vmatpush1.bf16.msra.mxu0 %v5126_v6  ;;  %v5134_v12 = vld [vmem:[#allocation5 + $0x84] ss:$16 sps:$4 sm:$0xff]   ;;  %v5138_v14 = vld [vmem:[#allocation5 + $0x80] ss:$16 sps:$4 sm:$0xff]   ;;  %p5985_p10 = scmp.ne.s32.totalorder %s6437_s1, %s5984_s16  ;;  %s6075_s15 = smov [#allocation13]  }
  0x8d   : > { %1695 = vmatpush1.bf16.msra.mxu1 %v5127_v7  ;;  %1653 = vmatprep.subr.bf16.mxu0 %v5128_v8  ;;  %v5136_v13 = vld [vmem:[#allocation5 + $0x284] ss:$16 sps:$4 sm:$0xff]   ;;  %v5139_v15 = vld [vmem:[#allocation5 + $0x280] ss:$16 sps:$4 sm:$0xff]   ;;  %v433_v7 = vld [vmem:[%s6303_s28 + $0x38] sm:$0xff]  ;;  %s5988_s19 = sshll.u32 %s6075_s15, 4  ;;  %s5989_s19 = int_to_ptr.vmem [resolvable:$false] %s5988_s19 }
  0x8e   : > { %1696 = vmatprep.subr.bf16.mxu1 %v5130_v9  ;;  %v5140_v16 = vld [vmem:[#allocation5 + $0x64] ss:$16 sps:$4 sm:$0xff]   ;;  %v5144_v18 = vld [vmem:[#allocation5 + $0x60] ss:$16 sps:$4 sm:$0xff]   ;;  %v435_v9 = vld [vmem:[%s6303_s28 + $0x48] sm:$0xff]  ;;  %p5986_p0 = pnand %p5985_p10, %p6515_p11  ;;  %s5990_s13 = scalar_lea.vmem %s5989_s19, 256 }
  0x8f   : > { %v5142_v17 = vld [vmem:[#allocation5 + $0x264] ss:$16 sps:$4 sm:$0xff]   ;;  %v5145_v19 = vld [vmem:[#allocation5 + $0x260] ss:$16 sps:$4 sm:$0xff]   ;;  %p5991_p7 = scmp.lt.s32.totalorder %s6437_s1, %s5989_s19  ;;  %p5992_p9 = scmp.lt.s32.totalorder %s5990_s13, %s5984_s16 }
  0x90   : > { %1654 = vmatpush1.bf16.msra.mxu0 %v5132_v10  ;;  %v5146_v20 = vld [vmem:[#allocation5 + $0x44] ss:$16 sps:$4 sm:$0xff]   ;;  %v5150_v22 = vld [vmem:[#allocation5 + $0x40] ss:$16 sps:$4 sm:$0xff]   ;;  %p5987_p13 = pneg %p5986_p0 }
  0x91   : > { %1697 = vmatpush1.bf16.msra.mxu1 %v5133_v11  ;;  %1655 = vmatprep.subr.bf16.mxu0 %v5134_v12  ;;  %v5148_v21 = vld [vmem:[#allocation5 + $0x244] ss:$16 sps:$4 sm:$0xff]   ;;  %v5151_v23 = vld [vmem:[#allocation5 + $0x240] ss:$16 sps:$4 sm:$0xff]   ;;  %p5993_p1 = por %p5992_p9, %p5991_p7 }
  0x92   : > { %1698 = vmatprep.subr.bf16.mxu1 %v5136_v13  ;;  %v5152_v24 = vld [vmem:[#allocation5 + $0x24] ss:$16 sps:$4 sm:$0xff]   ;;  %v5156_v26 = vld [vmem:[#allocation5 + $0x20] ss:$16 sps:$4 sm:$0xff]  }
  0x93   : > { %v5154_v25 = vld [vmem:[#allocation5 + $0x224] ss:$16 sps:$4 sm:$0xff]   ;;  %v5157_v27 = vld [vmem:[#allocation5 + $0x220] ss:$16 sps:$4 sm:$0xff]   ;;  %p5994_p3 = pnand %p5993_p1, %p5987_p13 }
  0x94   : > { %1656 = vmatpush1.bf16.msra.mxu0 %v5138_v14  ;;  %v5158_v28 = vld [vmem:[#allocation5 + $0x4] ss:$16 sps:$4 sm:$0xff]   ;;  %v5162_v30 = vld [vmem:[#allocation5] ss:$16 sps:$4 sm:$0xff]  }
  0x95   : > { %1699 = vmatpush1.bf16.msra.mxu1 %v5139_v15  ;;  %1657 = vmatprep.subr.bf16.mxu0 %v5140_v16  ;;  %v5160_v29 = vld [vmem:[#allocation5 + $0x204] ss:$16 sps:$4 sm:$0xff]   ;;  %v5163_v31 = vld [vmem:[#allocation5 + $0x200] ss:$16 sps:$4 sm:$0xff]  }
  0x96   : > { %1700 = vmatprep.subr.bf16.mxu1 %v5142_v17  ;;  %v5164_v32 = vld [vmem:[#allocation5 + $0x1e4] ss:$16 sps:$4 sm:$0xff]   ;;  %v5168_v34 = vld [vmem:[#allocation5 + $0x1e0] ss:$16 sps:$4 sm:$0xff]   ;;  %v5223_v17 = vld [vmem:[#allocation5 + $0xec] ss:$16 sps:$4 sm:$0xff]  }
  0x97   : > { %v5166_v33 = vld [vmem:[#allocation5 + $0x3e4] ss:$16 sps:$4 sm:$0xff]   ;;  %v5169_v35 = vld [vmem:[#allocation5 + $0x3e0] ss:$16 sps:$4 sm:$0xff]  }
  0x98   : > { %1658 = vmatpush1.bf16.msra.mxu0 %v5144_v18  ;;  %v5170_v36 = vld [vmem:[#allocation5 + $0x1c4] ss:$16 sps:$4 sm:$0xff]   ;;  %v5174_v38 = vld [vmem:[#allocation5 + $0x1c0] ss:$16 sps:$4 sm:$0xff]  }
  0x99   : > { %1701 = vmatpush1.bf16.msra.mxu1 %v5145_v19  ;;  %1659 = vmatprep.subr.bf16.mxu0 %v5146_v20  ;;  %v5172_v37 = vld [vmem:[#allocation5 + $0x3c4] ss:$16 sps:$4 sm:$0xff]   ;;  %v5175_v39 = vld [vmem:[#allocation5 + $0x3c0] ss:$16 sps:$4 sm:$0xff]   ;;  %v439_v20 = vld [vmem:[%s6303_s28 + $0x68] sm:$0xff] }
  0x9a   : > { %1702 = vmatprep.subr.bf16.mxu1 %v5148_v21  ;;  %v5176_v40 = vld [vmem:[#allocation5 + $0x1a4] ss:$16 sps:$4 sm:$0xff]   ;;  %v5180_v42 = vld [vmem:[#allocation5 + $0x1a0] ss:$16 sps:$4 sm:$0xff]   ;;  %v6074_v21 = vmov 0  }
  0x9b   : > { %v5178_v41 = vld [vmem:[#allocation5 + $0x3a4] ss:$16 sps:$4 sm:$0xff]   ;;  %v5181_v43 = vld [vmem:[#allocation5 + $0x3a0] ss:$16 sps:$4 sm:$0xff]  }
  0x9c   : > { %1660 = vmatpush1.bf16.msra.mxu0 %v5150_v22  ;;  %v5182_v44 = vld [vmem:[#allocation5 + $0x184] ss:$16 sps:$4 sm:$0xff]   ;;  %v5186_v50 = vld [vmem:[#allocation5 + $0x180] ss:$16 sps:$4 sm:$0xff]  }
  0x9d   : > { %1703 = vmatpush1.bf16.msra.mxu1 %v5151_v23  ;;  %1661 = vmatprep.subr.bf16.mxu0 %v5152_v24  ;;  %v5184_v45 = vld [vmem:[#allocation5 + $0x384] ss:$16 sps:$4 sm:$0xff]   ;;  %v5187_v51 = vld [vmem:[#allocation5 + $0x380] ss:$16 sps:$4 sm:$0xff]   ;;  %v5221_v24 = vld [vmem:[#allocation5 + $0xe8] ss:$16 sps:$4 sm:$0xff]  }
  0x9e   : > { %1704 = vmatprep.subr.bf16.mxu1 %v5154_v25  ;;  %v434_v47 = vld [vmem:[%s6303_s28 + $0x40] sm:$0xff]  ;;  %v436_v49 = vld [vmem:[%s6303_s28 + $0x50] sm:$0xff] }
  0x9f   : > { %v5188_v52 = vld [vmem:[#allocation5 + $0x164] ss:$16 sps:$4 sm:$0xff]   ;;  %v6325_v53 = vpack.c.bf16 %v434_v47, %v427_v46  ;;  %v6327_v54 = vpack.c.bf16 %v436_v49, %v429_v48  ;;  %v5192_v56 = vld [vmem:[#allocation5 + $0x160] ss:$16 sps:$4 sm:$0xff]   ;;  %v5251_v47 = vld [vmem:[#allocation5 + $0x48] ss:$16 sps:$4 sm:$0xff]  }
  0xa0   : > { %1662 = vmatpush1.bf16.msra.mxu0 %v5156_v26  ;;  %v5190_v55 = vld [vmem:[#allocation5 + $0x364] ss:$16 sps:$4 sm:$0xff]   ;;  %v5193_v57 = vld [vmem:[#allocation5 + $0x360] ss:$16 sps:$4 sm:$0xff]   ;;  %v5229_v26 = vld [vmem:[#allocation5 + $0xcc] ss:$16 sps:$4 sm:$0xff]  }
  0xa1   : > { %1705 = vmatpush1.bf16.msra.mxu1 %v5157_v27  ;;  %1663 = vmatprep.subr.bf16.mxu0 %v5158_v28  ;;  %v5194_v58 = vld [vmem:[#allocation5 + $0x144] ss:$16 sps:$4 sm:$0xff]   ;;  %v5198_v60 = vld [vmem:[#allocation5 + $0x140] ss:$16 sps:$4 sm:$0xff]   ;;  %v5227_v28 = vld [vmem:[#allocation5 + $0xc8] ss:$16 sps:$4 sm:$0xff]  }
  0xa2   : > { %1706 = vmatprep.subr.bf16.mxu1 %v5160_v29  ;;  %1681 = vmatprep.mubr.bf16.mxu0 %v6325_v53  ;;  %v5196_v59 = vld [vmem:[#allocation5 + $0x344] ss:$16 sps:$4 sm:$0xff]   ;;  %v5199_v61 = vld [vmem:[#allocation5 + $0x340] ss:$16 sps:$4 sm:$0xff]   ;;  %v5259_v49 = vld [vmem:[#allocation5 + $0x2c] ss:$16 sps:$4 sm:$0xff]  }
  0xa3   : > { %1724 = vmatprep.mubr.bf16.mxu1 %v6327_v54  ;;  %v5200_v62 = vld [vmem:[#allocation5 + $0x124] ss:$16 sps:$4 sm:$0xff]   ;;  %v5204_v0 = vld [vmem:[#allocation5 + $0x120] ss:$16 sps:$4 sm:$0xff]  }
  0xa4   : > { %1664 = vmatpush1.bf16.msra.mxu0 %v5162_v30  ;;  %v5202_v63 = vld [vmem:[#allocation5 + $0x324] ss:$16 sps:$4 sm:$0xff]   ;;  %v5205_v1 = vld [vmem:[#allocation5 + $0x320] ss:$16 sps:$4 sm:$0xff]   ;;  %v5235_v30 = vld [vmem:[#allocation5 + $0xac] ss:$16 sps:$4 sm:$0xff]  }
  0xa5   : > { %1707 = vmatpush1.bf16.msra.mxu1 %v5163_v31  ;;  %1665 = vmatprep.subr.bf16.mxu0 %v5164_v32  ;;  %v5206_v2 = vld [vmem:[#allocation5 + $0x104] ss:$16 sps:$4 sm:$0xff]   ;;  %v5210_v4 = vld [vmem:[#allocation5 + $0x100] ss:$16 sps:$4 sm:$0xff]   ;;  %v5233_v32 = vld [vmem:[#allocation5 + $0xa8] ss:$16 sps:$4 sm:$0xff]  }
  0xa6   : > { %1708 = vmatprep.subr.bf16.mxu1 %v5166_v33  ;;  %v5208_v3 = vld [vmem:[#allocation5 + $0x304] ss:$16 sps:$4 sm:$0xff]   ;;  %v5211_v5 = vld [vmem:[#allocation5 + $0x300] ss:$16 sps:$4 sm:$0xff]  }
  0xa7   : > { %v426_v6 = vld [vmem:[%s6303_s28] sm:$0xff]  ;;  %v428_v8 = vld [vmem:[%s6303_s28 + $0x10] sm:$0xff] }
  0xa8   : > { %1666 = vmatpush2.bf16.msra.mxu0 %v5168_v34  ;;  %v5214_v10 = vld [vmem:[#allocation5 + $0x4e4] ss:$16 sps:$4 sm:$0xff]   ;;  %v6335_v12 = vpack.c.bf16 %v433_v7, %v426_v6  ;;  %v6337_v13 = vpack.c.bf16 %v435_v9, %v428_v8  ;;  %v5212_v14 = vld [vmem:[#allocation5 + $0x4e0] ss:$16 sps:$4 sm:$0xff]   ;;  %v5241_v34 = vld [vmem:[#allocation5 + $0x8c] ss:$16 sps:$4 sm:$0xff]  }
  0xa9   : > { %1709 = vmatpush2.bf16.msra.mxu1 %v5169_v35  ;;  %1667 = vmatprep.subr.bf16.mxu0 %v5170_v36  ;;  %v5217_v11 = vld [vmem:[#allocation5 + $0x604] ss:$16 sps:$4 sm:$0xff]   ;;  %v5215_v15 = vld [vmem:[#allocation5 + $0x600] ss:$16 sps:$4 sm:$0xff]   ;;  %v5239_v36 = vld [vmem:[#allocation5 + $0x88] ss:$16 sps:$4 sm:$0xff]  }
  0xaa   : > { %1710 = vmatprep.subr.bf16.mxu1 %v5172_v37  ;;  %v5220_v16 = vld [vmem:[#allocation5 + $0x4c4] ss:$16 sps:$4 sm:$0xff]   ;;  %v5218_v18 = vld [vmem:[#allocation5 + $0x4c0] ss:$16 sps:$4 sm:$0xff]   ;;  %v5289_v6 = vld [vmem:[#allocation5 + $0x18c] ss:$16 sps:$4 sm:$0xff]  }
  0xab   : > { %v432_v19 = vld [vmem:[%s6303_s28 + $0x30] sm:$0xff]  ;;  %v5287_v8 = vld [vmem:[#allocation5 + $0x188] ss:$16 sps:$4 sm:$0xff]  }
  0xac   : > { %1668 = vmatpush2.bf16.msra.mxu0 %v5174_v38  ;;  %v5226_v22 = vld [vmem:[#allocation5 + $0x4a4] ss:$16 sps:$4 sm:$0xff]   ;;  %v6344_v23 = vpack.c.bf16 %v439_v20, %v432_v19  ;;  %v5224_v25 = vld [vmem:[#allocation5 + $0x4a0] ss:$16 sps:$4 sm:$0xff]   ;;  %v5247_v38 = vld [vmem:[#allocation5 + $0x6c] ss:$16 sps:$4 sm:$0xff]  }
  0xad   : > { %1711 = vmatpush2.bf16.msra.mxu1 %v5175_v39  ;;  %1669 = vmatprep.subr.bf16.mxu0 %v5176_v40  ;;  %v5232_v27 = vld [vmem:[#allocation5 + $0x484] ss:$16 sps:$4 sm:$0xff]   ;;  %v5230_v29 = vld [vmem:[#allocation5 + $0x480] ss:$16 sps:$4 sm:$0xff]   ;;  %v5245_v40 = vld [vmem:[#allocation5 + $0x68] ss:$16 sps:$4 sm:$0xff]  }
  0xae   : > { %1712 = vmatprep.subr.bf16.mxu1 %v5178_v41  ;;  %v5238_v31 = vld [vmem:[#allocation5 + $0x464] ss:$16 sps:$4 sm:$0xff]   ;;  %v5236_v33 = vld [vmem:[#allocation5 + $0x460] ss:$16 sps:$4 sm:$0xff]   ;;  %v431_v41 = vld [vmem:[%s6303_s28 + $0x28] sm:$0xff] }
  0xaf   : > { %v5244_v35 = vld [vmem:[#allocation5 + $0x444] ss:$16 sps:$4 sm:$0xff]   ;;  %v5242_v37 = vld [vmem:[#allocation5 + $0x440] ss:$16 sps:$4 sm:$0xff]  }
  0xb0   : > { %1670 = vmatpush2.bf16.msra.mxu0 %v5180_v42  ;;  %v5250_v39 = vld [vmem:[#allocation5 + $0x424] ss:$16 sps:$4 sm:$0xff]   ;;  %v5254_v48 = vld [vmem:[#allocation5 + $0x400] ss:$16 sps:$4 sm:$0xff]  }
  0xb1   : > { %1713 = vmatpush2.bf16.msra.mxu1 %v5181_v43  ;;  %1671 = vmatprep.subr.bf16.mxu0 %v5182_v44  ;;  %v438_v42 = vld [vmem:[%s6303_s28 + $0x60] sm:$0xff] }
  0xb2   : > { %1714 = vmatprep.subr.bf16.mxu1 %v5184_v45  ;;  %v5248_v43 = vld [vmem:[#allocation5 + $0x420] ss:$16 sps:$4 sm:$0xff]   ;;  %v6351_v44 = vpack.c.bf16 %v438_v42, %v431_v41  ;;  %v5253_v45 = vld [vmem:[#allocation5 + $0x4c] ss:$16 sps:$4 sm:$0xff]   ;;  %v5256_v46 = vld [vmem:[#allocation5 + $0x404] ss:$16 sps:$4 sm:$0xff]  }
  0xb3   : > { %v5292_v7 = vld [vmem:[#allocation5 + $0x544] ss:$16 sps:$4 sm:$0xff]   ;;  %v5290_v9 = vld [vmem:[#allocation5 + $0x540] ss:$16 sps:$4 sm:$0xff]   ;;  %v5331_v41 = vld [vmem:[#allocation5 + $0x4ac] ss:$16 sps:$4 sm:$0xff]  }
  0xb4   : > { %1672 = vmatpush2.bf16.msra.mxu0 %v5186_v50  ;;  %v5262_v50 = vld [vmem:[#allocation5 + $0x5e4] ss:$16 sps:$4 sm:$0xff]   ;;  %v5302_v19 = vld [vmem:[#allocation5 + $0x500] ss:$16 sps:$4 sm:$0xff]   ;;  %v5334_v42 = vld [vmem:[#allocation5 + $0x26c] ss:$16 sps:$4 sm:$0xff]  }
  0xb5   : > { %1715 = vmatpush2.bf16.msra.mxu1 %v5187_v51  ;;  %1673 = vmatprep.subr.bf16.mxu0 %v5188_v52  ;;  %v5257_v51 = vld [vmem:[#allocation5 + $0x28] ss:$16 sps:$4 sm:$0xff]   ;;  %v5260_v52 = vld [vmem:[#allocation5 + $0x5e0] ss:$16 sps:$4 sm:$0xff]  }
  0xb6   : > { %1716 = vmatprep.subr.bf16.mxu1 %v5190_v55  ;;  %v5268_v55 = vld [vmem:[#allocation5 + $0x5c4] ss:$16 sps:$4 sm:$0xff]  }
  0xb7   : > { %v430_v20 = vld [vmem:[%s6303_s28 + $0x20] sm:$0xff] }
  0xb8   : > { %1674 = vmatpush2.bf16.msra.mxu0 %v5192_v56  ;;  %v5263_v56 = vld [vmem:[#allocation5 + $0x8] ss:$16 sps:$4 sm:$0xff]  }
  0xb9   : > { %1717 = vmatpush2.bf16.msra.mxu1 %v5193_v57  ;;  %1675 = vmatprep.subr.bf16.mxu0 %v5194_v58  ;;  %v5266_v57 = vld [vmem:[#allocation5 + $0x5c0] ss:$16 sps:$4 sm:$0xff]   ;;  %v5271_v58 = vld [vmem:[#allocation5 + $0x1ec] ss:$16 sps:$4 sm:$0xff]  }
  0xba   : > { %1718 = vmatprep.subr.bf16.mxu1 %v5196_v59  ;;  %v5274_v59 = vld [vmem:[#allocation5 + $0x5a4] ss:$16 sps:$4 sm:$0xff]  }
  0xbc   : > { %1676 = vmatpush2.bf16.msra.mxu0 %v5198_v60  ;;  %v5269_v60 = vld [vmem:[#allocation5 + $0x1e8] ss:$16 sps:$4 sm:$0xff]  }
  0xbd   : > { %1719 = vmatpush2.bf16.msra.mxu1 %v5199_v61  ;;  %1677 = vmatprep.subr.bf16.mxu0 %v5200_v62  ;;  %v5272_v61 = vld [vmem:[#allocation5 + $0x5a0] ss:$16 sps:$4 sm:$0xff]   ;;  %v5277_v62 = vld [vmem:[#allocation5 + $0x1cc] ss:$16 sps:$4 sm:$0xff]  }
  0xbe   : > { %1720 = vmatprep.subr.bf16.mxu1 %v5202_v63  ;;  %v5280_v63 = vld [vmem:[#allocation5 + $0x584] ss:$16 sps:$4 sm:$0xff]  }
  0xc0   : > { %1678 = vmatpush2.bf16.msra.mxu0 %v5204_v0  ;;  %v5275_v0 = vld [vmem:[#allocation5 + $0x1c8] ss:$16 sps:$4 sm:$0xff]  }
  0xc1   : > { %1721 = vmatpush2.bf16.msra.mxu1 %v5205_v1  ;;  %1679 = vmatprep.subr.bf16.mxu0 %v5206_v2  ;;  %v5278_v1 = vld [vmem:[#allocation5 + $0x580] ss:$16 sps:$4 sm:$0xff]   ;;  %v5283_v2 = vld [vmem:[#allocation5 + $0x1ac] ss:$16 sps:$4 sm:$0xff]  }
  0xc2   : > { %1722 = vmatprep.subr.bf16.mxu1 %v5208_v3  ;;  %v5286_v3 = vld [vmem:[#allocation5 + $0x564] ss:$16 sps:$4 sm:$0xff]  }
  0xc4   : > { %1680 = vmatpush2.bf16.msra.mxu0 %v5210_v4  ;;  %v5281_v4 = vld [vmem:[#allocation5 + $0x1a8] ss:$16 sps:$4 sm:$0xff]  }
  0xc5   : > { %1723 = vmatpush2.bf16.msra.mxu1 %v5211_v5  ;;  %1735 = vmatprep.subr.bf16.mxu0 %v5214_v10  ;;  %v5284_v5 = vld [vmem:[#allocation5 + $0x560] ss:$16 sps:$4 sm:$0xff]   ;;  %v5295_v10 = vld [vmem:[#allocation5 + $0x16c] ss:$16 sps:$4 sm:$0xff]  }
  0xc6   : > { %1792 = vmatprep.subr.bf16.mxu1 %v5217_v11  ;;  %v5298_v11 = vld [vmem:[#allocation5 + $0x524] ss:$16 sps:$4 sm:$0xff]  }
  0xc7   : > { %1682 = vmatmul.mubr.bf16.vlgmr.msra.gmra.mxu0 %v6335_v12 }
  0xc8   : > { %1725 = vmatmul.mubr.bf16.vlgmr.msra.gmra.mxu1 %v6337_v13  ;;  %1736 = vmatpush1.bf16.msra.mxu0 %v5212_v14  ;;  %v5293_v14 = vld [vmem:[#allocation5 + $0x168] ss:$16 sps:$4 sm:$0xff]  }
  0xc9   : > { %1793 = vmatpush1.bf16.msra.mxu1 %v5215_v15  ;;  %1737 = vmatprep.subr.bf16.mxu0 %v5220_v16  ;;  %v5296_v15 = vld [vmem:[#allocation5 + $0x520] ss:$16 sps:$4 sm:$0xff]   ;;  %v5301_v16 = vld [vmem:[#allocation5 + $0x14c] ss:$16 sps:$4 sm:$0xff]  }
  0xca   : > { %1810 = vmatprep.mubr.bf16.mxu1 %v6074_v21  ;;  %1821 = vmatprep.subr.bf16.mxu1 %v5223_v17  ;;  %v5304_v17 = vld [vmem:[#allocation5 + $0x504] ss:$16 sps:$4 sm:$0xff]  }
  0xcb   : > { %1767 = vmatprep.mubr.bf16.mxu0 %v6351_v44 }
  0xcc   : > { %1738 = vmatpush1.bf16.msra.mxu0 %v5218_v18  ;;  %v5299_v18 = vld [vmem:[#allocation5 + $0x148] ss:$16 sps:$4 sm:$0xff]  }
  0xcd   : > { %1739 = vmatprep.subr.bf16.mxu0 %v5226_v22  ;;  %v437_v22 = vld [vmem:[%s6303_s28 + $0x58] sm:$0xff]  ;;  %s4309_s28 = scalar_lea.sflag [#allocation4], %s6299_s14 }
  0xd0   : > { %4657 = vmatmul.mubr.msk.bf16.vlgmr.msra.gmra.mxu1 %vm1645_vm0, %v6344_v23  ;;  %1740 = vmatpush1.bf16.msra.mxu0 %v5224_v25  ;;  %v5310_v25 = vld [vmem:[#allocation5 + $0x2ec] ss:$16 sps:$4 sm:$0xff]  }
  0xd1   : > { %1822 = vmatpush1.bf16.msra.mxu1 %v5221_v24  ;;  %1741 = vmatprep.subr.bf16.mxu0 %v5232_v27  ;;  %v5307_v24 = vld [vmem:[#allocation5 + $0x12c] ss:$16 sps:$4 sm:$0xff]   ;;  %v5305_v27 = vld [vmem:[#allocation5 + $0x128] ss:$16 sps:$4 sm:$0xff]  }
  0xd2   : > { %1823 = vmatprep.subr.bf16.mxu1 %v5229_v26  ;;  %1853 = vmatprep.mubr.bf16.mxu1 %v6325_v53  ;;  %v5265_v53 = vld [vmem:[#allocation5 + $0xc] ss:$16 sps:$4 sm:$0xff]   ;;  %v6356_v26 = vpack.c.bf16 %v437_v22, %v430_v20  ;;  %v5389_v20 = vld [vmem:[#allocation5 + $0x568] ss:$16 sps:$4 sm:$0xff]  }
  0xd3   : > { %v5392_v22 = vld [vmem:[#allocation5 + $0x328] ss:$16 sps:$4 sm:$0xff]  }
  0xd4   : > { %1742 = vmatpush1.bf16.msra.mxu0 %v5230_v29  ;;  %v5313_v29 = vld [vmem:[#allocation5 + $0x10c] ss:$16 sps:$4 sm:$0xff]  }
  0xd5   : > { %1824 = vmatpush1.bf16.msra.mxu1 %v5227_v28  ;;  %1743 = vmatprep.subr.bf16.mxu0 %v5238_v31  ;;  %v5308_v28 = vld [vmem:[#allocation5 + $0x2e8] ss:$16 sps:$4 sm:$0xff]  }
  0xd6   : > { %1825 = vmatprep.subr.bf16.mxu1 %v5235_v30  ;;  %v5316_v30 = vld [vmem:[#allocation5 + $0x2cc] ss:$16 sps:$4 sm:$0xff]   ;;  %v5311_v31 = vld [vmem:[#allocation5 + $0x108] ss:$16 sps:$4 sm:$0xff]  }
  0xd8   : > { %1744 = vmatpush1.bf16.msra.mxu0 %v5236_v33  ;;  %v5319_v33 = vld [vmem:[#allocation5 + $0x4ec] ss:$16 sps:$4 sm:$0xff]  }
  0xd9   : > { %1826 = vmatpush1.bf16.msra.mxu1 %v5233_v32  ;;  %1745 = vmatprep.subr.bf16.mxu0 %v5244_v35  ;;  %v5314_v32 = vld [vmem:[#allocation5 + $0x2c8] ss:$16 sps:$4 sm:$0xff]  }
  0xda   : > { %1827 = vmatprep.subr.bf16.mxu1 %v5241_v34  ;;  %v5322_v34 = vld [vmem:[#allocation5 + $0x2ac] ss:$16 sps:$4 sm:$0xff]   ;;  %v5317_v35 = vld [vmem:[#allocation5 + $0x4e8] ss:$16 sps:$4 sm:$0xff]  }
  0xdc   : > { %1746 = vmatpush1.bf16.msra.mxu0 %v5242_v37  ;;  %v5325_v37 = vld [vmem:[#allocation5 + $0x4cc] ss:$16 sps:$4 sm:$0xff]  }
  0xdd   : > { %1828 = vmatpush1.bf16.msra.mxu1 %v5239_v36  ;;  %1747 = vmatprep.subr.bf16.mxu0 %v5250_v39  ;;  %v5320_v36 = vld [vmem:[#allocation5 + $0x2a8] ss:$16 sps:$4 sm:$0xff]  }
  0xde   : > { %1829 = vmatprep.subr.bf16.mxu1 %v5247_v38  ;;  %v5328_v38 = vld [vmem:[#allocation5 + $0x28c] ss:$16 sps:$4 sm:$0xff]   ;;  %v5323_v39 = vld [vmem:[#allocation5 + $0x4c8] ss:$16 sps:$4 sm:$0xff]  }
  0xe0   : > { %1748 = vmatpush1.bf16.msra.mxu0 %v5248_v43  ;;  %v5329_v43 = vld [vmem:[#allocation5 + $0x4a8] ss:$16 sps:$4 sm:$0xff]  }
  0xe1   : > { %1830 = vmatpush1.bf16.msra.mxu1 %v5245_v40  ;;  %1749 = vmatprep.subr.bf16.mxu0 %v5256_v46  ;;  %v5326_v40 = vld [vmem:[#allocation5 + $0x288] ss:$16 sps:$4 sm:$0xff]   ;;  %v5340_v46 = vld [vmem:[#allocation5 + $0x24c] ss:$16 sps:$4 sm:$0xff]  }
  0xe2   : > { %1831 = vmatprep.subr.bf16.mxu1 %v5253_v45  ;;  %v5332_v45 = vld [vmem:[#allocation5 + $0x268] ss:$16 sps:$4 sm:$0xff]  }
  0xe4   : > { %1750 = vmatpush1.bf16.msra.mxu0 %v5254_v48  ;;  %v5343_v48 = vld [vmem:[#allocation5 + $0x46c] ss:$16 sps:$4 sm:$0xff]  }
  0xe5   : > { %1832 = vmatpush1.bf16.msra.mxu1 %v5251_v47  ;;  %1751 = vmatprep.subr.bf16.mxu0 %v5262_v50  ;;  %v5335_v47 = vld [vmem:[#allocation5 + $0x488] ss:$16 sps:$4 sm:$0xff]  }
  0xe6   : > { %1833 = vmatprep.subr.bf16.mxu1 %v5259_v49  ;;  %v5346_v49 = vld [vmem:[#allocation5 + $0x22c] ss:$16 sps:$4 sm:$0xff]   ;;  %v5341_v50 = vld [vmem:[#allocation5 + $0x468] ss:$16 sps:$4 sm:$0xff]  }
  0xe8   : > { %1752 = vmatpush2.bf16.msra.mxu0 %v5260_v52  ;;  %v5352_v52 = vld [vmem:[#allocation5 + $0x20c] ss:$16 sps:$4 sm:$0xff]  }
  0xe9   : > { %1834 = vmatpush1.bf16.msra.mxu1 %v5257_v51  ;;  %1753 = vmatprep.subr.bf16.mxu0 %v5268_v55  ;;  %v5344_v51 = vld [vmem:[#allocation5 + $0x228] ss:$16 sps:$4 sm:$0xff]  }
  0xea   : > { %1835 = vmatprep.subr.bf16.mxu1 %v5265_v53  ;;  %v5347_v53 = vld [vmem:[#allocation5 + $0x448] ss:$16 sps:$4 sm:$0xff]  }
  0xeb   : > { %v5350_v55 = vld [vmem:[#allocation5 + $0x208] ss:$16 sps:$4 sm:$0xff]  }
  0xec   : > { %1754 = vmatpush2.bf16.msra.mxu0 %v5266_v57  ;;  %v5358_v57 = vld [vmem:[#allocation5 + $0x3ec] ss:$16 sps:$4 sm:$0xff]  }
  0xed   : > { %1836 = vmatpush1.bf16.msra.mxu1 %v5263_v56  ;;  %1755 = vmatprep.subr.bf16.mxu0 %v5274_v59  ;;  %v5355_v56 = vld [vmem:[#allocation5 + $0x42c] ss:$16 sps:$4 sm:$0xff]   ;;  %v5356_v59 = vld [vmem:[#allocation5 + $0x3e8] ss:$16 sps:$4 sm:$0xff]  }
  0xee   : > { %1837 = vmatprep.subr.bf16.mxu1 %v5271_v58  ;;  %v5353_v58 = vld [vmem:[#allocation5 + $0x428] ss:$16 sps:$4 sm:$0xff]  }
  0xf0   : > { %1756 = vmatpush2.bf16.msra.mxu0 %v5272_v61  ;;  %v5364_v61 = vld [vmem:[#allocation5 + $0x3cc] ss:$16 sps:$4 sm:$0xff]  }
  0xf1   : > { %1838 = vmatpush2.bf16.msra.mxu1 %v5269_v60  ;;  %1757 = vmatprep.subr.bf16.mxu0 %v5280_v63  ;;  %v5361_v60 = vld [vmem:[#allocation5 + $0x40c] ss:$16 sps:$4 sm:$0xff]   ;;  %v5362_v63 = vld [vmem:[#allocation5 + $0x3c8] ss:$16 sps:$4 sm:$0xff]  }
  0xf2   : > { %1839 = vmatprep.subr.bf16.mxu1 %v5277_v62  ;;  %v5359_v62 = vld [vmem:[#allocation5 + $0x408] ss:$16 sps:$4 sm:$0xff]  }
  0xf4   : > { %1758 = vmatpush2.bf16.msra.mxu0 %v5278_v1  ;;  %v5370_v1 = vld [vmem:[#allocation5 + $0x3ac] ss:$16 sps:$4 sm:$0xff]  }
  0xf5   : > { %1840 = vmatpush2.bf16.msra.mxu1 %v5275_v0  ;;  %1759 = vmatprep.subr.bf16.mxu0 %v5286_v3  ;;  %v5367_v0 = vld [vmem:[#allocation5 + $0x5ec] ss:$16 sps:$4 sm:$0xff]   ;;  %v5368_v3 = vld [vmem:[#allocation5 + $0x3a8] ss:$16 sps:$4 sm:$0xff]  }
  0xf6   : > { %1841 = vmatprep.subr.bf16.mxu1 %v5283_v2  ;;  %v5365_v2 = vld [vmem:[#allocation5 + $0x5e8] ss:$16 sps:$4 sm:$0xff]  }
  0xf8   : > { %1760 = vmatpush2.bf16.msra.mxu0 %v5284_v5  ;;  %v5376_v5 = vld [vmem:[#allocation5 + $0x38c] ss:$16 sps:$4 sm:$0xff]  }
  0xf9   : > { %1842 = vmatpush2.bf16.msra.mxu1 %v5281_v4  ;;  %1761 = vmatprep.subr.bf16.mxu0 %v5292_v7  ;;  %v5373_v4 = vld [vmem:[#allocation5 + $0x5cc] ss:$16 sps:$4 sm:$0xff]   ;;  %v5374_v7 = vld [vmem:[#allocation5 + $0x388] ss:$16 sps:$4 sm:$0xff]  }
  0xfa   : > { %1843 = vmatprep.subr.bf16.mxu1 %v5289_v6  ;;  %v5371_v6 = vld [vmem:[#allocation5 + $0x5c8] ss:$16 sps:$4 sm:$0xff]  }
  0xfc   : > { %1762 = vmatpush2.bf16.msra.mxu0 %v5290_v9  ;;  %v5382_v9 = vld [vmem:[#allocation5 + $0x36c] ss:$16 sps:$4 sm:$0xff]  }
  0xfd   : > { %1844 = vmatpush2.bf16.msra.mxu1 %v5287_v8  ;;  %1763 = vmatprep.subr.bf16.mxu0 %v5298_v11  ;;  %v5379_v8 = vld [vmem:[#allocation5 + $0x5ac] ss:$16 sps:$4 sm:$0xff]   ;;  %v5380_v11 = vld [vmem:[#allocation5 + $0x368] ss:$16 sps:$4 sm:$0xff]  }
  0xfe   : > { %1845 = vmatprep.subr.bf16.mxu1 %v5295_v10  ;;  %v5377_v10 = vld [vmem:[#allocation5 + $0x5a8] ss:$16 sps:$4 sm:$0xff]  }
 0x100   : > { %1764 = vmatpush2.bf16.msra.mxu0 %v5296_v15  ;;  %v5388_v15 = vld [vmem:[#allocation5 + $0x34c] ss:$16 sps:$4 sm:$0xff]  }
 0x101   : > { %1846 = vmatpush2.bf16.msra.mxu1 %v5293_v14  ;;  %1765 = vmatprep.subr.bf16.mxu0 %v5304_v17  ;;  %v5385_v14 = vld [vmem:[#allocation5 + $0x58c] ss:$16 sps:$4 sm:$0xff]   ;;  %v5386_v17 = vld [vmem:[#allocation5 + $0x348] ss:$16 sps:$4 sm:$0xff]  }
 0x102   : > { %1847 = vmatprep.subr.bf16.mxu1 %v5301_v16  ;;  %v5383_v16 = vld [vmem:[#allocation5 + $0x588] ss:$16 sps:$4 sm:$0xff]  }
 0x104   : > { %1766 = vmatpush2.bf16.msra.mxu0 %v5302_v19  ;;  %v5394_v19 = vld [vmem:[#allocation5 + $0x32c] ss:$16 sps:$4 sm:$0xff]  }
 0x105   : > { %1848 = vmatpush2.bf16.msra.mxu1 %v5299_v18  ;;  %1864 = vmatprep.subr.bf16.mxu0 %v5310_v25  ;;  %v5391_v18 = vld [vmem:[#allocation5 + $0x56c] ss:$16 sps:$4 sm:$0xff]  }
 0x106   : > { %1849 = vmatprep.subr.bf16.mxu1 %v5307_v24  ;;  %v5397_v24 = vld [vmem:[#allocation5 + $0x54c] ss:$16 sps:$4 sm:$0xff]  }
 0x107   : > { %1768 = vmatmul.mubr.bf16.vlgmr.msra.gmra.mxu0 %v6356_v26  ;;  %v5400_v25 = vld [vmem:[#allocation5 + $0x30c] ss:$16 sps:$4 sm:$0xff]  }
 0x108   : > { %1865 = vmatpush1.bf16.msra.mxu0 %v5308_v28  ;;  %1896 = vmatprep.mubr.bf16.mxu0 %v6327_v54  ;;  %v5337_v54 = vld [vmem:[#allocation5 + $0x48c] ss:$16 sps:$4 sm:$0xff]   ;;  %v5398_v28 = vld [vmem:[#allocation5 + $0x308] ss:$16 sps:$4 sm:$0xff]  }
 0x109   : > { %1850 = vmatpush2.bf16.msra.mxu1 %v5305_v27  ;;  %1866 = vmatprep.subr.bf16.mxu0 %v5316_v30  ;;  %v5395_v27 = vld [vmem:[#allocation5 + $0x548] ss:$16 sps:$4 sm:$0xff]   ;;  %v5406_v30 = vld [vmem:[#allocation5 + $0x60c] ss:$16 sps:$4 sm:$0xff]  }
 0x10a   : > { %1851 = vmatprep.subr.bf16.mxu1 %v5313_v29  ;;  %v5403_v29 = vld [vmem:[#allocation5 + $0x52c] ss:$16 sps:$4 sm:$0xff]  }
 0x10c   : > { %1867 = vmatpush1.bf16.msra.mxu0 %v5314_v32  ;;  %v5404_v32 = vld [vmem:[#allocation5 + $0x608] ss:$16 sps:$4 sm:$0xff]  }
 0x10d   : > { %1852 = vmatpush2.bf16.msra.mxu1 %v5311_v31  ;;  %1868 = vmatprep.subr.bf16.mxu0 %v5322_v34  ;;  %v5401_v31 = vld [vmem:[#allocation5 + $0x528] ss:$16 sps:$4 sm:$0xff]  }
 0x10e   : > { %1907 = vmatprep.subr.bf16.mxu1 %v5319_v33  ;;  %v5409_v33 = vld [vmem:[#allocation5 + $0x50c] ss:$16 sps:$4 sm:$0xff]   ;;  %v5412_v34 = vld [vmem:[#allocation8 + $0xe4] ss:$16 sps:$4 sm:$0xff]  }
 0x110   : > { %1854 = vmatmul.mubr.bf16.vlgmr.msra.gmra.mxu1 %v6335_v12  ;;  %1869 = vmatpush1.bf16.msra.mxu0 %v5320_v36  ;;  %v5338_v12 = vld [vmem:[#allocation5 + $0x248] ss:$16 sps:$4 sm:$0xff]   ;;  %v5410_v36 = vld [vmem:[#allocation8 + $0xe0] ss:$16 sps:$4 sm:$0xff]  }
 0x111   : > { %1908 = vmatpush1.bf16.msra.mxu1 %v5317_v35  ;;  %1870 = vmatprep.subr.bf16.mxu0 %v5328_v38  ;;  %v5407_v35 = vld [vmem:[#allocation5 + $0x508] ss:$16 sps:$4 sm:$0xff]   ;;  %v5413_v38 = vld [vmem:[#allocation8 + $0xc0] ss:$16 sps:$4 sm:$0xff]  }
 0x112   : > { %1909 = vmatprep.subr.bf16.mxu1 %v5325_v37  ;;  %1939 = vmatprep.mubr.bf16.mxu1 %v6351_v44  ;;  %v5349_v44 = vld [vmem:[#allocation5 + $0x44c] ss:$16 sps:$4 sm:$0xff]   ;;  %v5415_v37 = vld [vmem:[#allocation8 + $0xc4] ss:$16 sps:$4 sm:$0xff]  }
 0x114   : > { %1871 = vmatpush1.bf16.msra.mxu0 %v5326_v40  ;;  %v5416_v40 = vld [vmem:[#allocation8 + $0xa0] ss:$16 sps:$4 sm:$0xff]  }
 0x115   : > { %1910 = vmatpush1.bf16.msra.mxu1 %v5323_v39  ;;  %1872 = vmatprep.subr.bf16.mxu0 %v5334_v42  ;;  %v5418_v39 = vld [vmem:[#allocation8 + $0xa4] ss:$16 sps:$4 sm:$0xff]   ;;  %v5422_v42 = vld [vmem:[#allocation8 + $0x60] ss:$16 sps:$4 sm:$0xff]  }
 0x116   : > { %1911 = vmatprep.subr.bf16.mxu1 %v5331_v41  ;;  %v5419_v41 = vld [vmem:[#allocation8 + $0x80] ss:$16 sps:$4 sm:$0xff]  }
 0x118   : > { %1873 = vmatpush1.bf16.msra.mxu0 %v5332_v45  ;;  %v5466_v45 = vld [vmem:[#allocation8 + $0x2e4] ss:$16 sps:$4 sm:$0xff]  }
 0x119   : > { %1912 = vmatpush1.bf16.msra.mxu1 %v5329_v43  ;;  %1874 = vmatprep.subr.bf16.mxu0 %v5340_v46  ;;  %v5464_v43 = vld [vmem:[#allocation8 + $0x2e0] ss:$16 sps:$4 sm:$0xff]   ;;  %v5472_v46 = vld [vmem:[#allocation8 + $0x2c4] ss:$16 sps:$4 sm:$0xff]  }
 0x11a   : > { %1913 = vmatprep.subr.bf16.mxu1 %v5337_v54  ;;  %v5470_v54 = vld [vmem:[#allocation8 + $0x2c0] ss:$16 sps:$4 sm:$0xff]  }
 0x11c   : > { %1875 = vmatpush1.bf16.msra.mxu0 %v5338_v12  ;;  %v5428_v12 = vld [vmem:[#allocation8 + $0x20] ss:$16 sps:$4 sm:$0xff]  }
 0x11d   : > { %1914 = vmatpush1.bf16.msra.mxu1 %v5335_v47  ;;  %1876 = vmatprep.subr.bf16.mxu0 %v5346_v49  ;;  %v5430_v47 = vld [vmem:[#allocation8 + $0x24] ss:$16 sps:$4 sm:$0xff]  }
 0x11e   : > { %1915 = vmatprep.subr.bf16.mxu1 %v5343_v48  ;;  %v5476_v48 = vld [vmem:[#allocation8 + $0x2a0] ss:$16 sps:$4 sm:$0xff]   ;;  %v5478_v49 = vld [vmem:[#allocation8 + $0x2a4] ss:$16 sps:$4 sm:$0xff]  }
 0x120   : > { %1877 = vmatpush1.bf16.msra.mxu0 %v5344_v51  ;;  %v5431_v51 = vld [vmem:[#allocation8] ss:$16 sps:$4 sm:$0xff]  }
 0x121   : > { %1916 = vmatpush1.bf16.msra.mxu1 %v5341_v50  ;;  %1878 = vmatprep.subr.bf16.mxu0 %v5352_v52  ;;  %v5433_v50 = vld [vmem:[#allocation8 + $0x4] ss:$16 sps:$4 sm:$0xff]  }
 0x122   : > { %1917 = vmatprep.subr.bf16.mxu1 %v5349_v44  ;;  %v5482_v44 = vld [vmem:[#allocation8 + $0x280] ss:$16 sps:$4 sm:$0xff]   ;;  %v5484_v52 = vld [vmem:[#allocation8 + $0x284] ss:$16 sps:$4 sm:$0xff]  }
 0x124   : > { %1879 = vmatpush1.bf16.msra.mxu0 %v5350_v55  ;;  %v5434_v55 = vld [vmem:[#allocation8 + $0x1e0] ss:$16 sps:$4 sm:$0xff]  }
 0x125   : > { %1918 = vmatpush1.bf16.msra.mxu1 %v5347_v53  ;;  %1880 = vmatprep.subr.bf16.mxu0 %v5358_v57  ;;  %v5436_v53 = vld [vmem:[#allocation8 + $0x1e4] ss:$16 sps:$4 sm:$0xff]  }
 0x126   : > { %1919 = vmatprep.subr.bf16.mxu1 %v5355_v56  ;;  %v5488_v56 = vld [vmem:[#allocation8 + $0x260] ss:$16 sps:$4 sm:$0xff]   ;;  %v5490_v57 = vld [vmem:[#allocation8 + $0x264] ss:$16 sps:$4 sm:$0xff]  }
 0x128   : > { %1881 = vmatpush2.bf16.msra.mxu0 %v5356_v59  ;;  %v5437_v59 = vld [vmem:[#allocation8 + $0x1c0] ss:$16 sps:$4 sm:$0xff]  }
 0x129   : > { %1920 = vmatpush1.bf16.msra.mxu1 %v5353_v58  ;;  %1882 = vmatprep.subr.bf16.mxu0 %v5364_v61  ;;  %v5439_v58 = vld [vmem:[#allocation8 + $0x1c4] ss:$16 sps:$4 sm:$0xff]  }
 0x12a   : > { %1921 = vmatprep.subr.bf16.mxu1 %v5361_v60  ;;  %v5494_v60 = vld [vmem:[#allocation8 + $0x240] ss:$16 sps:$4 sm:$0xff]   ;;  %v5496_v61 = vld [vmem:[#allocation8 + $0x244] ss:$16 sps:$4 sm:$0xff]  }
 0x12c   : > { %1883 = vmatpush2.bf16.msra.mxu0 %v5362_v63  ;;  %v5440_v63 = vld [vmem:[#allocation8 + $0x1a0] ss:$16 sps:$4 sm:$0xff]  }
 0x12d   : > { %1922 = vmatpush1.bf16.msra.mxu1 %v5359_v62  ;;  %1884 = vmatprep.subr.bf16.mxu0 %v5370_v1  ;;  %v5442_v62 = vld [vmem:[#allocation8 + $0x1a4] ss:$16 sps:$4 sm:$0xff]  }
 0x12e   : > { %1923 = vmatprep.subr.bf16.mxu1 %v5367_v0  ;;  %v5500_v0 = vld [vmem:[#allocation8 + $0x220] ss:$16 sps:$4 sm:$0xff]   ;;  %v5502_v1 = vld [vmem:[#allocation8 + $0x224] ss:$16 sps:$4 sm:$0xff]  }
 0x130   : > { %1885 = vmatpush2.bf16.msra.mxu0 %v5368_v3  ;;  %v5443_v3 = vld [vmem:[#allocation8 + $0x180] ss:$16 sps:$4 sm:$0xff]  }
 0x131   : > { %1924 = vmatpush2.bf16.msra.mxu1 %v5365_v2  ;;  %1886 = vmatprep.subr.bf16.mxu0 %v5376_v5  ;;  %v5445_v2 = vld [vmem:[#allocation8 + $0x184] ss:$16 sps:$4 sm:$0xff]  }
 0x132   : > { %1925 = vmatprep.subr.bf16.mxu1 %v5373_v4  ;;  %v5506_v4 = vld [vmem:[#allocation8 + $0x200] ss:$16 sps:$4 sm:$0xff]   ;;  %v5508_v5 = vld [vmem:[#allocation8 + $0x204] ss:$16 sps:$4 sm:$0xff]  }
 0x134   : > { %1887 = vmatpush2.bf16.msra.mxu0 %v5374_v7  ;;  %v5446_v7 = vld [vmem:[#allocation8 + $0x160] ss:$16 sps:$4 sm:$0xff]  }
 0x135   : > { %1926 = vmatpush2.bf16.msra.mxu1 %v5371_v6  ;;  %1888 = vmatprep.subr.bf16.mxu0 %v5382_v9  ;;  %v5448_v6 = vld [vmem:[#allocation8 + $0x164] ss:$16 sps:$4 sm:$0xff]  }
 0x136   : > { %1927 = vmatprep.subr.bf16.mxu1 %v5379_v8  ;;  %v5512_v8 = vld [vmem:[#allocation8 + $0x3e0] ss:$16 sps:$4 sm:$0xff]   ;;  %v5514_v9 = vld [vmem:[#allocation8 + $0x3e4] ss:$16 sps:$4 sm:$0xff]  }
 0x138   : > { %1889 = vmatpush2.bf16.msra.mxu0 %v5380_v11  ;;  %v5449_v11 = vld [vmem:[#allocation8 + $0x140] ss:$16 sps:$4 sm:$0xff]  }
 0x139   : > { %1928 = vmatpush2.bf16.msra.mxu1 %v5377_v10  ;;  %1890 = vmatprep.subr.bf16.mxu0 %v5388_v15  ;;  %v5451_v10 = vld [vmem:[#allocation8 + $0x144] ss:$16 sps:$4 sm:$0xff]  }
 0x13a   : > { %1929 = vmatprep.subr.bf16.mxu1 %v5385_v14  ;;  %v5518_v14 = vld [vmem:[#allocation8 + $0x3c0] ss:$16 sps:$4 sm:$0xff]   ;;  %v5520_v15 = vld [vmem:[#allocation8 + $0x3c4] ss:$16 sps:$4 sm:$0xff]  }
 0x13c   : > { %1891 = vmatpush2.bf16.msra.mxu0 %v5386_v17  ;;  %v5452_v17 = vld [vmem:[#allocation8 + $0x120] ss:$16 sps:$4 sm:$0xff]  }
 0x13d   : > { %1930 = vmatpush2.bf16.msra.mxu1 %v5383_v16  ;;  %1892 = vmatprep.subr.bf16.mxu0 %v5394_v19  ;;  %v5454_v16 = vld [vmem:[#allocation8 + $0x124] ss:$16 sps:$4 sm:$0xff]  }
 0x13e   : > { %1931 = vmatprep.subr.bf16.mxu1 %v5391_v18  ;;  %v5524_v18 = vld [vmem:[#allocation8 + $0x3a0] ss:$16 sps:$4 sm:$0xff]   ;;  %v5526_v19 = vld [vmem:[#allocation8 + $0x3a4] ss:$16 sps:$4 sm:$0xff]  }
 0x140   : > { %1893 = vmatpush2.bf16.msra.mxu0 %v5392_v22  ;;  %v5455_v22 = vld [vmem:[#allocation8 + $0x100] ss:$16 sps:$4 sm:$0xff]  }
 0x141   : > { %1932 = vmatpush2.bf16.msra.mxu1 %v5389_v20  ;;  %1894 = vmatprep.subr.bf16.mxu0 %v5400_v25  ;;  %v5457_v20 = vld [vmem:[#allocation8 + $0x104] ss:$16 sps:$4 sm:$0xff]   ;;  %v5460_v25 = vld [vmem:[#allocation8 + $0xec] ss:$16 sps:$4 sm:$0xff]  }
 0x142   : > { %1933 = vmatprep.subr.bf16.mxu1 %v5397_v24  ;;  %v5532_v24 = vld [vmem:[#allocation8 + $0x384] ss:$16 sps:$4 sm:$0xff]  }
 0x144   : > { %1895 = vmatpush2.bf16.msra.mxu0 %v5398_v28  ;;  %v5538_v28 = vld [vmem:[#allocation8 + $0x364] ss:$16 sps:$4 sm:$0xff]  }
 0x145   : > { %1934 = vmatpush2.bf16.msra.mxu1 %v5395_v27  ;;  %1964 = vmatprep.subr.bf16.mxu0 %v5406_v30  ;;  %v5530_v27 = vld [vmem:[#allocation8 + $0x380] ss:$16 sps:$4 sm:$0xff]   ;;  %v5544_v30 = vld [vmem:[#allocation8 + $0x344] ss:$16 sps:$4 sm:$0xff]  }
 0x146   : > { %1935 = vmatprep.subr.bf16.mxu1 %v5403_v29  ;;  %v5536_v29 = vld [vmem:[#allocation8 + $0x360] ss:$16 sps:$4 sm:$0xff]  }
 0x147   : > { %1897 = vmatmul.mubr.bf16.vlgmr.msra.gmra.mxu0 %v6337_v13  ;;  %v5421_v13 = vld [vmem:[#allocation8 + $0x84] ss:$16 sps:$4 sm:$0xff]  }
 0x148   : > { %1965 = vmatpush1.bf16.msra.mxu0 %v5404_v32  ;;  %1982 = vmatprep.mubr.bf16.mxu0 %v6074_v21  ;;  %v5424_v21 = vld [vmem:[#allocation8 + $0x64] ss:$16 sps:$4 sm:$0xff]  }
 0x149   : > { %1936 = vmatpush2.bf16.msra.mxu1 %v5401_v31  ;;  %2795 = vmatprep.subr.bf16.mxu0 %v5412_v34  ;;  %v5542_v31 = vld [vmem:[#allocation8 + $0x340] ss:$16 sps:$4 sm:$0xff]   ;;  %v5550_v32 = vld [vmem:[#allocation8 + $0x324] ss:$16 sps:$4 sm:$0xff]  }
 0x14a   : > { %1937 = vmatprep.subr.bf16.mxu1 %v5409_v33  ;;  %v5548_v33 = vld [vmem:[#allocation8 + $0x320] ss:$16 sps:$4 sm:$0xff]   ;;  %v5553_v34 = vld [vmem:[#allocation8 + $0x304] ss:$16 sps:$4 sm:$0xff]  }
 0x14d   : > { %1938 = vmatpush2.bf16.msra.mxu1 %v5407_v35  ;;  %v5551_v35 = vld [vmem:[#allocation8 + $0x300] ss:$16 sps:$4 sm:$0xff]  }
 0x14e   : > { %2838 = vmatprep.subr.bf16.mxu1 %v5466_v45  ;;  %v6375_v45 = vld [vmem:[#allocation7] sm:$0xf] }
 0x14f   : > { %4658 = vmatmul.mubr.msk.bf16.vlgmr.msra.gmra.mxu0 %vm1645_vm0, %v6344_v23  ;;  %v5425_v23 = vld [vmem:[#allocation8 + $0x40] ss:$16 sps:$4 sm:$0xff]  }
 0x150   : > { %1940 = vmatmul.mubr.bf16.vlgmr.msra.gmra.mxu1 %v6356_v26  ;;  %2796 = vmatpush1.bf16.msra.mxu0 %v5410_v36  ;;  %v5427_v26 = vld [vmem:[#allocation8 + $0x44] ss:$16 sps:$4 sm:$0xff]   ;;  %v5556_v36 = vld [vmem:[#allocation8 + $0x2ec] ss:$16 sps:$4 sm:$0xff]  }
 0x151   : > { %2797 = vmatprep.subr.bf16.mxu0 %v5415_v37  ;;  %2839 = vmatpush1.bf16.msra.mxu1 %v5464_v43 }
 0x152   : > { %2840 = vmatprep.subr.bf16.mxu1 %v5472_v46 }
 0x154   : > { %2798 = vmatpush1.bf16.msra.mxu0 %v5413_v38  ;;  %v645_v38 = vlaneseq }
 0x155   : > { %2799 = vmatprep.subr.bf16.mxu0 %v5418_v39  ;;  %2841 = vmatpush1.bf16.msra.mxu1 %v5470_v54 }
 0x156   : > { %2842 = vmatprep.subr.bf16.mxu1 %v5478_v49 }
 0x158   : > { %2800 = vmatpush1.bf16.msra.mxu0 %v5416_v40  ;;  %v6367_v40 = vshrl.u32 %v645_v38, 7  ;;  %v5515_v38 = vld [vmem:[#allocation8 + $0x1a8] ss:$16 sps:$4 sm:$0xff]  }
 0x159   : > { %2801 = vmatprep.subr.bf16.mxu0 %v5421_v13  ;;  %2843 = vmatpush1.bf16.msra.mxu1 %v5476_v48 }
 0x15a   : > { %2844 = vmatprep.subr.bf16.mxu1 %v5484_v52 }
 0x15c   : > { %2802 = vmatpush1.bf16.msra.mxu0 %v5419_v41 }
 0x15d   : > { %2803 = vmatprep.subr.bf16.mxu0 %v5424_v21  ;;  %2845 = vmatpush1.bf16.msra.mxu1 %v5482_v44  ;;  %v6370_v21 = vsub.s32 1, %v6367_v40 }
 0x15e   : > { %2846 = vmatprep.subr.bf16.mxu1 %v5490_v57 }
 0x160   : > { %2804 = vmatpush1.bf16.msra.mxu0 %v5422_v42  ;;  %v6373_v42 = vsub.s32 0, %v6367_v40 }
 0x161   : > { %2805 = vmatprep.subr.bf16.mxu0 %v5427_v26  ;;  %2847 = vmatpush1.bf16.msra.mxu1 %v5488_v56 }
 0x162   : > { %2848 = vmatprep.subr.bf16.mxu1 %v5496_v61  ;;  %v648_v54 = vrot.slane %v6375_v45, %v6373_v42 }
 0x164   : > { %2806 = vmatpush1.bf16.msra.mxu0 %v5425_v23  ;;  %v652_v23 = vrot.slane %v6375_v45, %v6370_v21 }
 0x165   : > { %2807 = vmatprep.subr.bf16.mxu0 %v5430_v47  ;;  %2849 = vmatpush1.bf16.msra.mxu1 %v5494_v60 }
 0x166   : > { %2850 = vmatprep.subr.bf16.mxu1 %v5502_v1 }
 0x168   : > { %2808 = vmatpush1.bf16.msra.mxu0 %v5428_v12 }
 0x169   : > { %2809 = vmatprep.subr.bf16.mxu0 %v5433_v50  ;;  %2851 = vmatpush1.bf16.msra.mxu1 %v5500_v0 }
 0x16a   : > { %2852 = vmatprep.subr.bf16.mxu1 %v5508_v5 }
 0x16c   : > { %2810 = vmatpush1.bf16.msra.mxu0 %v5431_v51 }
 0x16d   : > { %2811 = vmatprep.subr.bf16.mxu0 %v5436_v53  ;;  %2853 = vmatpush1.bf16.msra.mxu1 %v5506_v4 }
 0x16e   : > { %2854 = vmatprep.subr.bf16.mxu1 %v5514_v9 }
 0x170   : > { %2812 = vmatpush2.bf16.msra.mxu0 %v5434_v55 }
 0x171   : > { %2813 = vmatprep.subr.bf16.mxu0 %v5439_v58  ;;  %2855 = vmatpush2.bf16.msra.mxu1 %v5512_v8 }
 0x172   : > { %2856 = vmatprep.subr.bf16.mxu1 %v5520_v15 }
 0x174   : > { %2814 = vmatpush2.bf16.msra.mxu0 %v5437_v59 }
 0x175   : > { %2815 = vmatprep.subr.bf16.mxu0 %v5442_v62  ;;  %2857 = vmatpush2.bf16.msra.mxu1 %v5518_v14  ;;  %v5458_v14 = vld [vmem:[#allocation8 + $0xe8] ss:$16 sps:$4 sm:$0xff]  }
 0x176   : > { %2858 = vmatprep.subr.bf16.mxu1 %v5526_v19  ;;  %v5467_v19 = vld [vmem:[#allocation8 + $0xa8] ss:$16 sps:$4 sm:$0xff]  }
 0x178   : > { %2816 = vmatpush2.bf16.msra.mxu0 %v5440_v63 }
 0x179   : > { %2817 = vmatprep.subr.bf16.mxu0 %v5445_v2  ;;  %2859 = vmatpush2.bf16.msra.mxu1 %v5524_v18  ;;  %v5469_v18 = vld [vmem:[#allocation8 + $0xac] ss:$16 sps:$4 sm:$0xff]  }
 0x17a   : > { %2860 = vmatprep.subr.bf16.mxu1 %v5532_v24  ;;  %v5481_v24 = vld [vmem:[#allocation8 + $0x6c] ss:$16 sps:$4 sm:$0xff]  }
 0x17c   : > { %2818 = vmatpush2.bf16.msra.mxu0 %v5443_v3 }
 0x17d   : > { %2819 = vmatprep.subr.bf16.mxu0 %v5448_v6  ;;  %2861 = vmatpush2.bf16.msra.mxu1 %v5530_v27  ;;  %v5487_v27 = vld [vmem:[#allocation8 + $0x4c] ss:$16 sps:$4 sm:$0xff]  }
 0x17e   : > { %2862 = vmatprep.subr.bf16.mxu1 %v5538_v28  ;;  %v5485_v28 = vld [vmem:[#allocation8 + $0x48] ss:$16 sps:$4 sm:$0xff]  }
 0x180   : > { %2820 = vmatpush2.bf16.msra.mxu0 %v5446_v7 }
 0x181   : > { %2821 = vmatprep.subr.bf16.mxu0 %v5451_v10  ;;  %2863 = vmatpush2.bf16.msra.mxu1 %v5536_v29  ;;  %v5493_v29 = vld [vmem:[#allocation8 + $0x2c] ss:$16 sps:$4 sm:$0xff]  }
 0x182   : > { %2864 = vmatprep.subr.bf16.mxu1 %v5544_v30  ;;  %v5491_v30 = vld [vmem:[#allocation8 + $0x28] ss:$16 sps:$4 sm:$0xff]  }
 0x184   : > { %2822 = vmatpush2.bf16.msra.mxu0 %v5449_v11 }
 0x185   : > { %2823 = vmatprep.subr.bf16.mxu0 %v5454_v16  ;;  %2865 = vmatpush2.bf16.msra.mxu1 %v5542_v31  ;;  %v5463_v16 = vld [vmem:[#allocation8 + $0xcc] ss:$16 sps:$4 sm:$0xff]  }
 0x186   : > { %2866 = vmatprep.subr.bf16.mxu1 %v5550_v32  ;;  %v5499_v31 = vld [vmem:[#allocation8 + $0xc] ss:$16 sps:$4 sm:$0xff]   ;;  %v5497_v32 = vld [vmem:[#allocation8 + $0x8] ss:$16 sps:$4 sm:$0xff]  }
 0x187   : > { %v1683_v13 = vpop.f32.mrf.mxu0 }
 0x188   : > { %2824 = vmatpush2.bf16.msra.mxu0 %v5452_v17  ;;  %v1726_v37 = vpop.f32.mrf.mxu1  ;;  %v1684_v48 = vadd.f32 %v1683_v13, %v648_v54  ;;  %v5461_v17 = vld [vmem:[#allocation8 + $0xc8] ss:$16 sps:$4 sm:$0xff]  }
 0x189   : > { %2825 = vmatprep.subr.bf16.mxu0 %v5457_v20  ;;  %2867 = vmatpush2.bf16.msra.mxu1 %v5548_v33  ;;  %v1685_v43 = vpop.f32.mrf.mxu0  ;;  %v5475_v20 = vld [vmem:[#allocation8 + $0x8c] ss:$16 sps:$4 sm:$0xff]   ;;  %v5521_v13 = vld [vmem:[#allocation8 + $0x188] ss:$16 sps:$4 sm:$0xff]  }
 0x18a   : > { %2868 = vmatprep.subr.bf16.mxu1 %v5553_v34  ;;  %v1728_v39 = vpop.f32.mrf.mxu1  ;;  %v1686_v12 = vadd.f32 %v1685_v43, %v652_v23  ;;  %v1727_v55 = vadd.f32 %v1726_v37, %v1684_v48  ;;  %v5505_v33 = vld [vmem:[#allocation8 + $0x1ec] ss:$16 sps:$4 sm:$0xff]   ;;  %v5503_v34 = vld [vmem:[#allocation8 + $0x1e8] ss:$16 sps:$4 sm:$0xff]  }
 0x18b   : > { %v1687_v46 = vpop.f32.mrf.mxu0  ;;  %v5517_v37 = vld [vmem:[#allocation8 + $0x1ac] ss:$16 sps:$4 sm:$0xff]   ;;  %v5533_v48 = vld [vmem:[#allocation8 + $0x148] ss:$16 sps:$4 sm:$0xff]  }
 0x18c   : > { %2826 = vmatpush2.bf16.msra.mxu0 %v5455_v22  ;;  %v1730_v41 = vpop.f32.mrf.mxu1  ;;  %v1688_v50 = vadd.f32 %v1687_v46, %v648_v54  ;;  %v1729_v52 = vadd.f32 %v1728_v39, %v1686_v12  ;;  %v5473_v22 = vld [vmem:[#allocation8 + $0x88] ss:$16 sps:$4 sm:$0xff]   ;;  %v5523_v39 = vld [vmem:[#allocation8 + $0x18c] ss:$16 sps:$4 sm:$0xff]   ;;  %v6385_v46 = vsub.s32 3, %v6367_v40 }
 0x18d   : > { %2881 = vmatprep.subr.bf16.mxu0 %v5460_v25  ;;  %2869 = vmatpush2.bf16.msra.mxu1 %v5551_v35  ;;  %v1689_v49 = vpop.f32.mrf.mxu0  ;;  %v5479_v25 = vld [vmem:[#allocation8 + $0x68] ss:$16 sps:$4 sm:$0xff]   ;;  %v5511_v35 = vld [vmem:[#allocation8 + $0x1cc] ss:$16 sps:$4 sm:$0xff]  }
 0x18e   : > { %2924 = vmatprep.subr.bf16.mxu1 %v5556_v36  ;;  %v1732_v26 = vpop.f32.mrf.mxu1  ;;  %v1690_v53 = vadd.f32 %v1689_v49, %v652_v23  ;;  %v1731_v57 = vadd.f32 %v1730_v41, %v1688_v50  ;;  %v5509_v36 = vld [vmem:[#allocation8 + $0x1c8] ss:$16 sps:$4 sm:$0xff]   ;;  %v5529_v43 = vld [vmem:[#allocation8 + $0x16c] ss:$16 sps:$4 sm:$0xff]  }
 0x18f   : > { %v5535_v54 = vld [vmem:[#allocation8 + $0x14c] ss:$16 sps:$4 sm:$0xff]  }
 0x190   : > { %v1812_v47 = vpop.f32.mrf.mxu1  ;;  %v1733_v62 = vadd.f32 %v1732_v26, %v1690_v53  ;;  %v5527_v26 = vld [vmem:[#allocation8 + $0x168] ss:$16 sps:$4 sm:$0xff]  }
 0x192   : > { %v1814_v51 = vpop.f32.mrf.mxu1 }
 0x194   : > { %v1816_v59 = vpop.f32.mrf.mxu1 }
 0x196   : > { %v1818_v4 = vpop.f32.mrf.mxu1 }
 0x1c7   : > { %v1769_v44 = vpop.f32.mrf.mxu0 }
 0x1c8   : > { %v1770_v60 = vadd.f32 %v1769_v44, %v1727_v55  ;;  %v660_v44 = vrot.slane %v6375_v45, %v6385_v46  ;;  %v5539_v55 = vld [vmem:[#allocation8 + $0x128] ss:$16 sps:$4 sm:$0xff]  }
 0x1c9   : > { %v1771_v56 = vpop.f32.mrf.mxu0 }
 0x1ca   : > { %v1772_v58 = vadd.f32 %v1771_v56, %v1729_v52  ;;  %v1813_v5 = vadd.f32 %v1812_v47, %v1770_v60  ;;  %v6388_v47 = vsub.s32 2, %v6367_v40  ;;  %v5547_v40 = vld [vmem:[#allocation8 + $0x10c] ss:$16 sps:$4 sm:$0xff]  }
 0x1cb   : > { %v1773_v61 = vpop.f32.mrf.mxu0 }
 0x1cc   : > { %v1774_v63 = vadd.f32 %v1773_v61, %v1731_v57  ;;  %v1815_v1 = vadd.f32 %v1814_v51, %v1772_v58  ;;  %v1993_v10 = vmax.f32 %v1813_v5, 0.0  ;;  %v5541_v51 = vld [vmem:[#allocation8 + $0x12c] ss:$16 sps:$4 sm:$0xff]   ;;  %v656_v52 = vrot.slane %v6375_v45, %v6388_v47 }
 0x1cd   : > { %v1775_v0 = vpop.f32.mrf.mxu0 }
 0x1ce   : > { %v1817_v2 = vadd.f32 %v1816_v59, %v1774_v63  ;;  %v1776_v3 = vadd.f32 %v1775_v0, %v1733_v62  ;;  %v1994_v8 = vmax.f32 %v1815_v1, 0.0  ;;  %v5545_v0 = vld [vmem:[#allocation8 + $0x108] ss:$16 sps:$4 sm:$0xff]  }
 0x1d0   : > { %v1819_v6 = vadd.f32 %v1818_v4, %v1776_v3  ;;  %v1997_v7 = vmax.f32 %v1817_v2, 0.0  ;;  %v1855_v41 = vpop.f32.mrf.mxu1 }
 0x1d1   : > { %v1856_v59 = vadd.f32 %v1855_v41, %v656_v52  ;;  %v5613_v41 = vld [vmem:[#allocation10 + $0x84] ss:$16 sps:$4 sm:$0xff]  }
 0x1d2   : > { %v1998_v9 = vmax.f32 %v1819_v6, 0.0  ;;  %v6381_v15 = vpack.c.bf16 %v1997_v7, %v1993_v10  ;;  %v1857_v23 = vpop.f32.mrf.mxu1 }
 0x1d3   : > { %v1858_v58 = vadd.f32 %v1857_v23, %v660_v44  ;;  %v5611_v23 = vld [vmem:[#allocation10 + $0x80] ss:$16 sps:$4 sm:$0xff]  }
 0x1d4   : > { %v2002_v11 = vpack.c.bf16 %v1998_v9, %v1994_v8  ;;  %v1859_v49 = vpop.f32.mrf.mxu1 }
 0x1d5   : > { %v1860_v62 = vadd.f32 %v1859_v49, %v656_v52  ;;  %v5614_v49 = vld [vmem:[#allocation10 + $0x60] ss:$16 sps:$4 sm:$0xff]  }
 0x1d6   : > { %2827 = vmatprep.mubr.bf16.mxu0 %v2002_v11  ;;  %v1861_v56 = vpop.f32.mrf.mxu1  ;;  %v5617_v52 = vld [vmem:[#allocation10 + $0x40] ss:$16 sps:$4 sm:$0xff]  }
 0x1d7   : > { %2828 = vmatmul.mubr.bf16.vlgmr.msra.gmra.mxu0 %v6381_v15  ;;  %v1862_v45 = vadd.f32 %v1861_v56, %v660_v44  ;;  %v5574_v44 = vld [vmem:[#allocation8 + $0x22c] ss:$16 sps:$4 sm:$0xff]  }
 0x1d8   : > { %2882 = vmatpush1.bf16.msra.mxu0 %v5458_v14  ;;  %2913 = vmatprep.mubr.bf16.mxu0 %v2002_v11  ;;  %v5577_v56 = vld [vmem:[#allocation8 + $0x20c] ss:$16 sps:$4 sm:$0xff]  }
 0x1d9   : > { %2883 = vmatprep.subr.bf16.mxu0 %v5463_v16 }
 0x1dc   : > { %2884 = vmatpush1.bf16.msra.mxu0 %v5461_v17 }
 0x1dd   : > { %2885 = vmatprep.subr.bf16.mxu0 %v5469_v18 }
 0x1e0   : > { %2886 = vmatpush1.bf16.msra.mxu0 %v5467_v19 }
 0x1e1   : > { %2887 = vmatprep.subr.bf16.mxu0 %v5475_v20 }
 0x1e4   : > { %2888 = vmatpush1.bf16.msra.mxu0 %v5473_v22 }
 0x1e5   : > { %2889 = vmatprep.subr.bf16.mxu0 %v5481_v24 }
 0x1e8   : > { %2890 = vmatpush1.bf16.msra.mxu0 %v5479_v25 }
 0x1e9   : > { %2891 = vmatprep.subr.bf16.mxu0 %v5487_v27 }
 0x1ec   : > { %2892 = vmatpush1.bf16.msra.mxu0 %v5485_v28 }
 0x1ed   : > { %2893 = vmatprep.subr.bf16.mxu0 %v5493_v29  ;;  %v5554_v29 = vld [vmem:[#allocation8 + $0x2e8] ss:$16 sps:$4 sm:$0xff]  }
 0x1f0   : > { %2894 = vmatpush1.bf16.msra.mxu0 %v5491_v30 }
 0x1f1   : > { %2895 = vmatprep.subr.bf16.mxu0 %v5499_v31  ;;  %v5559_v31 = vld [vmem:[#allocation8 + $0x2cc] ss:$16 sps:$4 sm:$0xff]  }
 0x1f4   : > { %2896 = vmatpush1.bf16.msra.mxu0 %v5497_v32  ;;  %v5602_v32 = vld [vmem:[#allocation10 + $0xe0] ss:$16 sps:$4 sm:$0xff]  }
 0x1f5   : > { %2897 = vmatprep.subr.bf16.mxu0 %v5505_v33  ;;  %v5604_v33 = vld [vmem:[#allocation10 + $0xe4] ss:$16 sps:$4 sm:$0xff]  }
 0x1f8   : > { %2898 = vmatpush2.bf16.msra.mxu0 %v5503_v34  ;;  %v5607_v34 = vld [vmem:[#allocation10 + $0xc4] ss:$16 sps:$4 sm:$0xff]  }
 0x1f9   : > { %2899 = vmatprep.subr.bf16.mxu0 %v5511_v35  ;;  %v5557_v35 = vld [vmem:[#allocation8 + $0x2c8] ss:$16 sps:$4 sm:$0xff]  }
 0x1fc   : > { %2900 = vmatpush2.bf16.msra.mxu0 %v5509_v36  ;;  %v5605_v36 = vld [vmem:[#allocation10 + $0xc0] ss:$16 sps:$4 sm:$0xff]  }
 0x1fd   : > { %2901 = vmatprep.subr.bf16.mxu0 %v5517_v37  ;;  %v5610_v37 = vld [vmem:[#allocation10 + $0xa4] ss:$16 sps:$4 sm:$0xff]  }
 0x200   : > { %2902 = vmatpush2.bf16.msra.mxu0 %v5515_v38  ;;  %v5560_v38 = vld [vmem:[#allocation8 + $0x2a8] ss:$16 sps:$4 sm:$0xff]  }
 0x201   : > { %2903 = vmatprep.subr.bf16.mxu0 %v5523_v39  ;;  %v5565_v39 = vld [vmem:[#allocation8 + $0x28c] ss:$16 sps:$4 sm:$0xff]  }
 0x204   : > { %2904 = vmatpush2.bf16.msra.mxu0 %v5521_v13  ;;  %v5608_v13 = vld [vmem:[#allocation10 + $0xa0] ss:$16 sps:$4 sm:$0xff]  }
 0x205   : > { %2905 = vmatprep.subr.bf16.mxu0 %v5529_v43  ;;  %v5563_v43 = vld [vmem:[#allocation8 + $0x288] ss:$16 sps:$4 sm:$0xff]  }
 0x207   : > { %v1898_v12 = vpop.f32.mrf.mxu0 }
 0x208   : > { %2906 = vmatpush2.bf16.msra.mxu0 %v5527_v26  ;;  %v1899_v1 = vadd.f32 %v1898_v12, %v1856_v59  ;;  %v5568_v26 = vld [vmem:[#allocation8 + $0x26c] ss:$16 sps:$4 sm:$0xff]   ;;  %v5566_v12 = vld [vmem:[#allocation8 + $0x268] ss:$16 sps:$4 sm:$0xff]  }
 0x209   : > { %v1900_v50 = vpop.f32.mrf.mxu0  ;;  %2907 = vmatprep.subr.bf16.mxu0 %v5535_v54  ;;  %v5616_v54 = vld [vmem:[#allocation10 + $0x64] ss:$16 sps:$4 sm:$0xff]   ;;  %v5580_v59 = vld [vmem:[#allocation8 + $0x3ec] ss:$16 sps:$4 sm:$0xff]  }
 0x20a   : > { %v1901_v63 = vadd.f32 %v1900_v50, %v1858_v58  ;;  %v5619_v50 = vld [vmem:[#allocation10 + $0x44] ss:$16 sps:$4 sm:$0xff]   ;;  %v5575_v58 = vld [vmem:[#allocation8 + $0x208] ss:$16 sps:$4 sm:$0xff]  }
 0x20b   : > { %v1902_v53 = vpop.f32.mrf.mxu0 }
 0x20c   : > { %2908 = vmatpush2.bf16.msra.mxu0 %v5533_v48  ;;  %v1903_v4 = vadd.f32 %v1902_v53, %v1860_v62  ;;  %v5571_v48 = vld [vmem:[#allocation8 + $0x24c] ss:$16 sps:$4 sm:$0xff]   ;;  %v5622_v53 = vld [vmem:[#allocation10 + $0x24] ss:$16 sps:$4 sm:$0xff]   ;;  %v5578_v62 = vld [vmem:[#allocation8 + $0x3e8] ss:$16 sps:$4 sm:$0xff]  }
 0x20d   : > { %v1904_v57 = vpop.f32.mrf.mxu0  ;;  %2909 = vmatprep.subr.bf16.mxu0 %v5541_v51  ;;  %v5569_v51 = vld [vmem:[#allocation8 + $0x248] ss:$16 sps:$4 sm:$0xff]  }
 0x20e   : > { %v1905_v9 = vadd.f32 %v1904_v57, %v1862_v45  ;;  %v5620_v57 = vld [vmem:[#allocation10 + $0x20] ss:$16 sps:$4 sm:$0xff]  }
 0x20f   : > { %v1984_v61 = vpop.f32.mrf.mxu0  ;;  %v5629_v45 = vld [vmem:[#allocation10 + $0x1c0] ss:$16 sps:$4 sm:$0xff]  }
 0x210   : > { %v1941_v60 = vpop.f32.mrf.mxu1  ;;  %2910 = vmatpush2.bf16.msra.mxu0 %v5539_v55  ;;  %v5572_v55 = vld [vmem:[#allocation8 + $0x228] ss:$16 sps:$4 sm:$0xff]  }
 0x211   : > { %v1986_v3 = vpop.f32.mrf.mxu0  ;;  %2911 = vmatprep.subr.bf16.mxu0 %v5547_v40  ;;  %v1942_v6 = vadd.f32 %v1941_v60, %v1899_v1  ;;  %v5625_v40 = vld [vmem:[#allocation10 + $0x4] ss:$16 sps:$4 sm:$0xff]   ;;  %v5623_v60 = vld [vmem:[#allocation10] ss:$16 sps:$4 sm:$0xff]  }
 0x212   : > { %v1943_v2 = vpop.f32.mrf.mxu1  ;;  %v5631_v1 = vld [vmem:[#allocation10 + $0x1c4] ss:$16 sps:$4 sm:$0xff]  }
 0x213   : > { %v1944_v5 = vadd.f32 %v1943_v2, %v1901_v63  ;;  %v1988_v8 = vpop.f32.mrf.mxu0  ;;  %v1985_v19 = vadd.f32 %v1984_v61, %v1942_v6  ;;  %v5628_v61 = vld [vmem:[#allocation10 + $0x1e4] ss:$16 sps:$4 sm:$0xff]   ;;  %v5583_v63 = vld [vmem:[#allocation8 + $0x3cc] ss:$16 sps:$4 sm:$0xff]   ;;  %v5581_v2 = vld [vmem:[#allocation8 + $0x3c8] ss:$16 sps:$4 sm:$0xff]  }
 0x214   : > { %v1945_v7 = vpop.f32.mrf.mxu1  ;;  %2912 = vmatpush2.bf16.msra.mxu0 %v5545_v0  ;;  %v5626_v0 = vld [vmem:[#allocation10 + $0x1e0] ss:$16 sps:$4 sm:$0xff]   ;;  %v5589_v6 = vld [vmem:[#allocation8 + $0x38c] ss:$16 sps:$4 sm:$0xff]  }
 0x215   : > { %v1946_v10 = vadd.f32 %v1945_v7, %v1903_v4  ;;  %v1990_v14 = vpop.f32.mrf.mxu0  ;;  %v1987_v16 = vadd.f32 %v1986_v3, %v1944_v5  ;;  %v1995_v27 = vmax.f32 %v1985_v19, 0.0  ;;  %3769 = vmatprep.subr.bf16.mxu0 %v5604_v33  ;;  %v5586_v3 = vld [vmem:[#allocation8 + $0x3ac] ss:$16 sps:$4 sm:$0xff]   ;;  %v5634_v4 = vld [vmem:[#allocation10 + $0x1a4] ss:$16 sps:$4 sm:$0xff]  }
 0x216   : > { %v1947_v11 = vpop.f32.mrf.mxu1  ;;  %v5584_v5 = vld [vmem:[#allocation8 + $0x3a8] ss:$16 sps:$4 sm:$0xff]   ;;  %v5632_v7 = vld [vmem:[#allocation10 + $0x1a0] ss:$16 sps:$4 sm:$0xff]   ;;  %v5637_v19 = vld [vmem:[#allocation10 + $0x184] ss:$16 sps:$4 sm:$0xff]  }
 0x217   : > { %v1989_v17 = vadd.f32 %v1988_v8, %v1946_v10  ;;  %v1948_v18 = vadd.f32 %v1947_v11, %v1905_v9  ;;  %2914 = vmatmul.mubr.bf16.vlgmr.msra.gmra.mxu0 %v6381_v15  ;;  %v1996_v24 = vmax.f32 %v1987_v16, 0.0  ;;  %v5562_v15 = vld [vmem:[#allocation8 + $0x2ac] ss:$16 sps:$4 sm:$0xff]   ;;  %v5587_v8 = vld [vmem:[#allocation8 + $0x388] ss:$16 sps:$4 sm:$0xff]  }
 0x218   : > { %3770 = vmatpush1.bf16.msra.mxu0 %v5602_v32  ;;  %v5592_v9 = vld [vmem:[#allocation8 + $0x36c] ss:$16 sps:$4 sm:$0xff]   ;;  %v5590_v10 = vld [vmem:[#allocation8 + $0x368] ss:$16 sps:$4 sm:$0xff]   ;;  %v5649_v32 = vld [vmem:[#allocation10 + $0x104] ss:$16 sps:$4 sm:$0xff]  }
 0x219   : > { %v1991_v20 = vadd.f32 %v1990_v14, %v1948_v18  ;;  %v1999_v22 = vmax.f32 %v1989_v17, 0.0  ;;  %3771 = vmatprep.subr.bf16.mxu0 %v5607_v34  ;;  %v5595_v11 = vld [vmem:[#allocation8 + $0x34c] ss:$16 sps:$4 sm:$0xff]   ;;  %v5593_v14 = vld [vmem:[#allocation8 + $0x348] ss:$16 sps:$4 sm:$0xff]  }
 0x21a   : > { %v5598_v16 = vld [vmem:[#allocation8 + $0x32c] ss:$16 sps:$4 sm:$0xff]   ;;  %v5596_v17 = vld [vmem:[#allocation8 + $0x328] ss:$16 sps:$4 sm:$0xff]   ;;  %v5647_v33 = vld [vmem:[#allocation10 + $0x100] ss:$16 sps:$4 sm:$0xff]  }
 0x21b   : > { %v2000_v25 = vmax.f32 %v1991_v20, 0.0  ;;  %v6395_v30 = vpack.c.bf16 %v1999_v22, %v1995_v27  ;;  %v5601_v18 = vld [vmem:[#allocation8 + $0x30c] ss:$16 sps:$4 sm:$0xff]   ;;  %v5599_v20 = vld [vmem:[#allocation8 + $0x308] ss:$16 sps:$4 sm:$0xff]  }
 0x21c   : > { %3772 = vmatpush1.bf16.msra.mxu0 %v5605_v36  ;;  %v5635_v22 = vld [vmem:[#allocation10 + $0x180] ss:$16 sps:$4 sm:$0xff]   ;;  %v5643_v27 = vld [vmem:[#allocation10 + $0x144] ss:$16 sps:$4 sm:$0xff]  }
 0x21d   : > { %v2004_v28 = vpack.c.bf16 %v2000_v25, %v1996_v24  ;;  %3773 = vmatprep.subr.bf16.mxu0 %v5610_v37  ;;  %v5640_v24 = vld [vmem:[#allocation10 + $0x164] ss:$16 sps:$4 sm:$0xff]   ;;  %v5638_v25 = vld [vmem:[#allocation10 + $0x160] ss:$16 sps:$4 sm:$0xff]  }
 0x21e   : > { %v5650_v34 = vld [vmem:[#allocation10 + $0x2e0] ss:$16 sps:$4 sm:$0xff]  }
 0x21f   : > { %2870 = vmatprep.mubr.bf16.mxu1 %v2004_v28  ;;  %v5656_v36 = vld [vmem:[#allocation10 + $0x2c0] ss:$16 sps:$4 sm:$0xff]  }
 0x220   : > { %2871 = vmatmul.mubr.bf16.vlgmr.msra.gmra.mxu1 %v6395_v30  ;;  %3774 = vmatpush1.bf16.msra.mxu0 %v5608_v13  ;;  %v5662_v37 = vld [vmem:[#allocation10 + $0x2a0] ss:$16 sps:$4 sm:$0xff]   ;;  %v5670_v13 = vld [vmem:[#allocation10 + $0x284] ss:$16 sps:$4 sm:$0xff]  }
 0x221   : > { %2925 = vmatpush1.bf16.msra.mxu1 %v5554_v29  ;;  %2956 = vmatprep.mubr.bf16.mxu1 %v2004_v28  ;;  %v5641_v28 = vld [vmem:[#allocation10 + $0x140] ss:$16 sps:$4 sm:$0xff]   ;;  %v5646_v29 = vld [vmem:[#allocation10 + $0x124] ss:$16 sps:$4 sm:$0xff]  }
 0x222   : > { %2926 = vmatprep.subr.bf16.mxu1 %v5559_v31  ;;  %3775 = vmatprep.subr.bf16.mxu0 %v5613_v41  ;;  %v5644_v31 = vld [vmem:[#allocation10 + $0x120] ss:$16 sps:$4 sm:$0xff]  }
 0x223   : > { %v5674_v41 = vld [vmem:[#allocation10 + $0x260] ss:$16 sps:$4 sm:$0xff]  }
 0x224   : > { %3776 = vmatpush1.bf16.msra.mxu0 %v5611_v23  ;;  %v5682_v23 = vld [vmem:[#allocation10 + $0x244] ss:$16 sps:$4 sm:$0xff]  }
 0x225   : > { %2927 = vmatpush1.bf16.msra.mxu1 %v5557_v35  ;;  %3777 = vmatprep.subr.bf16.mxu0 %v5616_v54  ;;  %v5652_v35 = vld [vmem:[#allocation10 + $0x2e4] ss:$16 sps:$4 sm:$0xff]   ;;  %v5686_v54 = vld [vmem:[#allocation10 + $0x220] ss:$16 sps:$4 sm:$0xff]  }
 0x226   : > { %2928 = vmatprep.subr.bf16.mxu1 %v5562_v15  ;;  %v5655_v15 = vld [vmem:[#allocation10 + $0xec] ss:$16 sps:$4 sm:$0xff]  }
 0x228   : > { %3778 = vmatpush1.bf16.msra.mxu0 %v5614_v49  ;;  %v5694_v49 = vld [vmem:[#allocation10 + $0x204] ss:$16 sps:$4 sm:$0xff]  }
 0x229   : > { %2929 = vmatpush1.bf16.msra.mxu1 %v5560_v38  ;;  %3779 = vmatprep.subr.bf16.mxu0 %v5619_v50  ;;  %v5664_v38 = vld [vmem:[#allocation10 + $0x2a4] ss:$16 sps:$4 sm:$0xff]   ;;  %v5698_v50 = vld [vmem:[#allocation10 + $0x3e0] ss:$16 sps:$4 sm:$0xff]  }
 0x22a   : > { %2930 = vmatprep.subr.bf16.mxu1 %v5565_v39  ;;  %v5668_v39 = vld [vmem:[#allocation10 + $0x280] ss:$16 sps:$4 sm:$0xff]  }
 0x22c   : > { %3780 = vmatpush1.bf16.msra.mxu0 %v5617_v52  ;;  %v5706_v52 = vld [vmem:[#allocation10 + $0x3c4] ss:$16 sps:$4 sm:$0xff]  }
 0x22d   : > { %2931 = vmatpush1.bf16.msra.mxu1 %v5563_v43  ;;  %3781 = vmatprep.subr.bf16.mxu0 %v5622_v53  ;;  %v5676_v43 = vld [vmem:[#allocation10 + $0x264] ss:$16 sps:$4 sm:$0xff]   ;;  %v5710_v53 = vld [vmem:[#allocation10 + $0x3a0] ss:$16 sps:$4 sm:$0xff]  }
 0x22e   : > { %2932 = vmatprep.subr.bf16.mxu1 %v5568_v26  ;;  %v5680_v26 = vld [vmem:[#allocation10 + $0x240] ss:$16 sps:$4 sm:$0xff]  }
 0x230   : > { %3782 = vmatpush1.bf16.msra.mxu0 %v5620_v57  ;;  %v5718_v57 = vld [vmem:[#allocation10 + $0x384] ss:$16 sps:$4 sm:$0xff]  }
 0x231   : > { %2933 = vmatpush1.bf16.msra.mxu1 %v5566_v12  ;;  %3783 = vmatprep.subr.bf16.mxu0 %v5625_v40  ;;  %v5688_v12 = vld [vmem:[#allocation10 + $0x224] ss:$16 sps:$4 sm:$0xff]   ;;  %v5722_v40 = vld [vmem:[#allocation10 + $0x360] ss:$16 sps:$4 sm:$0xff]  }
 0x232   : > { %2934 = vmatprep.subr.bf16.mxu1 %v5571_v48  ;;  %v5692_v48 = vld [vmem:[#allocation10 + $0x200] ss:$16 sps:$4 sm:$0xff]  }
 0x234   : > { %3784 = vmatpush1.bf16.msra.mxu0 %v5623_v60  ;;  %v5728_v60 = vld [vmem:[#allocation10 + $0x340] ss:$16 sps:$4 sm:$0xff]  }
 0x235   : > { %2935 = vmatpush1.bf16.msra.mxu1 %v5569_v51  ;;  %3785 = vmatprep.subr.bf16.mxu0 %v5628_v61  ;;  %v5700_v51 = vld [vmem:[#allocation10 + $0x3e4] ss:$16 sps:$4 sm:$0xff]  }
 0x236   : > { %2936 = vmatprep.subr.bf16.mxu1 %v5574_v44  ;;  %v5704_v44 = vld [vmem:[#allocation10 + $0x3c0] ss:$16 sps:$4 sm:$0xff]   ;;  %v5736_v61 = vld [vmem:[#allocation10 + $0x324] ss:$16 sps:$4 sm:$0xff]  }
 0x238   : > { %3786 = vmatpush2.bf16.msra.mxu0 %v5626_v0  ;;  %v5740_v0 = vld [vmem:[#allocation10 + $0x300] ss:$16 sps:$4 sm:$0xff]  }
 0x239   : > { %2937 = vmatpush1.bf16.msra.mxu1 %v5572_v55  ;;  %3787 = vmatprep.subr.bf16.mxu0 %v5631_v1  ;;  %v5712_v55 = vld [vmem:[#allocation10 + $0x3a4] ss:$16 sps:$4 sm:$0xff]   ;;  %v5748_v1 = vld [vmem:[#allocation10 + $0x2ec] ss:$16 sps:$4 sm:$0xff]  }
 0x23a   : > { %2938 = vmatprep.subr.bf16.mxu1 %v5577_v56  ;;  %v5716_v56 = vld [vmem:[#allocation10 + $0x380] ss:$16 sps:$4 sm:$0xff]  }
 0x23c   : > { %3788 = vmatpush2.bf16.msra.mxu0 %v5629_v45  ;;  %v6402_v45 = vld [vmem:[%s6484_s4] sm:$0xf] }
 0x23d   : > { %2939 = vmatpush1.bf16.msra.mxu1 %v5575_v58  ;;  %3789 = vmatprep.subr.bf16.mxu0 %v5634_v4  ;;  %v5724_v58 = vld [vmem:[#allocation10 + $0x364] ss:$16 sps:$4 sm:$0xff]  }
 0x23e   : > { %2940 = vmatprep.subr.bf16.mxu1 %v5580_v59  ;;  %v5730_v59 = vld [vmem:[#allocation10 + $0x344] ss:$16 sps:$4 sm:$0xff]  }
 0x240   : > { %3790 = vmatpush2.bf16.msra.mxu0 %v5632_v7 }
 0x241   : > { %2941 = vmatpush2.bf16.msra.mxu1 %v5578_v62  ;;  %3791 = vmatprep.subr.bf16.mxu0 %v5637_v19  ;;  %v5734_v62 = vld [vmem:[#allocation10 + $0x320] ss:$16 sps:$4 sm:$0xff]  }
 0x242   : > { %2942 = vmatprep.subr.bf16.mxu1 %v5583_v63  ;;  %v5742_v63 = vld [vmem:[#allocation10 + $0x304] ss:$16 sps:$4 sm:$0xff]  }
 0x244   : > { %3792 = vmatpush2.bf16.msra.mxu0 %v5635_v22 }
 0x245   : > { %2943 = vmatpush2.bf16.msra.mxu1 %v5581_v2  ;;  %3793 = vmatprep.subr.bf16.mxu0 %v5640_v24 }
 0x246   : > { %2944 = vmatprep.subr.bf16.mxu1 %v5586_v3 }
 0x248   : > { %3794 = vmatpush2.bf16.msra.mxu0 %v5638_v25 }
 0x249   : > { %2945 = vmatpush2.bf16.msra.mxu1 %v5584_v5  ;;  %3795 = vmatprep.subr.bf16.mxu0 %v5643_v27  ;;  %v2142_v5 = vrot.slane %v6402_v45, %v6370_v21 }
 0x24a   : > { %2946 = vmatprep.subr.bf16.mxu1 %v5589_v6  ;;  %v2138_v6 = vrot.slane %v6402_v45, %v6373_v42 }
 0x24c   : > { %3796 = vmatpush2.bf16.msra.mxu0 %v5641_v28 }
 0x24d   : > { %2947 = vmatpush2.bf16.msra.mxu1 %v5587_v8  ;;  %3797 = vmatprep.subr.bf16.mxu0 %v5646_v29 }
 0x24e   : > { %2948 = vmatprep.subr.bf16.mxu1 %v5592_v9 }
 0x250   : > { %3798 = vmatpush2.bf16.msra.mxu0 %v5644_v31 }
 0x251   : > { %2949 = vmatpush2.bf16.msra.mxu1 %v5590_v10  ;;  %3799 = vmatprep.subr.bf16.mxu0 %v5649_v32  ;;  %v5653_v32 = vld [vmem:[#allocation10 + $0xe8] ss:$16 sps:$4 sm:$0xff]  }
 0x252   : > { %2950 = vmatprep.subr.bf16.mxu1 %v5595_v11 }
 0x254   : > { %3800 = vmatpush2.bf16.msra.mxu0 %v5647_v33 }
 0x255   : > { %2951 = vmatpush2.bf16.msra.mxu1 %v5593_v14  ;;  %3855 = vmatprep.subr.bf16.mxu0 %v5655_v15  ;;  %v5667_v15 = vld [vmem:[#allocation10 + $0xac] ss:$16 sps:$4 sm:$0xff]  }
 0x256   : > { %2952 = vmatprep.subr.bf16.mxu1 %v5598_v16 }
 0x259   : > { %2953 = vmatpush2.bf16.msra.mxu1 %v5596_v17 }
 0x25a   : > { %2954 = vmatprep.subr.bf16.mxu1 %v5601_v18 }
 0x25d   : > { %2955 = vmatpush2.bf16.msra.mxu1 %v5599_v20 }
 0x25e   : > { %3812 = vmatprep.subr.bf16.mxu1 %v5652_v35  ;;  %v5659_v35 = vld [vmem:[#allocation10 + $0xc8] ss:$16 sps:$4 sm:$0xff]  }
 0x260   : > { %2957 = vmatmul.mubr.bf16.vlgmr.msra.gmra.mxu1 %v6395_v30  ;;  %v5658_v30 = vld [vmem:[#allocation10 + $0x2c4] ss:$16 sps:$4 sm:$0xff]  }
 0x261   : > { %3813 = vmatpush1.bf16.msra.mxu1 %v5650_v34  ;;  %v5661_v34 = vld [vmem:[#allocation10 + $0xcc] ss:$16 sps:$4 sm:$0xff]  }
 0x262   : > { %3814 = vmatprep.subr.bf16.mxu1 %v5658_v30  ;;  %v5673_v30 = vld [vmem:[#allocation10 + $0x8c] ss:$16 sps:$4 sm:$0xff]  }
 0x265   : > { %3815 = vmatpush1.bf16.msra.mxu1 %v5656_v36  ;;  %v5665_v36 = vld [vmem:[#allocation10 + $0xa8] ss:$16 sps:$4 sm:$0xff]  }
 0x266   : > { %3816 = vmatprep.subr.bf16.mxu1 %v5664_v38  ;;  %v5679_v38 = vld [vmem:[#allocation10 + $0x6c] ss:$16 sps:$4 sm:$0xff]  }
 0x269   : > { %3817 = vmatpush1.bf16.msra.mxu1 %v5662_v37  ;;  %v5671_v37 = vld [vmem:[#allocation10 + $0x88] ss:$16 sps:$4 sm:$0xff]  }
 0x26a   : > { %3818 = vmatprep.subr.bf16.mxu1 %v5670_v13  ;;  %v5685_v13 = vld [vmem:[#allocation10 + $0x4c] ss:$16 sps:$4 sm:$0xff]  }
 0x26d   : > { %3819 = vmatpush1.bf16.msra.mxu1 %v5668_v39  ;;  %v5677_v39 = vld [vmem:[#allocation10 + $0x68] ss:$16 sps:$4 sm:$0xff]  }
 0x26e   : > { %3820 = vmatprep.subr.bf16.mxu1 %v5676_v43  ;;  %v5691_v43 = vld [vmem:[#allocation10 + $0x2c] ss:$16 sps:$4 sm:$0xff]  }
 0x271   : > { %3821 = vmatpush1.bf16.msra.mxu1 %v5674_v41  ;;  %v5683_v41 = vld [vmem:[#allocation10 + $0x48] ss:$16 sps:$4 sm:$0xff]  }
 0x272   : > { %3822 = vmatprep.subr.bf16.mxu1 %v5682_v23  ;;  %v5697_v23 = vld [vmem:[#allocation10 + $0xc] ss:$16 sps:$4 sm:$0xff]  }
 0x275   : > { %3823 = vmatpush1.bf16.msra.mxu1 %v5680_v26  ;;  %v5689_v26 = vld [vmem:[#allocation10 + $0x28] ss:$16 sps:$4 sm:$0xff]  }
 0x276   : > { %3824 = vmatprep.subr.bf16.mxu1 %v5688_v12  ;;  %v5703_v12 = vld [vmem:[#allocation10 + $0x1ec] ss:$16 sps:$4 sm:$0xff]  }
 0x279   : > { %3825 = vmatpush1.bf16.msra.mxu1 %v5686_v54  ;;  %v5695_v54 = vld [vmem:[#allocation10 + $0x8] ss:$16 sps:$4 sm:$0xff]  }
 0x27a   : > { %3826 = vmatprep.subr.bf16.mxu1 %v5694_v49  ;;  %v5709_v49 = vld [vmem:[#allocation10 + $0x1cc] ss:$16 sps:$4 sm:$0xff]  }
 0x27d   : > { %3827 = vmatpush1.bf16.msra.mxu1 %v5692_v48  ;;  %v5701_v48 = vld [vmem:[#allocation10 + $0x1e8] ss:$16 sps:$4 sm:$0xff]  }
 0x27e   : > { %3828 = vmatprep.subr.bf16.mxu1 %v5700_v51  ;;  %v5715_v51 = vld [vmem:[#allocation10 + $0x1ac] ss:$16 sps:$4 sm:$0xff]  }
 0x281   : > { %3829 = vmatpush2.bf16.msra.mxu1 %v5698_v50  ;;  %v5707_v50 = vld [vmem:[#allocation10 + $0x1c8] ss:$16 sps:$4 sm:$0xff]  }
 0x282   : > { %3830 = vmatprep.subr.bf16.mxu1 %v5706_v52  ;;  %v5721_v52 = vld [vmem:[#allocation10 + $0x18c] ss:$16 sps:$4 sm:$0xff]  }
 0x285   : > { %3831 = vmatpush2.bf16.msra.mxu1 %v5704_v44  ;;  %v5713_v44 = vld [vmem:[#allocation10 + $0x1a8] ss:$16 sps:$4 sm:$0xff]  }
 0x286   : > { %3832 = vmatprep.subr.bf16.mxu1 %v5712_v55  ;;  %v5719_v55 = vld [vmem:[#allocation10 + $0x188] ss:$16 sps:$4 sm:$0xff]  }
 0x289   : > { %3833 = vmatpush2.bf16.msra.mxu1 %v5710_v53 }
 0x28a   : > { %3834 = vmatprep.subr.bf16.mxu1 %v5718_v57 }
 0x28d   : > { %3835 = vmatpush2.bf16.msra.mxu1 %v5716_v56  ;;  %v5727_v56 = vld [vmem:[#allocation10 + $0x16c] ss:$16 sps:$4 sm:$0xff]  }
 0x28e   : > { %3836 = vmatprep.subr.bf16.mxu1 %v5724_v58  ;;  %v5733_v58 = vld [vmem:[#allocation10 + $0x14c] ss:$16 sps:$4 sm:$0xff]  }
 0x291   : > { %3837 = vmatpush2.bf16.msra.mxu1 %v5722_v40  ;;  %v5725_v40 = vld [vmem:[#allocation10 + $0x168] ss:$16 sps:$4 sm:$0xff]  }
 0x292   : > { %3838 = vmatprep.subr.bf16.mxu1 %v5730_v59 }
 0x295   : > { %3839 = vmatpush2.bf16.msra.mxu1 %v5728_v60  ;;  %v2150_v60 = vrot.slane %v6402_v45, %v6385_v46 }
 0x296   : > { %3840 = vmatprep.subr.bf16.mxu1 %v5736_v61  ;;  %v5731_v61 = vld [vmem:[#allocation10 + $0x148] ss:$16 sps:$4 sm:$0xff]  }
 0x297   : > { %v2829_v2 = vpop.f32.mrf.mxu0 }
 0x298   : > { %v2830_v14 = vadd.f32 %v2829_v2, %v2138_v6 }
 0x299   : > { %3841 = vmatpush2.bf16.msra.mxu1 %v5734_v62  ;;  %v2831_v3 = vpop.f32.mrf.mxu0  ;;  %v2146_v62 = vrot.slane %v6402_v45, %v6388_v47  ;;  %v5743_v45 = vld [vmem:[#allocation10 + $0x108] ss:$16 sps:$4 sm:$0xff]  }
 0x29a   : > { %3842 = vmatprep.subr.bf16.mxu1 %v5742_v63  ;;  %v2832_v10 = vadd.f32 %v2831_v3, %v2142_v5 }
 0x29b   : > { %v2833_v4 = vpop.f32.mrf.mxu0 }
 0x29c   : > { %v2834_v11 = vadd.f32 %v2833_v4, %v2138_v6 }
 0x29d   : > { %3843 = vmatpush2.bf16.msra.mxu1 %v5740_v0  ;;  %v2835_v8 = vpop.f32.mrf.mxu0  ;;  %v5739_v0 = vld [vmem:[#allocation10 + $0x12c] ss:$16 sps:$4 sm:$0xff]  }
 0x29e   : > { %3898 = vmatprep.subr.bf16.mxu1 %v5748_v1  ;;  %v2836_v17 = vadd.f32 %v2835_v8, %v2142_v5  ;;  %v5737_v5 = vld [vmem:[#allocation10 + $0x128] ss:$16 sps:$4 sm:$0xff]   ;;  %v5745_v8 = vld [vmem:[#allocation10 + $0x10c] ss:$16 sps:$4 sm:$0xff]  }
 0x2d7   : > { %v2915_v53 = vpop.f32.mrf.mxu0 }
 0x2d8   : > { %v2916_v6 = vadd.f32 %v2915_v53, %v2146_v62  ;;  %v5775_v53 = vld [vmem:[#allocation10 + $0x3cc] ss:$16 sps:$4 sm:$0xff]  }
 0x2d9   : > { %v2917_v57 = vpop.f32.mrf.mxu0 }
 0x2da   : > { %v2918_v3 = vadd.f32 %v2917_v57, %v2150_v60  ;;  %v5776_v57 = vld [vmem:[#allocation10 + $0x3a8] ss:$16 sps:$4 sm:$0xff]  }
 0x2db   : > { %v2919_v59 = vpop.f32.mrf.mxu0 }
 0x2dc   : > { %v2920_v4 = vadd.f32 %v2919_v59, %v2146_v62  ;;  %v5784_v59 = vld [vmem:[#allocation10 + $0x36c] ss:$16 sps:$4 sm:$0xff]   ;;  %v5785_v62 = vld [vmem:[#allocation10 + $0x348] ss:$16 sps:$4 sm:$0xff]  }
 0x2dd   : > { %v2921_v1 = vpop.f32.mrf.mxu0 }
 0x2e0   : > { %v2872_v7 = vpop.f32.mrf.mxu1 }
 0x2e1   : > { %v2873_v20 = vadd.f32 %v2872_v7, %v2830_v14 }
 0x2e2   : > { %v2874_v9 = vpop.f32.mrf.mxu1 }
 0x2e3   : > { %v2875_v18 = vadd.f32 %v2874_v9, %v2832_v10  ;;  %v2967_v29 = vmax.f32 %v2873_v20, 0.0  ;;  %v2922_v9 = vadd.f32 %v2921_v1, %v2150_v60  ;;  %v5782_v60 = vld [vmem:[#allocation10 + $0x368] ss:$16 sps:$4 sm:$0xff]   ;;  %v5793_v1 = vld [vmem:[#allocation10 + $0x30c] ss:$16 sps:$4 sm:$0xff]  }
 0x2e4   : > { %v2876_v16 = vpop.f32.mrf.mxu1 }
 0x2e5   : > { %v2877_v19 = vadd.f32 %v2876_v16, %v2834_v11  ;;  %v2968_v27 = vmax.f32 %v2875_v18, 0.0 }
 0x2e6   : > { %v2878_v22 = vpop.f32.mrf.mxu1 }
 0x2e7   : > { %v2879_v24 = vadd.f32 %v2878_v22, %v2836_v17  ;;  %v2971_v25 = vmax.f32 %v2877_v19, 0.0 }
 0x2e9   : > { %v2972_v28 = vmax.f32 %v2879_v24, 0.0  ;;  %v6408_v33 = vpack.c.bf16 %v2971_v25, %v2967_v29  ;;  %v5746_v25 = vld [vmem:[#allocation10 + $0x2e8] ss:$16 sps:$4 sm:$0xff]  }
 0x2ea   : > { %v5749_v29 = vld [vmem:[#allocation10 + $0x2c8] ss:$16 sps:$4 sm:$0xff]  }
 0x2eb   : > { %v2976_v31 = vpack.c.bf16 %v2972_v28, %v2968_v27  ;;  %v5751_v28 = vld [vmem:[#allocation10 + $0x2cc] ss:$16 sps:$4 sm:$0xff]  }
 0x2ed   : > { %3801 = vmatprep.mubr.bf16.mxu0 %v2976_v31 }
 0x2ee   : > { %3802 = vmatmul.mubr.bf16.vlgmr.msra.gmra.mxu0 %v6408_v33 }
 0x2ef   : > { %3856 = vmatpush1.bf16.msra.mxu0 %v5653_v32  ;;  %3887 = vmatprep.mubr.bf16.mxu0 %v2976_v31  ;;  %v5754_v31 = vld [vmem:[#allocation10 + $0x2ac] ss:$16 sps:$4 sm:$0xff]   ;;  %v5752_v32 = vld [vmem:[#allocation10 + $0x2a8] ss:$16 sps:$4 sm:$0xff]  }
 0x2f0   : > { %3857 = vmatprep.subr.bf16.mxu0 %v5661_v34  ;;  %v5757_v34 = vld [vmem:[#allocation10 + $0x28c] ss:$16 sps:$4 sm:$0xff]  }
 0x2f3   : > { %3858 = vmatpush1.bf16.msra.mxu0 %v5659_v35  ;;  %v5794_v35 = vld [vmem:[#allocation11 + $0x78] sm:$0xff]  }
 0x2f4   : > { %3859 = vmatprep.subr.bf16.mxu0 %v5667_v15  ;;  %v5795_v15 = vld [vmem:[#allocation11 + $0x38] sm:$0xff]  }
 0x2f7   : > { %3860 = vmatpush1.bf16.msra.mxu0 %v5665_v36  ;;  %v5796_v36 = vld [vmem:[#allocation11 + $0x70] sm:$0xff]  }
 0x2f8   : > { %3861 = vmatprep.subr.bf16.mxu0 %v5673_v30  ;;  %v5755_v30 = vld [vmem:[#allocation10 + $0x288] ss:$16 sps:$4 sm:$0xff]  }
 0x2fb   : > { %3862 = vmatpush1.bf16.msra.mxu0 %v5671_v37  ;;  %v5760_v37 = vld [vmem:[#allocation10 + $0x26c] ss:$16 sps:$4 sm:$0xff]  }
 0x2fc   : > { %3863 = vmatprep.subr.bf16.mxu0 %v5679_v38  ;;  %v5797_v38 = vld [vmem:[#allocation11 + $0x30] sm:$0xff]  }
 0x2ff   : > { %3864 = vmatpush1.bf16.msra.mxu0 %v5677_v39  ;;  %v5758_v39 = vld [vmem:[#allocation10 + $0x268] ss:$16 sps:$4 sm:$0xff]  }
 0x300   : > { %3865 = vmatprep.subr.bf16.mxu0 %v5685_v13  ;;  %v5763_v13 = vld [vmem:[#allocation10 + $0x24c] ss:$16 sps:$4 sm:$0xff]  }
 0x303   : > { %3866 = vmatpush1.bf16.msra.mxu0 %v5683_v41  ;;  %v5799_v41 = vld [vmem:[#allocation11 + $0x28] sm:$0xff]  }
 0x304   : > { %3867 = vmatprep.subr.bf16.mxu0 %v5691_v43  ;;  %v5800_v43 = vld [vmem:[#allocation11 + $0x60] sm:$0xff]  }
 0x307   : > { %3868 = vmatpush1.bf16.msra.mxu0 %v5689_v26  ;;  %v5761_v26 = vld [vmem:[#allocation10 + $0x248] ss:$16 sps:$4 sm:$0xff]  }
 0x308   : > { %3869 = vmatprep.subr.bf16.mxu0 %v5697_v23  ;;  %v5766_v23 = vld [vmem:[#allocation10 + $0x22c] ss:$16 sps:$4 sm:$0xff]  }
 0x30b   : > { %3870 = vmatpush1.bf16.msra.mxu0 %v5695_v54  ;;  %v5801_v54 = vld [vmem:[#allocation11 + $0x20] sm:$0xff]  }
 0x30c   : > { %3871 = vmatprep.subr.bf16.mxu0 %v5703_v12  ;;  %v5802_v12 = vld [vmem:[#allocation11 + $0x58] sm:$0xff]  }
 0x30f   : > { %3872 = vmatpush2.bf16.msra.mxu0 %v5701_v48  ;;  %v5764_v48 = vld [vmem:[#allocation10 + $0x228] ss:$16 sps:$4 sm:$0xff]  }
 0x310   : > { %3873 = vmatprep.subr.bf16.mxu0 %v5709_v49  ;;  %v5769_v49 = vld [vmem:[#allocation10 + $0x20c] ss:$16 sps:$4 sm:$0xff]  }
 0x313   : > { %3874 = vmatpush2.bf16.msra.mxu0 %v5707_v50  ;;  %v5803_v50 = vld [vmem:[#allocation11 + $0x18] sm:$0xff]  }
 0x314   : > { %3875 = vmatprep.subr.bf16.mxu0 %v5715_v51  ;;  %v5767_v51 = vld [vmem:[#allocation10 + $0x208] ss:$16 sps:$4 sm:$0xff]  }
 0x317   : > { %3876 = vmatpush2.bf16.msra.mxu0 %v5713_v44  ;;  %v5772_v44 = vld [vmem:[#allocation10 + $0x3ec] ss:$16 sps:$4 sm:$0xff]  }
 0x318   : > { %3877 = vmatprep.subr.bf16.mxu0 %v5721_v52  ;;  %v5770_v52 = vld [vmem:[#allocation10 + $0x3e8] ss:$16 sps:$4 sm:$0xff]  }
 0x31b   : > { %3878 = vmatpush2.bf16.msra.mxu0 %v5719_v55  ;;  %v5773_v55 = vld [vmem:[#allocation10 + $0x3c8] ss:$16 sps:$4 sm:$0xff]  }
 0x31c   : > { %3879 = vmatprep.subr.bf16.mxu0 %v5727_v56  ;;  %v5778_v56 = vld [vmem:[#allocation10 + $0x3ac] ss:$16 sps:$4 sm:$0xff]  }
 0x31f   : > { %3880 = vmatpush2.bf16.msra.mxu0 %v5725_v40  ;;  %v5781_v40 = vld [vmem:[#allocation10 + $0x38c] ss:$16 sps:$4 sm:$0xff]  }
 0x320   : > { %v2958_v63 = vpop.f32.mrf.mxu1  ;;  %3881 = vmatprep.subr.bf16.mxu0 %v5733_v58  ;;  %v5779_v58 = vld [vmem:[#allocation10 + $0x388] ss:$16 sps:$4 sm:$0xff]  }
 0x321   : > { %v2959_v14 = vadd.f32 %v2958_v63, %v2916_v6  ;;  %v5790_v63 = vld [vmem:[#allocation10 + $0x32c] ss:$16 sps:$4 sm:$0xff]  }
 0x322   : > { %v2960_v2 = vpop.f32.mrf.mxu1  ;;  %v5807_v6 = vld [vmem:[#allocation11 + $0x8] sm:$0xff]  }
 0x323   : > { %3882 = vmatpush2.bf16.msra.mxu0 %v5731_v61  ;;  %v2961_v10 = vadd.f32 %v2960_v2, %v2918_v3  ;;  %v2969_v22 = vmax.f32 %v2959_v14, 0.0  ;;  %v5787_v61 = vld [vmem:[#allocation10 + $0x34c] ss:$16 sps:$4 sm:$0xff]   ;;  %v5791_v2 = vld [vmem:[#allocation10 + $0x308] ss:$16 sps:$4 sm:$0xff]   ;;  %v5804_v3 = vld [vmem:[#allocation11 + $0x50] sm:$0xff]  }
 0x324   : > { %v2962_v7 = vpop.f32.mrf.mxu1  ;;  %3883 = vmatprep.subr.bf16.mxu0 %v5739_v0  ;;  %v5788_v0 = vld [vmem:[#allocation10 + $0x328] ss:$16 sps:$4 sm:$0xff]   ;;  %v5813_v14 = vld [vmem:[#allocation11 + $0xb0] sm:$0xff]  }
 0x325   : > { %v2963_v11 = vadd.f32 %v2962_v7, %v2920_v4  ;;  %v2970_v19 = vmax.f32 %v2961_v10, 0.0  ;;  %v5805_v4 = vld [vmem:[#allocation11 + $0x10] sm:$0xff]   ;;  %v5808_v7 = vld [vmem:[#allocation11 + $0x40] sm:$0xff]   ;;  %v5811_v10 = vld [vmem:[#allocation11 + $0xb8] sm:$0xff]  }
 0x326   : > { %v2964_v16 = vpop.f32.mrf.mxu1 }
 0x327   : > { %v2965_v17 = vadd.f32 %v2964_v16, %v2922_v9  ;;  %3884 = vmatpush2.bf16.msra.mxu0 %v5737_v5  ;;  %v2973_v18 = vmax.f32 %v2963_v11, 0.0  ;;  %v5806_v5 = vld [vmem:[#allocation11 + $0x48] sm:$0xff]   ;;  %v5810_v9 = vld [vmem:[#allocation11 + $0xf8] sm:$0xff]   ;;  %v5812_v11 = vld [vmem:[#allocation11 + $0xf0] sm:$0xff]  }
 0x328   : > { %3885 = vmatprep.subr.bf16.mxu0 %v5745_v8  ;;  %v5809_v8 = vld [vmem:[#allocation11] sm:$0xff]   ;;  %v5814_v16 = vld [vmem:[#allocation11 + $0xe8] sm:$0xff]  }
 0x329   : > { %v2974_v20 = vmax.f32 %v2965_v17, 0.0  ;;  %v6415_v27 = vpack.c.bf16 %v2973_v18, %v2969_v22  ;;  %v5815_v17 = vld [vmem:[#allocation11 + $0xa8] sm:$0xff]   ;;  %v5817_v18 = vld [vmem:[#allocation11 + $0xa0] sm:$0xff]   ;;  %v5820_v22 = vld [vmem:[#allocation11 + $0xd0] sm:$0xff]  }
 0x32b   : > { %v2978_v24 = vpack.c.bf16 %v2974_v20, %v2970_v19  ;;  %3886 = vmatpush2.bf16.msra.mxu0 %v5743_v45  ;;  %v5816_v45 = vld [vmem:[#allocation11 + $0xe0] sm:$0xff]   ;;  %v5818_v19 = vld [vmem:[#allocation11 + $0xd8] sm:$0xff]  }
 0x32c   : > { %4963 = vmatprep.subr.bf16.mxu0 %v5794_v35  ;;  %v5819_v20 = vld [vmem:[#allocation11 + $0x98] sm:$0xff]  }
 0x32d   : > { %3844 = vmatprep.mubr.bf16.mxu1 %v2978_v24 }
 0x32e   : > { %3845 = vmatmul.mubr.bf16.vlgmr.msra.gmra.mxu1 %v6415_v27  ;;  %3888 = vmatmul.mubr.bf16.vlgmr.msra.gmra.mxu0 %v6408_v33  ;;  %v5798_v33 = vld [vmem:[#allocation11 + $0x68] sm:$0xff]  }
 0x32f   : > { %3899 = vmatpush1.bf16.msra.mxu1 %v5746_v25  ;;  %3930 = vmatprep.mubr.bf16.mxu1 %v2978_v24  ;;  %v5821_v24 = vld [vmem:[#allocation11 + $0x90] sm:$0xff]   ;;  %v5822_v25 = vld [vmem:[#allocation11 + $0xc8] sm:$0xff]  }
 0x330   : > { %3900 = vmatprep.subr.bf16.mxu1 %v5751_v28  ;;  %4964 = vmatpush3.bf16.msra.mxu0 %v5795_v15  ;;  %v5824_v28 = vld [vmem:[#allocation11 + $0xc0] sm:$0xff]  }
 0x331   : > { %4965 = vmatprep.subr.bf16.mxu0 %v5796_v36 }
 0x333   : > { %3901 = vmatpush1.bf16.msra.mxu1 %v5749_v29  ;;  %v5825_v29 = vld [vmem:[#allocation11 + $0x80] sm:$0xff]  }
 0x334   : > { %3902 = vmatprep.subr.bf16.mxu1 %v5754_v31  ;;  %4966 = vmatpush3.bf16.msra.mxu0 %v5797_v38 }
 0x335   : > { %4967 = vmatprep.subr.bf16.mxu0 %v5798_v33 }
 0x337   : > { %3903 = vmatpush1.bf16.msra.mxu1 %v5752_v32 }
 0x338   : > { %3904 = vmatprep.subr.bf16.mxu1 %v5757_v34  ;;  %4968 = vmatpush3.bf16.msra.mxu0 %v5799_v41  ;;  %v3107_v34 = vld [vmem:[%s6486_s6] sm:$0xf] }
 0x339   : > { %4969 = vmatprep.subr.bf16.mxu0 %v5800_v43  ;;  %v3116_v15 = vrot.slane %v3107_v34, %v6370_v21  ;;  %v3112_v36 = vrot.slane %v3107_v34, %v6373_v42 }
 0x33b   : > { %3905 = vmatpush1.bf16.msra.mxu1 %v5755_v30 }
 0x33c   : > { %3906 = vmatprep.subr.bf16.mxu1 %v5760_v37  ;;  %4970 = vmatpush3.bf16.msra.mxu0 %v5801_v54 }
 0x33d   : > { %4971 = vmatprep.subr.bf16.mxu0 %v5802_v12 }
 0x33f   : > { %3907 = vmatpush1.bf16.msra.mxu1 %v5758_v39 }
 0x340   : > { %3908 = vmatprep.subr.bf16.mxu1 %v5763_v13  ;;  %4972 = vmatpush3.bf16.msra.mxu0 %v5803_v50 }
 0x341   : > { %4973 = vmatprep.subr.bf16.mxu0 %v5804_v3 }
 0x343   : > { %3909 = vmatpush1.bf16.msra.mxu1 %v5761_v26 }
 0x344   : > { %3910 = vmatprep.subr.bf16.mxu1 %v5766_v23  ;;  %4974 = vmatpush3.bf16.msra.mxu0 %v5805_v4 }
 0x345   : > { %4975 = vmatprep.subr.bf16.mxu0 %v5806_v5 }
 0x347   : > { %3911 = vmatpush1.bf16.msra.mxu1 %v5764_v48 }
 0x348   : > { %3912 = vmatprep.subr.bf16.mxu1 %v5769_v49  ;;  %4976 = vmatpush3.bf16.msra.mxu0 %v5807_v6 }
 0x349   : > { %4977 = vmatprep.subr.bf16.mxu0 %v5808_v7 }
 0x34b   : > { %3913 = vmatpush1.bf16.msra.mxu1 %v5767_v51 }
 0x34c   : > { %3914 = vmatprep.subr.bf16.mxu1 %v5772_v44  ;;  %4978 = vmatpush3.bf16.msra.mxu0 %v5809_v8 }
 0x34f   : > { %3915 = vmatpush2.bf16.msra.mxu1 %v5770_v52 }
 0x350   : > { %3916 = vmatprep.subr.bf16.mxu1 %v5775_v53 }
 0x353   : > { %3917 = vmatpush2.bf16.msra.mxu1 %v5773_v55 }
 0x354   : > { %3918 = vmatprep.subr.bf16.mxu1 %v5778_v56  ;;  %v3124_v56 = vrot.slane %v3107_v34, %v6385_v46 }
 0x357   : > { %3919 = vmatpush2.bf16.msra.mxu1 %v5776_v57  ;;  %v3120_v57 = vrot.slane %v3107_v34, %v6388_v47 }
 0x358   : > { %3920 = vmatprep.subr.bf16.mxu1 %v5781_v40 }
 0x35b   : > { %3921 = vmatpush2.bf16.msra.mxu1 %v5779_v58 }
 0x35c   : > { %3922 = vmatprep.subr.bf16.mxu1 %v5784_v59 }
 0x35f   : > { %3923 = vmatpush2.bf16.msra.mxu1 %v5782_v60 }
 0x360   : > { %3924 = vmatprep.subr.bf16.mxu1 %v5787_v61 }
 0x363   : > { %3925 = vmatpush2.bf16.msra.mxu1 %v5785_v62 }
 0x364   : > { %3926 = vmatprep.subr.bf16.mxu1 %v5790_v63 }
 0x367   : > { %3927 = vmatpush2.bf16.msra.mxu1 %v5788_v0 }
 0x368   : > { %3928 = vmatprep.subr.bf16.mxu1 %v5793_v1 }
 0x36b   : > { %3929 = vmatpush2.bf16.msra.mxu1 %v5791_v2 }
 0x36c   : > { %4985 = vmatprep.subr.bf16.mxu1 %v5810_v9 }
 0x36e   : > { %3931 = vmatmul.mubr.bf16.vlgmr.msra.gmra.mxu1 %v6415_v27  ;;  %v5823_v27 = vld [vmem:[#allocation11 + $0x88] sm:$0xff]  }
 0x36f   : > { %4986 = vmatpush3.bf16.msra.mxu1 %v5811_v10 }
 0x370   : > { %4987 = vmatprep.subr.bf16.mxu1 %v5812_v11 }
 0x373   : > { %4988 = vmatpush3.bf16.msra.mxu1 %v5813_v14 }
 0x374   : > { %4989 = vmatprep.subr.bf16.mxu1 %v5814_v16 }
 0x377   : > { %4990 = vmatpush3.bf16.msra.mxu1 %v5815_v17 }
 0x378   : > { %4991 = vmatprep.subr.bf16.mxu1 %v5816_v45 }
 0x37b   : > { %4992 = vmatpush3.bf16.msra.mxu1 %v5817_v18 }
 0x37c   : > { %4993 = vmatprep.subr.bf16.mxu1 %v5818_v19 }
 0x37f   : > { %4994 = vmatpush3.bf16.msra.mxu1 %v5819_v20  ;;  %v4915_v20 = vld [vmem:[%s6488_s8] ss:$0 sm:$0xff] }
 0x380   : > { %4995 = vmatprep.subr.bf16.mxu1 %v5820_v22 }
 0x383   : > { %4996 = vmatpush3.bf16.msra.mxu1 %v5821_v24 }
 0x384   : > { %4997 = vmatprep.subr.bf16.mxu1 %v5822_v25 }
 0x387   : > { %4998 = vmatpush3.bf16.msra.mxu1 %v5823_v27 }
 0x388   : > { %4999 = vmatprep.subr.bf16.mxu1 %v5824_v28 }
 0x38b   : > { %5000 = vmatpush3.bf16.msra.mxu1 %v5825_v29 }
 0x3ae   : > { %v3803_v31 = vpop.f32.mrf.mxu0 }
 0x3af   : > { %v3804_v13 = vadd.f32 %v3803_v31, %v3112_v36 }
 0x3b0   : > { %v3805_v32 = vpop.f32.mrf.mxu0 }
 0x3b1   : > { %v3806_v33 = vadd.f32 %v3805_v32, %v3116_v15 }
 0x3b2   : > { %v3807_v35 = vpop.f32.mrf.mxu0 }
 0x3b3   : > { %v3808_v39 = vadd.f32 %v3807_v35, %v3112_v36 }
 0x3b4   : > { %v3809_v37 = vpop.f32.mrf.mxu0 }
 0x3b5   : > { %v3810_v43 = vadd.f32 %v3809_v37, %v3116_v15 }
 0x3ee   : > { %v3846_v30 = vpop.f32.mrf.mxu1  ;;  %v3889_v42 = vpop.f32.mrf.mxu0 }
 0x3ef   : > { %v3847_v54 = vadd.f32 %v3846_v30, %v3804_v13  ;;  %v3890_v62 = vadd.f32 %v3889_v42, %v3120_v57 }
 0x3f0   : > { %v3848_v38 = vpop.f32.mrf.mxu1  ;;  %v3891_v53 = vpop.f32.mrf.mxu0 }
 0x3f1   : > { %v3849_v26 = vadd.f32 %v3848_v38, %v3806_v33  ;;  %v3941_v44 = vmax.f32 %v3847_v54, 0.0  ;;  %v3892_v60 = vadd.f32 %v3891_v53, %v3124_v56 }
 0x3f2   : > { %v3850_v41 = vpop.f32.mrf.mxu1  ;;  %v3893_v55 = vpop.f32.mrf.mxu0 }
 0x3f3   : > { %v3851_v23 = vadd.f32 %v3850_v41, %v3808_v39  ;;  %v3942_v50 = vmax.f32 %v3849_v26, 0.0  ;;  %v3894_v61 = vadd.f32 %v3893_v55, %v3120_v57 }
 0x3f4   : > { %v3852_v12 = vpop.f32.mrf.mxu1  ;;  %v3895_v58 = vpop.f32.mrf.mxu0 }
 0x3f5   : > { %v3853_v48 = vadd.f32 %v3852_v12, %v3810_v43  ;;  %v3945_v49 = vmax.f32 %v3851_v23, 0.0  ;;  %v3896_v0 = vadd.f32 %v3895_v58, %v3124_v56 }
 0x3f7   : > { %v3946_v51 = vmax.f32 %v3853_v48, 0.0  ;;  %v3949_v52 = vpack.c.bf16 %v3945_v49, %v3941_v44 }
 0x3f9   : > { %v3950_v21 = vpack.c.bf16 %v3946_v51, %v3942_v50 }
 0x3fb   : > { %4248 = vmatprep.mubr.bf16.mxu0 %v3950_v21 }
 0x3fc   : > { %4249 = vmatmul.mubr.bf16.vlgmr.msra.gmra.mxu0 %v3949_v52 }
 0x42e   : > { %v3932_v40 = vpop.f32.mrf.mxu1 }
 0x42f   : > { %v3933_v3 = vadd.f32 %v3932_v40, %v3890_v62 }
 0x430   : > { %v3934_v59 = vpop.f32.mrf.mxu1 }
 0x431   : > { %v3935_v1 = vadd.f32 %v3934_v59, %v3892_v60  ;;  %v3943_v46 = vmax.f32 %v3933_v3, 0.0 }
 0x432   : > { %v3936_v63 = vpop.f32.mrf.mxu1 }
 0x433   : > { %v3937_v2 = vadd.f32 %v3936_v63, %v3894_v61  ;;  %v3944_v7 = vmax.f32 %v3935_v1, 0.0 }
 0x434   : > { %v3938_v4 = vpop.f32.mrf.mxu1 }
 0x435   : > { %v3939_v5 = vadd.f32 %v3938_v4, %v3896_v0  ;;  %v3947_v6 = vmax.f32 %v3937_v2, 0.0 }
 0x437   : > { %v3948_v8 = vmax.f32 %v3939_v5, 0.0  ;;  %v3951_v47 = vpack.c.bf16 %v3947_v6, %v3943_v46 }
 0x439   : > { %v3952_v9 = vpack.c.bf16 %v3948_v8, %v3944_v7 }
 0x43b   : > { %4289 = vmatprep.mubr.bf16.mxu1 %v3952_v9 }
 0x43c   : > { %4290 = vmatmul.mubr.bf16.vlgmr.msra.gmra.mxu1 %v3951_v47 }
 0x4bc   : > { %v4979_v10 = vpop.f32.mrf.mxu0 }
 0x4be   : > { %v4980_v11 = vpop.f32.mrf.mxu0 }
 0x4bf   : > { %v4981_v18 = vadd.f32 %v4980_v11, %v4979_v10 }
 0x4c0   : > { %v4982_v14 = vpop.f32.mrf.mxu0 }
 0x4c1   : > { %v4251_v27 = vadd.f32 %v4981_v18, %v4915_v20 }
 0x4c2   : > { %v4983_v16 = vpop.f32.mrf.mxu0 }
 0x4c3   : > { %v4984_v19 = vadd.f32 %v4983_v16, %v4982_v14 }
 0x4c5   : > { %v4254_v28 = vadd.f32 %v4984_v19, %v4915_v20 }
 0x4fc   : > { %v5001_v17 = vpop.f32.mrf.mxu1 }
 0x4fe   : > { %v5002_v45 = vpop.f32.mrf.mxu1 }
 0x4ff   : > { %v5003_v24 = vadd.f32 %v5002_v45, %v5001_v17 }
 0x500   : > { %v5004_v22 = vpop.f32.mrf.mxu1 }
 0x501   : > { %v4292_v31 = vadd.f32 %v5003_v24, %v4251_v27 }
 0x502   : > { %v5005_v25 = vpop.f32.mrf.mxu1 }
 0x503   : > { %v5006_v29 = vadd.f32 %v5005_v25, %v5004_v22 }
 0x505   : > { %v4295_v32 = vadd.f32 %v5006_v29, %v4254_v28 }
 0x507   : > { %v4961_v34 = vpack.c.bf16 %v4295_v32, %v4292_v31 }
 0x509   : > { %4962 = vst [vmem:[%s422_s2] sm:$0xff] %v4961_v34  }
 0x50a   : > { %5997 = shalt.err (!%p5994_p3)
}
 0x50b   : > { %s5998_s25 = scalar_lea.hbm %s6435_s24, 128  ;;  %s6002_s29 = scalar_lea.hbm %s6489_s9, 256 }
 0x50c   : > { %p5999_p4 = scmp.ne.s32.totalorder %s6435_s24, %s5998_s25  ;;  %p6003_p2 = scmp.lt.s32.totalorder %s6435_s24, %s6489_s9 }
 0x50d   : > { %p6004_p5 = scmp.lt.s32.totalorder %s6002_s29, %s5998_s25 }
 0x50e   : > { %p6000_p12 = pnand %p5999_p4, %p6515_p11 }
 0x50f   : > { %p6005_p8 = por %p6004_p5, %p6003_p2 }
 0x510   : > { %p6001_p6 = pneg %p6000_p12 }
 0x512   : > { %p6006_p10 = pnand %p6005_p8, %p6001_p6 }
 0x514   : > { %6009 = shalt.err (!%p6006_p10)
}
 0x515   : > { %s6076_s3 = smov 64   ;;  %s6077_s22 = smov 4  }
 0x516   : > { %5032 = dma.vmem_to_hbm [thread:$0]  (%p6515_p11), %s6437_s1, 128, %s6435_s24, %s4309_s28, %s6076_s3, %s6076_s3, %s6077_s22  }
 0x517 PF: > { %s4337_s16 = sand.u32 1, %s6048_s30   ;;  %p6516_p0 = scmp.ne.s32.totalorder %s6505_s21, 0 }
 0x518   : > { %p6517_p13 = scmp.ge.s32.totalorder %s6060_s12, 2  ;;  %s4338_s15 = scalar_lea.sflag [#allocation4], %s4337_s16 }
 0x51a   : > { %p5055_p7 = pnand %p6517_p13, %p6516_p0 }
 0x51c   : > { %p5056_p9 = pneg %p5055_p7 }
 0x51e   : > { %6043 = dma.done.wait (%p5056_p9), %s4338_s15, 128  }
 0x51f   : > { %6045 = vsyncadd (%p5056_p9), %s4338_s15, 4294967168  ;;  %p25_p1 = scmp.ge.s32.totalorder %s6233_s20, 4   ;;  %s6518_s30 = smov %s6052_s10 }
 0x520   : > { %s6519_s10 = smov %s6056_s11  ;;  %s6520_s11 = smov %s6245_s26 }
 0x521   : > { %s6521_s12 = smov %s6233_s20  ;;  %27 = sbr.rel (!%p25_p1) target bundleno = 12 (0xc), region = 121 }
 0x526   :  { %4343 = vsyncpa [#allocation3], 1 }
 0x527   :  { %4345 = vsyncpa [#allocation3 + $0x1], 1 }
 0x528   :  { %4346 = vsyncpa [#allocation6], 1 }
 0x529   :  { %4347 = vsyncpa [#allocation9], 1 }
 0x52a   :  { %4348 = vsyncpa [#allocation12], 1 }
 0x52b   :  { %4349 = vsyncpa [#allocation4], 1 }
 0x52c   :  { %4351 = vsyncpa [#allocation4 + $0x1], 1 }

</bundles_post_ra>
